<compile_context>
chip_gen: v7x
topology: tpu7x:2x2x1
jax: 0.10.0
libtpu: 0.0.40
codegen_flags: <defaults>
</compile_context>

<pallas_src>
from functools import partial

import jax
import jax.numpy as jnp
import numpy as np
from jax.experimental import pallas as pl
from jax.experimental.pallas import tpu as pltpu

# Hyper-params consistent with MetadataModel(vocab, hidden, n_filters, [3, 5])
VOCAB = 64
HIDDEN = 32                  # hidden_size (embedding dim)
NUM_FILTERS = 8              # number_filters (conv out-channels per filter size)
FILTER_SIZES = (3, 5)
SEQ_LEN = 8                  # length of x.metadata
TOTAL_COLS = sum(FILTER_SIZES) * NUM_FILTERS   # 3*F + 5*F = 64 packed matmul columns
OUT_DIM = 2 * NUM_FILTERS                      # concat of the two pooled branches = 16
K_PAD = VOCAB + 8                              # one-hot K: vocab + 1 bias column, padded to 72

BATCH = 128                  # independent sequences per call (x.metadata rows)


def metadata_kernel(tok_ref, params_ref, out_ref):
    """One batch tile.
    tok_ref:    (SEQ, TB, 1) int32   — time-major token ids
    params_ref: (K_PAD, 8F)  bf16    — folded emb@W table + bias row (+ zero pad)
    out_ref:    (2F, TB)     f32     — lane-dense transposed output tile
    """
    seq, tb, _ = tok_ref.shape

    # --- embedding gather as a one-hot MXU matmul, fused with both convs + bias ----
    ids = tok_ref[...]                                               # (SEQ, TB, 1) int32
    iota = jax.lax.broadcasted_iota(jnp.int32, (seq, tb, K_PAD), 2)
    # column `v` matches the token id; column VOCAB is the always-1 bias column;
    # columns > VOCAB stay 0 (matching zero pad rows in params).
    one_hot = ((iota == ids) | (iota == VOCAB)).astype(jnp.bfloat16)  # exact in bf16
    one_hot = one_hot.reshape(seq * tb, K_PAD)       # collapse leading dims: tb % 8 == 0 -> free

    w = params_ref[...]                                               # (K_PAD, 8F) bf16
    y = jnp.dot(one_hot, w, preferred_element_type=jnp.float32)       # (SEQ*TB, 8F) f32
    y = y.reshape(seq, tb, TOTAL_COLS)                                # split leading dim: free

    # --- per-branch tap combination + time max-pool (time = leading, untiled axis) ---
    # Taps are tile-aligned slices along axis 0 (no sublane shifting); the pool over
    # time is a pure elementwise max across leading slabs (VPU only).
    # NOTE: the 8-lane column windows below may lower to masked lane selects; if the
    # Mosaic dump shows relayouts here, switch to pltpu.roll along the lane axis.
    outs = []
    col = 0
    for fs in FILTER_SIZES:
        t_out = seq - fs + 1
        acc = y[0:t_out, :, col:col + NUM_FILTERS]                    # tap 0 (carries the bias)
        for k in range(1, fs):                                        # static unroll
            c0 = col + k * NUM_FILTERS
            acc = acc + y[k:k + t_out, :, c0:c0 + NUM_FILTERS]
        pooled = jnp.max(acc, axis=0)                                 # (TB, F)
        outs.append(jnp.maximum(pooled, 0.0).T)                       # ReLU after pool; (F, TB)
        col += fs * NUM_FILTERS

    # single lane-dense store of the full tile (last dim = TB lanes)
    out_ref[...] = jnp.concatenate(outs, axis=0)                      # (2F, TB)


def pack_params(emb_table, w3, b3, w5, b5):
    """Fold the embedding table into the conv weights, place the biases on an
    always-1 one-hot column, pad K to a sublane multiple, and cast to bf16."""
    w_cols = jnp.concatenate([w3[k] for k in range(FILTER_SIZES[0])]
                             + [w5[k] for k in range(FILTER_SIZES[1])],
                             axis=1)                                  # (HIDDEN, 8F)
    fused = (emb_table.astype(jnp.float32)
             @ w_cols.astype(jnp.float32))                            # (VOCAB, 8F)

    # bias row hits tap-0 columns of each branch (added exactly once per output time step)
    bias_row = jnp.zeros((1, TOTAL_COLS), jnp.float32)
    bias_row = bias_row.at[0, 0:NUM_FILTERS].set(b3.reshape(-1).astype(jnp.float32))
    off5 = FILTER_SIZES[0] * NUM_FILTERS
    bias_row = bias_row.at[0, off5:off5 + NUM_FILTERS].set(b5.reshape(-1).astype(jnp.float32))

    pad = jnp.zeros((K_PAD - VOCAB - 1, TOTAL_COLS), jnp.float32)
    packed = jnp.concatenate([fused, bias_row, pad], axis=0)          # (K_PAD, 8F)
    return packed.astype(jnp.bfloat16)


@partial(jax.jit, static_argnames=("batch_tile",))
def metadata_model(tokens, emb_table, w3, b3, w5, b5, *, batch_tile=None):
    B, S = tokens.shape
    assert S == SEQ_LEN
    if batch_tile is None:
        # single grid step: best on single-TC v5e/v6e (kernel is launch/overhead-bound).
        # On v7x use batch_tile = B // 2 (one step per TensorCore) when B >= 256 so the
        # lane-dense output tile stays a multiple of 128.
        batch_tile = B
    assert B % batch_tile == 0
    assert batch_tile == B or batch_tile % 128 == 0, \
        "lane-dense output tile must be the full batch or a multiple of 128"

    params = pack_params(emb_table, w3, b3, w5, b5)     # folded once, cached under jit
    tok = tokens.astype(jnp.int32).T[:, :, None]        # (SEQ, B, 1): time-major, matmul-row order

    grid = (B // batch_tile,)
    out_t = pl.pallas_call(
        metadata_kernel,
        out_shape=jax.ShapeDtypeStruct((OUT_DIM, B), jnp.float32),    # transposed, lane-dense
        grid=grid,
        in_specs=[
            # token ids: per batch tile, time-major
            pl.BlockSpec((SEQ_LEN, batch_tile, 1), lambda i: (0, i, 0)),
            # packed params: constant block index -> stays resident in VMEM
            pl.BlockSpec((K_PAD, TOTAL_COLS), lambda i: (0, 0)),
        ],
        out_specs=pl.BlockSpec((OUT_DIM, batch_tile), lambda i: (0, i)),
        compiler_params=pltpu.CompilerParams(
            dimension_semantics=("parallel",),          # megacore-shard batch tiles (v7x)
        ),
    )(tok, params)
    return out_t.T                                      # (B, 2F)


def ref_forward(tokens, emb_table, w3, b3, w5, b5):
    """Pure-JAX f32 reference mirroring the PyTorch forward (per batch row)."""
    emb = emb_table[tokens].astype(jnp.float32)          # (B, SEQ, HIDDEN)
    B = tokens.shape[0]
    outs = []
    for w, b, fs in ((w3, b3, FILTER_SIZES[0]), (w5, b5, FILTER_SIZES[1])):
        t_out = SEQ_LEN - fs + 1
        acc = jnp.zeros((B, t_out, NUM_FILTERS), jnp.float32)
        for k in range(fs):
            acc += jnp.einsum('bth,hf->btf', emb[:, k:k + t_out, :], w[k])
        acc = jnp.maximum(acc + b, 0.0)                  # bias + ReLU (PyTorch order)
        outs.append(jnp.max(acc, axis=1))                # max_pool1d over full T
    return jnp.concatenate(outs, axis=1)                 # (B, 2*F)


if __name__ == "__main__":
    key = jax.random.PRNGKey(0)
    k_tok, k_emb, k_w3, k_b3, k_w5, k_b5 = jax.random.split(key, 6)

    # Batched x.metadata: B independent token-id sequences
    tokens = jax.random.randint(k_tok, (BATCH, SEQ_LEN), 0, VOCAB, dtype=jnp.int32)

    # Deterministic synthetic parameters (shapes per MetadataModel.__init__;
    # Conv2d(1, F, (fs, HIDDEN)) weight stored as (fs, HIDDEN, F); bias (1, F)).
    emb_table = jax.random.normal(k_emb, (VOCAB, HIDDEN), jnp.float32)
    w3 = 0.1 * jax.random.normal(k_w3, (FILTER_SIZES[0], HIDDEN, NUM_FILTERS), jnp.float32)
    b3 = 0.1 * jax.random.normal(k_b3, (1, NUM_FILTERS), jnp.float32)
    w5 = 0.1 * jax.random.normal(k_w5, (FILTER_SIZES[1], HIDDEN, NUM_FILTERS), jnp.float32)
    b5 = 0.1 * jax.random.normal(k_b5, (1, NUM_FILTERS), jnp.float32)

    out = metadata_model(tokens, emb_table, w3, b3, w5, b5)
    out = jax.block_until_ready(out)

    ref = ref_forward(tokens, emb_table, w3, b3, w5, b5)
    # tolerance loosened vs v1: fused weights/bias run through bf16 MXU inputs
    np.testing.assert_allclose(np.asarray(out), np.asarray(ref), rtol=2e-2, atol=2e-2)
    assert out.shape == (BATCH, OUT_DIM)
    print("KERNEL_OK")
</pallas_src>

<mosaic_0001>
module attributes {stable_mosaic.version = 11 : i64} {
  func.func @metadata_kernel(%arg0: i32, %arg1: memref<8x128x1xi32, #tpu.memory_space<vmem>>, %arg2: memref<72x64xbf16, #tpu.memory_space<vmem>>, %arg3: memref<16x128xf32, #tpu.memory_space<vmem>>) attributes {dimension_semantics = [#tpu.dimension_semantics<parallel>], iteration_bounds = array<i64: 1>, scalar_prefetch = 0 : i64, scratch_operands = 0 : i64, tpu.core_type = #tpu.core_type<tc>, window_params = [{transform_indices = @transform_0, window_bounds = array<i64: 8, 128, 1>}, {pipeline_mode = #tpu.pipeline_mode<synchronous>, transform_indices = @transform_1, window_bounds = array<i64: 72, 64>}, {transform_indices = @transform_2, window_bounds = array<i64: 16, 128>}]} {
    %c0 = arith.constant 0 : index
    %c0_0 = arith.constant 0 : index
    %c0_1 = arith.constant 0 : index
    %0 = vector.load %arg1[%c0, %c0_0, %c0_1] : memref<8x128x1xi32, #tpu.memory_space<vmem>>, vector<8x128x1xi32>
    %1 = tpu.iota {dimensions = array<i32: 2>} : vector<8x128x72xi32>
    %2 = vector.broadcast %0 : vector<8x128x1xi32> to vector<8x128x72xi32>
    %3 = arith.cmpi eq, %1, %2 : vector<8x128x72xi32>
    %c64_i32 = arith.constant 64 : i32
    %4 = vector.broadcast %c64_i32 : i32 to vector<8x128x72xi32>
    %5 = arith.cmpi eq, %1, %4 : vector<8x128x72xi32>
    %6 = arith.ori %3, %5 : vector<8x128x72xi1>
    %7 = arith.extui %6 : vector<8x128x72xi1> to vector<8x128x72xi32>
    %8 = arith.sitofp %7 : vector<8x128x72xi32> to vector<8x128x72xf32>
    %9 = arith.truncf %8 : vector<8x128x72xf32> to vector<8x128x72xbf16>
    %10 = vector.shape_cast %9 : vector<8x128x72xbf16> to vector<1024x72xbf16>
    %c0_2 = arith.constant 0 : index
    %c0_3 = arith.constant 0 : index
    %11 = vector.load %arg2[%c0_2, %c0_3] : memref<72x64xbf16, #tpu.memory_space<vmem>>, vector<72x64xbf16>
    %cst = arith.constant dense<0.000000e+00> : vector<1024x64xf32>
    %12 = tpu.matmul %10, %11, %cst {dimension_numbers = #tpu.dot_dimension_numbers<[1], [0], [0], [1], [0, 0, 1, 1], [], []>} : vector<1024x72xbf16>, vector<72x64xbf16>, vector<1024x64xf32> -> vector<1024x64xf32>
    %13 = vector.shape_cast %12 : vector<1024x64xf32> to vector<8x128x64xf32>
    %14 = vector.extract_strided_slice %13 {offsets = [0, 0, 0], sizes = [6, 128, 8], strides = [1, 1, 1]} : vector<8x128x64xf32> to vector<6x128x8xf32>
    %15 = vector.extract_strided_slice %13 {offsets = [1, 0, 8], sizes = [6, 128, 8], strides = [1, 1, 1]} : vector<8x128x64xf32> to vector<6x128x8xf32>
    %16 = arith.addf %14, %15 : vector<6x128x8xf32>
    %17 = vector.extract_strided_slice %13 {offsets = [2, 0, 16], sizes = [6, 128, 8], strides = [1, 1, 1]} : vector<8x128x64xf32> to vector<6x128x8xf32>
    %18 = arith.addf %16, %17 : vector<6x128x8xf32>
    %cst_4 = arith.constant dense<0xFF800000> : vector<128x8xf32>
    %19 = vector.multi_reduction <maximumf>, %18, %cst_4 [0] : vector<6x128x8xf32> to vector<128x8xf32>
    %cst_5 = arith.constant 0.000000e+00 : f32
    %20 = vector.broadcast %cst_5 : f32 to vector<128x8xf32>
    %21 = arith.maximumf %19, %20 : vector<128x8xf32>
    %22 = tpu.transpose %21, [1, 0] : vector<128x8xf32> -> vector<8x128xf32>
    %23 = vector.extract_strided_slice %13 {offsets = [0, 0, 24], sizes = [4, 128, 8], strides = [1, 1, 1]} : vector<8x128x64xf32> to vector<4x128x8xf32>
    %24 = vector.extract_strided_slice %13 {offsets = [1, 0, 32], sizes = [4, 128, 8], strides = [1, 1, 1]} : vector<8x128x64xf32> to vector<4x128x8xf32>
    %25 = arith.addf %23, %24 : vector<4x128x8xf32>
    %26 = vector.extract_strided_slice %13 {offsets = [2, 0, 40], sizes = [4, 128, 8], strides = [1, 1, 1]} : vector<8x128x64xf32> to vector<4x128x8xf32>
    %27 = arith.addf %25, %26 : vector<4x128x8xf32>
    %28 = vector.extract_strided_slice %13 {offsets = [3, 0, 48], sizes = [4, 128, 8], strides = [1, 1, 1]} : vector<8x128x64xf32> to vector<4x128x8xf32>
    %29 = arith.addf %27, %28 : vector<4x128x8xf32>
    %30 = vector.extract_strided_slice %13 {offsets = [4, 0, 56], sizes = [4, 128, 8], strides = [1, 1, 1]} : vector<8x128x64xf32> to vector<4x128x8xf32>
    %31 = arith.addf %29, %30 : vector<4x128x8xf32>
    %cst_6 = arith.constant dense<0xFF800000> : vector<128x8xf32>
    %32 = vector.multi_reduction <maximumf>, %31, %cst_6 [0] : vector<4x128x8xf32> to vector<128x8xf32>
    %cst_7 = arith.constant 0.000000e+00 : f32
    %33 = vector.broadcast %cst_7 : f32 to vector<128x8xf32>
    %34 = arith.maximumf %32, %33 : vector<128x8xf32>
    %35 = tpu.transpose %34, [1, 0] : vector<128x8xf32> -> vector<8x128xf32>
    %36 = tpu.concatenate %22, %35 in 0 : vector<8x128xf32>, vector<8x128xf32> -> vector<16x128xf32>
    %c0_8 = arith.constant 0 : index
    %c0_9 = arith.constant 0 : index
    %37 = vector.load %arg3[%c0_8, %c0_9] : memref<16x128xf32, #tpu.memory_space<vmem>>, vector<16x128xf32>
    tpu.vector_store %arg3[%c0_8, %c0_9], %36 {strides = array<i32>} : memref<16x128xf32, #tpu.memory_space<vmem>>, vector<16x128xf32>,
    return
  }
  func.func @transform_0(%arg0: i32) -> (i32, i32, i32) {
    %c0_i32 = arith.constant 0 : i32
    %c0_i32_0 = arith.constant 0 : i32
    %c0_i32_1 = arith.constant 0 : i32
    return %c0_i32, %arg0, %c0_i32_0 : i32, i32, i32
  }
  func.func @transform_1(%arg0: i32) -> (i32, i32) {
    %c0_i32 = arith.constant 0 : i32
    %c0_i32_0 = arith.constant 0 : i32
    %c0_i32_1 = arith.constant 0 : i32
    return %c0_i32, %c0_i32_0 : i32, i32
  }
  func.func @transform_2(%arg0: i32) -> (i32, i32) {
    %c0_i32 = arith.constant 0 : i32
    %c0_i32_0 = arith.constant 0 : i32
    return %c0_i32, %arg0 : i32, i32
  }
}

</mosaic_0001>

<bundles_post_ra>
// kernel: metadata_model.1
= control target key start
LH: loop header
LB: loop body
LE: loop exit
PB: predicated region body
PF: predicated region fallthrough
CT: control target
= control target key end

     0   :  { %v4198_v2 = vmov 0   ;;  %s7938_s0 = inlined_call_operand.vmem [shape: s32[8,128,1], index: 0, kind: input, shape index: {}]   ;;  %s7939_s1 = inlined_call_operand.vmem [shape: bf16[72,64], index: 1, kind: input, shape index: {}]   ;;  %s7940_s2 = inlined_call_operand.hbm [shape: f32[16,128], index: 2, kind: output, shape index: {}]  }
   0x1   :  { %v15_v0 = vld [vmem:[%s7938_s0 + $0x10] sm:$0xff]  ;;  %v13_v1 = vld [vmem:[%s7938_s0] sm:$0xff]  ;;  %4168 = vset.pattern.permute.xlu1 %v4198_v2  ;;  %4167 = vset.pattern.permute.xlu0 %v4198_v2  ;;  %v16_v3 = vld [vmem:[%s7938_s0 + $0x18] sm:$0xff] }
   0x2   :  { %150 = vperm.xlu1 %4168, %v15_v0   ;;  %144 = vperm.xlu0 %4167, %v13_v1   ;;  %v14_v4 = vld [vmem:[%s7938_s0 + $0x8] sm:$0xff]  ;;  %v17_v6 = vld [vmem:[%s7938_s0 + $0x20] sm:$0xff]  ;;  %v20_v7 = vld [vmem:[%s7938_s0 + $0x38] sm:$0xff] }
   0x3   :  { %v18_v5 = vld [vmem:[%s7938_s0 + $0x28] sm:$0xff]  ;;  %v19_v8 = vld [vmem:[%s7938_s0 + $0x30] sm:$0xff]  ;;  %v21_v10 = vld [vmem:[%s7938_s0 + $0x40] sm:$0xff] }
   0x4   :  { %v22_v9 = vld [vmem:[%s7938_s0 + $0x48] sm:$0xff]  ;;  %v24_v11 = vld [vmem:[%s7938_s0 + $0x58] sm:$0xff]  ;;  %v23_v12 = vld [vmem:[%s7938_s0 + $0x50] sm:$0xff] }
   0x5   :  { %v4169_v13 = vld [vmem:[%s7939_s1] sm:$0xff]   ;;  %v26_v14 = vld [vmem:[%s7938_s0 + $0x68] sm:$0xff]  ;;  %v4171_v17 = vld [vmem:[%s7939_s1 + $0x10] sm:$0xff]  }
   0x6   :  { %153 = vperm.xlu1 %4168, %v16_v3   ;;  %147 = vperm.xlu0 %4167, %v14_v4   ;;  %v4170_v15 = vld [vmem:[%s7939_s1 + $0x8] sm:$0xff]   ;;  %v25_v16 = vld [vmem:[%s7938_s0 + $0x60] sm:$0xff]  ;;  %v28_v18 = vld [vmem:[%s7938_s0 + $0x78] sm:$0xff] }
   0x7   :  { %4008 = vmatprep.subr.bf16.mxu0 %v4169_v13  ;;  %4146 = vmatprep.subr.bf16.mxu1 %v4169_v13  ;;  %v27_v19 = vld [vmem:[%s7938_s0 + $0x70] sm:$0xff]  ;;  %v4172_v20 = vld [vmem:[%s7939_s1 + $0x18] sm:$0xff]   ;;  %v30_v21 = vld [vmem:[%s7938_s0 + $0x88] sm:$0xff] }
   0x8   :  { %4009 = vmatpush3.bf16.msra.mxu0 %v4169_v13  ;;  %4151 = vmatpush3.bf16.msra.mxu1 %v4169_v13  ;;  %v29_v22 = vld [vmem:[%s7938_s0 + $0x80] sm:$0xff] }
   0x9   :  { %4010 = vmatprep.subr.bf16.mxu0 %v4170_v15  ;;  %4147 = vmatprep.subr.bf16.mxu1 %v4170_v15 }
   0xa   :  { %159 = vperm.xlu1 %4168, %v18_v5   ;;  %156 = vperm.xlu0 %4167, %v17_v6  }
   0xc   :  { %4011 = vmatpush3.bf16.msra.mxu0 %v4170_v15  ;;  %4152 = vmatpush3.bf16.msra.mxu1 %v4170_v15 }
   0xd   :  { %4012 = vmatprep.subr.bf16.mxu0 %v4171_v17  ;;  %4148 = vmatprep.subr.bf16.mxu1 %v4171_v17 }
   0xe   :  { %165 = vperm.xlu1 %4168, %v20_v7   ;;  %162 = vperm.xlu0 %4167, %v19_v8  }
  0x12   :  { %171 = vperm.xlu1 %4168, %v22_v9   ;;  %168 = vperm.xlu0 %4167, %v21_v10  }
  0x16   :  { %177 = vperm.xlu1 %4168, %v24_v11   ;;  %174 = vperm.xlu0 %4167, %v23_v12  }
  0x1a   :  { %183 = vperm.xlu1 %4168, %v26_v14   ;;  %180 = vperm.xlu0 %4167, %v25_v16  }
  0x1e   :  { %189 = vperm.xlu1 %4168, %v28_v18   ;;  %186 = vperm.xlu0 %4167, %v27_v19  }
  0x1f   :  { %7 = vsyncpa [#allocation3], 0  ;;  %4013 = vmatpush3.bf16.msra.mxu0 %v4171_v17  ;;  %4153 = vmatpush3.bf16.msra.mxu1 %v4171_v17  ;;  %v4173_v23 = vld [vmem:[%s7939_s1 + $0x20] ss:$0 sps:$4 sm:$0xff]   ;;  %vm1333_vm0 = vcmask 1043456   ;;  %v32_v24 = vld [vmem:[%s7938_s0 + $0x98] sm:$0xff]  ;;  %v141_v5 = vlaneseq }
  0x20   :  { %4014 = vmatprep.subr.bf16.mxu0 %v4172_v20  ;;  %4149 = vmatprep.subr.bf16.mxu1 %v4172_v20  ;;  %v31_v25 = vld [vmem:[%s7938_s0 + $0x90] sm:$0xff]  ;;  %v1335_v26 = vsel %vm1333_vm0, %v4173_v23, 0  ;;  %v34_v27 = vld [vmem:[%s7938_s0 + $0xa8] sm:$0xff]  ;;  %v33_v28 = vld [vmem:[%s7938_s0 + $0xa0] sm:$0xff]  ;;  %v4199_v19 = vmov 0.0   ;;  %vm1140_vm10 = vcmask 588800  }
  0x21   :  { %v36_v29 = vld [vmem:[%s7938_s0 + $0xb8] sm:$0xff]  ;;  %v35_v30 = vld [vmem:[%s7938_s0 + $0xb0] sm:$0xff]  ;;  %v38_v31 = vld [vmem:[%s7938_s0 + $0xc8] sm:$0xff]  ;;  %v4429_v8 = vand.u32 127, %v141_v5  ;;  %s4201_s15 = smov 112   ;;  %s4202_s16 = smov 104  }
  0x22   :  { %195 = vperm.xlu1 %4168, %v30_v21   ;;  %192 = vperm.xlu0 %4167, %v29_v22   ;;  %v37_v32 = vld [vmem:[%s7938_s0 + $0xc0] sm:$0xff]  ;;  %v40_v33 = vld [vmem:[%s7938_s0 + $0xd8] sm:$0xff]  ;;  %v39_v34 = vld [vmem:[%s7938_s0 + $0xd0] sm:$0xff]  ;;  %s4203_s17 = smov 96   ;;  %s4204_s18 = smov [#allocation2]  }
  0x23   :  { %4015 = vmatpush3.bf16.msra.mxu0 %v4172_v20  ;;  %4154 = vmatpush3.bf16.msra.mxu1 %v4172_v20  ;;  %v42_v35 = vld [vmem:[%s7938_s0 + $0xe8] sm:$0xff]  ;;  %v41_v36 = vld [vmem:[%s7938_s0 + $0xe0] sm:$0xff]  ;;  %v44_v37 = vld [vmem:[%s7938_s0 + $0xf8] sm:$0xff]  ;;  %vm655_vm1 = vcmp.eq.s32.totalorder %v4429_v8, 64  ;;  %s3731_s19 = sshll.u32 %s4204_s18, 4  ;;  %s3732_s19 = int_to_ptr.vmem [resolvable:$true] %s3731_s19 }
  0x24   :  { %4156 = vmatprep.subr.msk.bf16.mxu0 %vm1333_vm0, %v4173_v23  ;;  %4157 = vmatprep.subr.msk.bf16.mxu1 %vm1333_vm0, %v4173_v23  ;;  %v43_v38 = vld [vmem:[%s7938_s0 + $0xf0] sm:$0xff]  ;;  %v46_v39 = vld [vmem:[%s7938_s0 + $0x108] sm:$0xff]  ;;  %v45_v40 = vld [vmem:[%s7938_s0 + $0x100] sm:$0xff]  ;;  %s4174_s20 = scalar_lea.vmem %s3732_s19, 256  ;;  %p4179_p1 = scmp.lt.s32.totalorder %s3732_s19, %s3732_s19 }
  0x25   :  { %v48_v41 = vld [vmem:[%s7938_s0 + $0x118] sm:$0xff]  ;;  %v47_v42 = vld [vmem:[%s7938_s0 + $0x110] sm:$0xff]  ;;  %v50_v43 = vld [vmem:[%s7938_s0 + $0x128] sm:$0xff]  ;;  %p4175_p0 = scmp.ne.s32.totalorder %s3732_s19, %s4174_s20  ;;  %p4180_p2 = scmp.lt.s32.totalorder %s4174_s20, %s4174_s20 }
  0x26   :  { %201 = vperm.xlu1 %4168, %v32_v24   ;;  %198 = vperm.xlu0 %4167, %v31_v25   ;;  %v49_v44 = vld [vmem:[%s7938_s0 + $0x120] sm:$0xff]  ;;  %v52_v45 = vld [vmem:[%s7938_s0 + $0x138] sm:$0xff]  ;;  %v51_v46 = vld [vmem:[%s7938_s0 + $0x130] sm:$0xff] }
  0x27   :  { %4017 = vmatpush3.bf16.msra.mxu0 %v1335_v26  ;;  %4155 = vmatpush3.bf16.msra.mxu1 %v1335_v26  ;;  %v54_v47 = vld [vmem:[%s7938_s0 + $0x148] sm:$0xff]  ;;  %v53_v48 = vld [vmem:[%s7938_s0 + $0x140] sm:$0xff]  ;;  %v56_v49 = vld [vmem:[%s7938_s0 + $0x158] sm:$0xff]  ;;  %p4181_p3 = por %p4180_p2, %p4179_p1 }
  0x28   :  { %v55_v50 = vld [vmem:[%s7938_s0 + $0x150] sm:$0xff]  ;;  %v58_v51 = vld [vmem:[%s7938_s0 + $0x168] sm:$0xff]  ;;  %v57_v52 = vld [vmem:[%s7938_s0 + $0x160] sm:$0xff] }
  0x29   :  { %v60_v53 = vld [vmem:[%s7938_s0 + $0x178] sm:$0xff]  ;;  %v59_v54 = vld [vmem:[%s7938_s0 + $0x170] sm:$0xff]  ;;  %v62_v55 = vld [vmem:[%s7938_s0 + $0x188] sm:$0xff]  ;;  %p4182_p4 = pnand %p4181_p3, %p4175_p0 }
  0x2a   :  { %207 = vperm.xlu1 %4168, %v34_v27   ;;  %204 = vperm.xlu0 %4167, %v33_v28   ;;  %v61_v56 = vld [vmem:[%s7938_s0 + $0x180] sm:$0xff]  ;;  %v64_v57 = vld [vmem:[%s7938_s0 + $0x198] sm:$0xff]  ;;  %v63_v58 = vld [vmem:[%s7938_s0 + $0x190] sm:$0xff] }
  0x2b   :  { %v66_v59 = vld [vmem:[%s7938_s0 + $0x1a8] sm:$0xff]  ;;  %v65_v60 = vld [vmem:[%s7938_s0 + $0x1a0] sm:$0xff]  ;;  %v68_v61 = vld [vmem:[%s7938_s0 + $0x1b8] sm:$0xff] }
  0x2c   :  { %v67_v62 = vld [vmem:[%s7938_s0 + $0x1b0] sm:$0xff]  ;;  %v70_v63 = vld [vmem:[%s7938_s0 + $0x1c8] sm:$0xff]  ;;  %v69_v0 = vld [vmem:[%s7938_s0 + $0x1c0] sm:$0xff] }
  0x2d   :  { %v72_v1 = vld [vmem:[%s7938_s0 + $0x1d8] sm:$0xff]  ;;  %v71_v2 = vld [vmem:[%s7938_s0 + $0x1d0] sm:$0xff]  ;;  %v74_v3 = vld [vmem:[%s7938_s0 + $0x1e8] sm:$0xff] }
  0x2e   :  { %213 = vperm.xlu1 %4168, %v36_v29   ;;  %210 = vperm.xlu0 %4167, %v35_v30   ;;  %v73_v4 = vld [vmem:[%s7938_s0 + $0x1e0] sm:$0xff]  ;;  %v76_v6 = vld [vmem:[%s7938_s0 + $0x1f8] sm:$0xff]  ;;  %v75_v7 = vld [vmem:[%s7938_s0 + $0x1f0] sm:$0xff] }
  0x2f   :  { %v78_v9 = vld [vmem:[%s7938_s0 + $0x208] sm:$0xff]  ;;  %v77_v10 = vld [vmem:[%s7938_s0 + $0x200] sm:$0xff]  ;;  %v80_v13 = vld [vmem:[%s7938_s0 + $0x218] sm:$0xff] }
  0x30   :  { %v79_v14 = vld [vmem:[%s7938_s0 + $0x210] sm:$0xff]  ;;  %v82_v17 = vld [vmem:[%s7938_s0 + $0x228] sm:$0xff]  ;;  %v81_v18 = vld [vmem:[%s7938_s0 + $0x220] sm:$0xff] }
  0x31   :  { %v84_v28 = vld [vmem:[%s7938_s0 + $0x238] sm:$0xff]  ;;  %v83_v29 = vld [vmem:[%s7938_s0 + $0x230] sm:$0xff] }
  0x32   :  { %219 = vperm.xlu1 %4168, %v38_v31   ;;  %216 = vperm.xlu0 %4167, %v37_v32  }
  0x36   :  { %225 = vperm.xlu1 %4168, %v40_v33   ;;  %222 = vperm.xlu0 %4167, %v39_v34  }
  0x3a   :  { %231 = vperm.xlu1 %4168, %v42_v35   ;;  %228 = vperm.xlu0 %4167, %v41_v36   ;;  %v86_v35 = vld [vmem:[%s7938_s0 + $0x248] sm:$0xff]  ;;  %v85_v36 = vld [vmem:[%s7938_s0 + $0x240] sm:$0xff] }
  0x3e   :  { %237 = vperm.xlu1 %4168, %v44_v37   ;;  %234 = vperm.xlu0 %4167, %v43_v38  }
  0x42   :  { %243 = vperm.xlu1 %4168, %v46_v39   ;;  %240 = vperm.xlu0 %4167, %v45_v40  }
  0x46   :  { %249 = vperm.xlu1 %4168, %v48_v41   ;;  %246 = vperm.xlu0 %4167, %v47_v42   ;;  %v88_v42 = vld [vmem:[%s7938_s0 + $0x258] sm:$0xff] }
  0x4a   :  { %255 = vperm.xlu1 %4168, %v50_v43   ;;  %252 = vperm.xlu0 %4167, %v49_v44   ;;  %v87_v43 = vld [vmem:[%s7938_s0 + $0x250] sm:$0xff] }
  0x4e   :  { %261 = vperm.xlu1 %4168, %v52_v45   ;;  %258 = vperm.xlu0 %4167, %v51_v46  }
  0x52   :  { %267 = vperm.xlu1 %4168, %v54_v47   ;;  %264 = vperm.xlu0 %4167, %v53_v48  }
  0x56   :  { %273 = vperm.xlu1 %4168, %v56_v49   ;;  %270 = vperm.xlu0 %4167, %v55_v50   ;;  %v90_v49 = vld [vmem:[%s7938_s0 + $0x268] sm:$0xff]  ;;  %v89_v50 = vld [vmem:[%s7938_s0 + $0x260] sm:$0xff] }
  0x5a   :  { %279 = vperm.xlu1 %4168, %v58_v51   ;;  %276 = vperm.xlu0 %4167, %v57_v52  }
  0x5e   :  { %285 = vperm.xlu1 %4168, %v60_v53   ;;  %282 = vperm.xlu0 %4167, %v59_v54  }
  0x62   :  { %291 = vperm.xlu1 %4168, %v62_v55   ;;  %288 = vperm.xlu0 %4167, %v61_v56   ;;  %v92_v56 = vld [vmem:[%s7938_s0 + $0x278] sm:$0xff] }
  0x66   :  { %297 = vperm.xlu1 %4168, %v64_v57   ;;  %294 = vperm.xlu0 %4167, %v63_v58   ;;  %v91_v57 = vld [vmem:[%s7938_s0 + $0x270] sm:$0xff] }
  0x6a   :  { %303 = vperm.xlu1 %4168, %v66_v59   ;;  %300 = vperm.xlu0 %4167, %v65_v60  }
  0x6e   :  { %309 = vperm.xlu1 %4168, %v68_v61   ;;  %306 = vperm.xlu0 %4167, %v67_v62  }
  0x72   :  { %315 = vperm.xlu1 %4168, %v70_v63   ;;  %312 = vperm.xlu0 %4167, %v69_v0   ;;  %v94_v63 = vld [vmem:[%s7938_s0 + $0x288] sm:$0xff]  ;;  %v93_v0 = vld [vmem:[%s7938_s0 + $0x280] sm:$0xff] }
  0x76   :  { %321 = vperm.xlu1 %4168, %v72_v1   ;;  %318 = vperm.xlu0 %4167, %v71_v2  }
  0x7a   :  { %327 = vperm.xlu1 %4168, %v74_v3   ;;  %324 = vperm.xlu0 %4167, %v73_v4  }
  0x7e   :  { %333 = vperm.xlu1 %4168, %v76_v6   ;;  %330 = vperm.xlu0 %4167, %v75_v7   ;;  %v96_v6 = vld [vmem:[%s7938_s0 + $0x298] sm:$0xff]  ;;  %v95_v7 = vld [vmem:[%s7938_s0 + $0x290] sm:$0xff] }
  0x81   :  { %v151_v11 = vpop.permute.xlu1 %150  ;;  %v145_v12 = vpop.permute.xlu0 %144 }
  0x82   :  { %vm529_vm2 = vcmp.eq.s32.totalorder %v4429_v8, %v151_v11  ;;  %339 = vperm.xlu1 %4168, %v78_v9   ;;  %336 = vperm.xlu0 %4167, %v77_v10   ;;  %vm527_vm3 = vcmp.eq.s32.totalorder %v4429_v8, %v145_v12 }
  0x83   :  { %vm658_vm4 = vmor %vm529_vm2, %vm655_vm1 }
  0x84   :  { %vm656_vm5 = vmor %vm527_vm3, %vm655_vm1  ;;  %v3744_v20 = vsel %vm658_vm4, 1.0, %v4199_v19 }
  0x85   :  { %v154_v15 = vpop.permute.xlu1 %153  ;;  %v148_v16 = vpop.permute.xlu0 %147  ;;  %v3742_v25 = vsel %vm656_vm5, 1.0, %v4199_v19 }
  0x86   :  { %vm530_vm6 = vcmp.eq.s32.totalorder %v4429_v8, %v154_v15  ;;  %vm528_vm7 = vcmp.eq.s32.totalorder %v4429_v8, %v148_v16  ;;  %345 = vperm.xlu1 %4168, %v80_v13   ;;  %342 = vperm.xlu0 %4167, %v79_v14   ;;  %v98_v14 = vld [vmem:[%s7938_s0 + $0x2a8] sm:$0xff]  ;;  %v97_v15 = vld [vmem:[%s7938_s0 + $0x2a0] sm:$0xff] }
  0x87   :  { %vm659_vm8 = vmor %vm530_vm6, %vm655_vm1 }
  0x88   :  { %v3745_v21 = vsel %vm659_vm8, 1.0, %v4199_v19  ;;  %vm657_vm9 = vmor %vm528_vm7, %vm655_vm1 }
  0x89   :  { %v1041_v22 = vpack.c.bf16 %v3745_v21, %v3744_v20  ;;  %v160_v23 = vpop.permute.xlu1 %159  ;;  %v157_v24 = vpop.permute.xlu0 %156  ;;  %v3743_v26 = vsel %vm657_vm9, 1.0, %v4199_v19 }
  0x8a   :  { %vm532_vm11 = vcmp.eq.s32.totalorder %v4429_v8, %v160_v23  ;;  %vm531_vm12 = vcmp.eq.s32.totalorder %v4429_v8, %v157_v24  ;;  %351 = vperm.xlu1 %4168, %v82_v17   ;;  %348 = vperm.xlu0 %4167, %v81_v18   ;;  %v1040_v27 = vpack.c.bf16 %v3743_v26, %v3742_v25  ;;  %v99_v23 = vld [vmem:[%s7938_s0 + $0x2b0] sm:$0xff] }
  0x8b   :  { %vm661_vm13 = vmor %vm532_vm11, %vm655_vm1 }
  0x8c   :  { %v3747_v30 = vsel %vm661_vm13, 1.0, %v4199_v19  ;;  %vm660_vm14 = vmor %vm531_vm12, %vm655_vm1  ;;  %4018 = vmatprep.mubr.msk.bf16.mxu0 %vm1140_vm10, %v1040_v27 }
  0x8d   :  { %v3746_v31 = vsel %vm660_vm14, 1.0, %v4199_v19  ;;  %4019 = vmatmul.mubr.msk.bf16.vlgmr.msra.gmra.mrb[0].mxu0 %vm1140_vm10, %v1041_v22  ;;  %v166_v32 = vpop.permute.xlu1 %165  ;;  %v163_v33 = vpop.permute.xlu0 %162  ;;  %v100_v22 = vld [vmem:[%s7938_s0 + $0x2b8] sm:$0xff] }
  0x8e   :  { %v1042_v34 = vpack.c.bf16 %v3747_v30, %v3746_v31  ;;  %vm534_vm15 = vcmp.eq.s32.totalorder %v4429_v8, %v166_v32  ;;  %vm533_vm0 = vcmp.eq.s32.totalorder %v4429_v8, %v163_v33  ;;  %357 = vperm.xlu1 %4168, %v84_v28   ;;  %354 = vperm.xlu0 %4167, %v83_v29   ;;  %v102_v29 = vld [vmem:[%s7938_s0 + $0x2c8] sm:$0xff]  ;;  %v101_v30 = vld [vmem:[%s7938_s0 + $0x2c0] sm:$0xff] }
  0x8f   :  { %vm663_vm2 = vmor %vm534_vm15, %vm655_vm1 }
  0x90   :  { %v3749_v37 = vsel %vm663_vm2, 1.0, %v4199_v19  ;;  %vm662_vm3 = vmor %vm533_vm0, %vm655_vm1  ;;  %4022 = vmatprep.mubr.msk.bf16.mxu0 %vm1140_vm10, %v1042_v34 }
  0x91   :  { %v3748_v38 = vsel %vm662_vm3, 1.0, %v4199_v19  ;;  %v172_v39 = vpop.permute.xlu1 %171  ;;  %v169_v40 = vpop.permute.xlu0 %168 }
  0x92   :  { %v1043_v41 = vpack.c.bf16 %v3749_v37, %v3748_v38  ;;  %vm536_vm4 = vcmp.eq.s32.totalorder %v4429_v8, %v172_v39  ;;  %vm535_vm5 = vcmp.eq.s32.totalorder %v4429_v8, %v169_v40  ;;  %363 = vperm.xlu1 %4168, %v86_v35   ;;  %360 = vperm.xlu0 %4167, %v85_v36   ;;  %v104_v36 = vld [vmem:[%s7938_s0 + $0x2d8] sm:$0xff]  ;;  %v103_v37 = vld [vmem:[%s7938_s0 + $0x2d0] sm:$0xff] }
  0x93   :  { %vm665_vm6 = vmor %vm536_vm4, %vm655_vm1 }
  0x94   :  { %v3751_v44 = vsel %vm665_vm6, 1.0, %v4199_v19  ;;  %vm664_vm7 = vmor %vm535_vm5, %vm655_vm1 }
  0x95   :  { %v3750_v45 = vsel %vm664_vm7, 1.0, %v4199_v19  ;;  %4023 = vmatmul.mubr.msk.bf16.gmra.mrb[4].mxu0 %vm1140_vm10, %v1043_v41  ;;  %v178_v46 = vpop.permute.xlu1 %177  ;;  %v175_v47 = vpop.permute.xlu0 %174 }
  0x96   :  { %v1044_v48 = vpack.c.bf16 %v3751_v44, %v3750_v45  ;;  %vm538_vm8 = vcmp.eq.s32.totalorder %v4429_v8, %v178_v46  ;;  %vm537_vm9 = vcmp.eq.s32.totalorder %v4429_v8, %v175_v47  ;;  %369 = vperm.xlu1 %4168, %v88_v42   ;;  %366 = vperm.xlu0 %4167, %v87_v43   ;;  %v106_v43 = vld [vmem:[%s7938_s0 + $0x2e8] sm:$0xff]  ;;  %v105_v44 = vld [vmem:[%s7938_s0 + $0x2e0] sm:$0xff] }
  0x97   :  { %vm667_vm11 = vmor %vm538_vm8, %vm655_vm1 }
  0x98   :  { %v3753_v51 = vsel %vm667_vm11, 1.0, %v4199_v19  ;;  %vm666_vm12 = vmor %vm537_vm9, %vm655_vm1  ;;  %4026 = vmatprep.mubr.msk.bf16.mxu0 %vm1140_vm10, %v1044_v48 }
  0x99   :  { %v3752_v52 = vsel %vm666_vm12, 1.0, %v4199_v19  ;;  %v184_v53 = vpop.permute.xlu1 %183  ;;  %v181_v54 = vpop.permute.xlu0 %180 }
  0x9a   :  { %v1045_v55 = vpack.c.bf16 %v3753_v51, %v3752_v52  ;;  %vm540_vm13 = vcmp.eq.s32.totalorder %v4429_v8, %v184_v53  ;;  %vm539_vm14 = vcmp.eq.s32.totalorder %v4429_v8, %v181_v54  ;;  %375 = vperm.xlu1 %4168, %v90_v49   ;;  %372 = vperm.xlu0 %4167, %v89_v50   ;;  %v108_v50 = vld [vmem:[%s7938_s0 + $0x2f8] sm:$0xff]  ;;  %v107_v51 = vld [vmem:[%s7938_s0 + $0x2f0] sm:$0xff] }
  0x9b   :  { %vm669_vm15 = vmor %vm540_vm13, %vm655_vm1 }
  0x9c   :  { %v3755_v58 = vsel %vm669_vm15, 1.0, %v4199_v19  ;;  %vm668_vm0 = vmor %vm539_vm14, %vm655_vm1 }
  0x9d   :  { %v3754_v59 = vsel %vm668_vm0, 1.0, %v4199_v19  ;;  %4027 = vmatmul.mubr.msk.bf16.gmra.mrb[8].mxu0 %vm1140_vm10, %v1045_v55  ;;  %v190_v60 = vpop.permute.xlu1 %189  ;;  %v187_v61 = vpop.permute.xlu0 %186 }
  0x9e   :  { %v1046_v62 = vpack.c.bf16 %v3755_v58, %v3754_v59  ;;  %vm542_vm2 = vcmp.eq.s32.totalorder %v4429_v8, %v190_v60  ;;  %vm541_vm3 = vcmp.eq.s32.totalorder %v4429_v8, %v187_v61  ;;  %381 = vperm.xlu1 %4168, %v92_v56   ;;  %378 = vperm.xlu0 %4167, %v91_v57   ;;  %v110_v57 = vld [vmem:[%s7938_s0 + $0x308] sm:$0xff]  ;;  %v109_v58 = vld [vmem:[%s7938_s0 + $0x300] sm:$0xff] }
  0x9f   :  { %vm671_vm4 = vmor %vm542_vm2, %vm655_vm1 }
  0xa0   :  { %v3757_v1 = vsel %vm671_vm4, 1.0, %v4199_v19  ;;  %vm670_vm5 = vmor %vm541_vm3, %vm655_vm1  ;;  %4030 = vmatprep.mubr.msk.bf16.mxu0 %vm1140_vm10, %v1046_v62 }
  0xa1   :  { %v3756_v2 = vsel %vm670_vm5, 1.0, %v4199_v19  ;;  %v196_v3 = vpop.permute.xlu1 %195  ;;  %v193_v4 = vpop.permute.xlu0 %192 }
  0xa2   :  { %v1047_v5 = vpack.c.bf16 %v3757_v1, %v3756_v2  ;;  %vm544_vm6 = vcmp.eq.s32.totalorder %v4429_v8, %v196_v3  ;;  %vm543_vm7 = vcmp.eq.s32.totalorder %v4429_v8, %v193_v4  ;;  %387 = vperm.xlu1 %4168, %v94_v63   ;;  %384 = vperm.xlu0 %4167, %v93_v0   ;;  %v112_v0 = vld [vmem:[%s7938_s0 + $0x318] sm:$0xff]  ;;  %v111_v1 = vld [vmem:[%s7938_s0 + $0x310] sm:$0xff] }
  0xa3   :  { %vm673_vm8 = vmor %vm544_vm6, %vm655_vm1 }
  0xa4   :  { %v3759_v9 = vsel %vm673_vm8, 1.0, %v4199_v19  ;;  %vm672_vm9 = vmor %vm543_vm7, %vm655_vm1 }
  0xa5   :  { %v3758_v10 = vsel %vm672_vm9, 1.0, %v4199_v19  ;;  %4031 = vmatmul.mubr.msk.bf16.gmra.mrb[12].mxu0 %vm1140_vm10, %v1047_v5  ;;  %v202_v11 = vpop.permute.xlu1 %201  ;;  %v199_v12 = vpop.permute.xlu0 %198 }
  0xa6   :  { %v1048_v13 = vpack.c.bf16 %v3759_v9, %v3758_v10  ;;  %vm546_vm11 = vcmp.eq.s32.totalorder %v4429_v8, %v202_v11  ;;  %vm545_vm12 = vcmp.eq.s32.totalorder %v4429_v8, %v199_v12  ;;  %393 = vperm.xlu1 %4168, %v96_v6   ;;  %390 = vperm.xlu0 %4167, %v95_v7   ;;  %v114_v7 = vld [vmem:[%s7938_s0 + $0x328] sm:$0xff]  ;;  %v113_v9 = vld [vmem:[%s7938_s0 + $0x320] sm:$0xff] }
  0xa7   :  { %vm675_vm13 = vmor %vm546_vm11, %vm655_vm1 }
  0xa8   :  { %v3761_v16 = vsel %vm675_vm13, 1.0, %v4199_v19  ;;  %vm674_vm14 = vmor %vm545_vm12, %vm655_vm1  ;;  %4034 = vmatprep.mubr.msk.bf16.mxu0 %vm1140_vm10, %v1048_v13 }
  0xa9   :  { %v3760_v17 = vsel %vm674_vm14, 1.0, %v4199_v19  ;;  %v208_v18 = vpop.permute.xlu1 %207  ;;  %v205_v20 = vpop.permute.xlu0 %204 }
  0xaa   :  { %v1049_v21 = vpack.c.bf16 %v3761_v16, %v3760_v17  ;;  %vm548_vm15 = vcmp.eq.s32.totalorder %v4429_v8, %v208_v18  ;;  %vm547_vm0 = vcmp.eq.s32.totalorder %v4429_v8, %v205_v20  ;;  %399 = vperm.xlu1 %4168, %v98_v14   ;;  %396 = vperm.xlu0 %4167, %v97_v15   ;;  %v116_v15 = vld [vmem:[%s7938_s0 + $0x338] sm:$0xff]  ;;  %v115_v16 = vld [vmem:[%s7938_s0 + $0x330] sm:$0xff] }
  0xab   :  { %vm677_vm2 = vmor %vm548_vm15, %vm655_vm1 }
  0xac   :  { %v3763_v24 = vsel %vm677_vm2, 1.0, %v4199_v19  ;;  %vm676_vm3 = vmor %vm547_vm0, %vm655_vm1 }
  0xad   :  { %v3762_v25 = vsel %vm676_vm3, 1.0, %v4199_v19  ;;  %4035 = vmatmul.mubr.msk.bf16.gmra.mrb[16].mxu0 %vm1140_vm10, %v1049_v21  ;;  %v214_v26 = vpop.permute.xlu1 %213  ;;  %v211_v27 = vpop.permute.xlu0 %210 }
  0xae   :  { %v1050_v28 = vpack.c.bf16 %v3763_v24, %v3762_v25  ;;  %vm550_vm4 = vcmp.eq.s32.totalorder %v4429_v8, %v214_v26  ;;  %vm549_vm5 = vcmp.eq.s32.totalorder %v4429_v8, %v211_v27  ;;  %405 = vperm.xlu1 %4168, %v100_v22   ;;  %402 = vperm.xlu0 %4167, %v99_v23   ;;  %v118_v23 = vld [vmem:[%s7938_s0 + $0x348] sm:$0xff]  ;;  %v117_v24 = vld [vmem:[%s7938_s0 + $0x340] sm:$0xff] }
  0xaf   :  { %vm679_vm6 = vmor %vm550_vm4, %vm655_vm1 }
  0xb0   :  { %v3765_v31 = vsel %vm679_vm6, 1.0, %v4199_v19  ;;  %vm678_vm7 = vmor %vm549_vm5, %vm655_vm1  ;;  %4038 = vmatprep.mubr.msk.bf16.mxu0 %vm1140_vm10, %v1050_v28 }
  0xb1   :  { %v3764_v32 = vsel %vm678_vm7, 1.0, %v4199_v19  ;;  %v220_v33 = vpop.permute.xlu1 %219  ;;  %v217_v34 = vpop.permute.xlu0 %216 }
  0xb2   :  { %v1051_v35 = vpack.c.bf16 %v3765_v31, %v3764_v32  ;;  %vm552_vm8 = vcmp.eq.s32.totalorder %v4429_v8, %v220_v33  ;;  %vm551_vm9 = vcmp.eq.s32.totalorder %v4429_v8, %v217_v34  ;;  %411 = vperm.xlu1 %4168, %v102_v29   ;;  %408 = vperm.xlu0 %4167, %v101_v30   ;;  %v120_v30 = vld [vmem:[%s7938_s0 + $0x358] sm:$0xff]  ;;  %v119_v31 = vld [vmem:[%s7938_s0 + $0x350] sm:$0xff] }
  0xb3   :  { %vm681_vm11 = vmor %vm552_vm8, %vm655_vm1 }
  0xb4   :  { %v3767_v38 = vsel %vm681_vm11, 1.0, %v4199_v19  ;;  %vm680_vm12 = vmor %vm551_vm9, %vm655_vm1 }
  0xb5   :  { %v3766_v39 = vsel %vm680_vm12, 1.0, %v4199_v19  ;;  %4039 = vmatmul.mubr.msk.bf16.gmra.mrb[20].mxu0 %vm1140_vm10, %v1051_v35  ;;  %v226_v40 = vpop.permute.xlu1 %225  ;;  %v223_v41 = vpop.permute.xlu0 %222 }
  0xb6   :  { %v1052_v42 = vpack.c.bf16 %v3767_v38, %v3766_v39  ;;  %vm554_vm13 = vcmp.eq.s32.totalorder %v4429_v8, %v226_v40  ;;  %vm553_vm14 = vcmp.eq.s32.totalorder %v4429_v8, %v223_v41  ;;  %417 = vperm.xlu1 %4168, %v104_v36   ;;  %414 = vperm.xlu0 %4167, %v103_v37   ;;  %v122_v37 = vld [vmem:[%s7938_s0 + $0x368] sm:$0xff]  ;;  %v121_v38 = vld [vmem:[%s7938_s0 + $0x360] sm:$0xff] }
  0xb7   :  { %vm683_vm15 = vmor %vm554_vm13, %vm655_vm1 }
  0xb8   :  { %v3769_v45 = vsel %vm683_vm15, 1.0, %v4199_v19  ;;  %vm682_vm0 = vmor %vm553_vm14, %vm655_vm1  ;;  %4042 = vmatprep.mubr.msk.bf16.mxu0 %vm1140_vm10, %v1052_v42 }
  0xb9   :  { %v3768_v46 = vsel %vm682_vm0, 1.0, %v4199_v19  ;;  %v232_v47 = vpop.permute.xlu1 %231  ;;  %v229_v48 = vpop.permute.xlu0 %228 }
  0xba   :  { %v1053_v49 = vpack.c.bf16 %v3769_v45, %v3768_v46  ;;  %vm556_vm2 = vcmp.eq.s32.totalorder %v4429_v8, %v232_v47  ;;  %vm555_vm3 = vcmp.eq.s32.totalorder %v4429_v8, %v229_v48  ;;  %423 = vperm.xlu1 %4168, %v106_v43   ;;  %420 = vperm.xlu0 %4167, %v105_v44   ;;  %v124_v44 = vld [vmem:[%s7938_s0 + $0x378] sm:$0xff]  ;;  %v123_v45 = vld [vmem:[%s7938_s0 + $0x370] sm:$0xff] }
  0xbb   :  { %vm685_vm4 = vmor %vm556_vm2, %vm655_vm1 }
  0xbc   :  { %v3771_v52 = vsel %vm685_vm4, 1.0, %v4199_v19  ;;  %vm684_vm5 = vmor %vm555_vm3, %vm655_vm1 }
  0xbd   :  { %v3770_v53 = vsel %vm684_vm5, 1.0, %v4199_v19  ;;  %4043 = vmatmul.mubr.msk.bf16.gmra.mrb[24].mxu0 %vm1140_vm10, %v1053_v49  ;;  %v238_v54 = vpop.permute.xlu1 %237  ;;  %v235_v55 = vpop.permute.xlu0 %234 }
  0xbe   :  { %v1054_v56 = vpack.c.bf16 %v3771_v52, %v3770_v53  ;;  %vm558_vm6 = vcmp.eq.s32.totalorder %v4429_v8, %v238_v54  ;;  %vm557_vm7 = vcmp.eq.s32.totalorder %v4429_v8, %v235_v55  ;;  %429 = vperm.xlu1 %4168, %v108_v50   ;;  %426 = vperm.xlu0 %4167, %v107_v51   ;;  %v126_v51 = vld [vmem:[%s7938_s0 + $0x388] sm:$0xff]  ;;  %v125_v52 = vld [vmem:[%s7938_s0 + $0x380] sm:$0xff] }
  0xbf   :  { %vm687_vm8 = vmor %vm558_vm6, %vm655_vm1 }
  0xc0   :  { %v3773_v59 = vsel %vm687_vm8, 1.0, %v4199_v19  ;;  %vm686_vm9 = vmor %vm557_vm7, %vm655_vm1  ;;  %4046 = vmatprep.mubr.msk.bf16.mxu0 %vm1140_vm10, %v1054_v56 }
  0xc1   :  { %v3772_v60 = vsel %vm686_vm9, 1.0, %v4199_v19  ;;  %v244_v61 = vpop.permute.xlu1 %243  ;;  %v241_v62 = vpop.permute.xlu0 %240 }
  0xc2   :  { %v1055_v63 = vpack.c.bf16 %v3773_v59, %v3772_v60  ;;  %vm560_vm11 = vcmp.eq.s32.totalorder %v4429_v8, %v244_v61  ;;  %vm559_vm12 = vcmp.eq.s32.totalorder %v4429_v8, %v241_v62  ;;  %435 = vperm.xlu1 %4168, %v110_v57   ;;  %432 = vperm.xlu0 %4167, %v109_v58   ;;  %v128_v58 = vld [vmem:[%s7938_s0 + $0x398] sm:$0xff]  ;;  %v127_v59 = vld [vmem:[%s7938_s0 + $0x390] sm:$0xff] }
  0xc3   :  { %vm689_vm13 = vmor %vm560_vm11, %vm655_vm1 }
  0xc4   :  { %v3775_v2 = vsel %vm689_vm13, 1.0, %v4199_v19  ;;  %vm688_vm14 = vmor %vm559_vm12, %vm655_vm1 }
  0xc5   :  { %v3774_v3 = vsel %vm688_vm14, 1.0, %v4199_v19  ;;  %4047 = vmatmul.mubr.msk.bf16.gmra.mrb[28].mxu0 %vm1140_vm10, %v1055_v63  ;;  %v250_v4 = vpop.permute.xlu1 %249  ;;  %v247_v5 = vpop.permute.xlu0 %246 }
  0xc6   :  { %v1056_v6 = vpack.c.bf16 %v3775_v2, %v3774_v3  ;;  %vm562_vm15 = vcmp.eq.s32.totalorder %v4429_v8, %v250_v4  ;;  %vm561_vm0 = vcmp.eq.s32.totalorder %v4429_v8, %v247_v5  ;;  %441 = vperm.xlu1 %4168, %v112_v0   ;;  %438 = vperm.xlu0 %4167, %v111_v1   ;;  %v130_v1 = vld [vmem:[%s7938_s0 + $0x3a8] sm:$0xff]  ;;  %v129_v2 = vld [vmem:[%s7938_s0 + $0x3a0] sm:$0xff] }
  0xc7   :  { %vm691_vm2 = vmor %vm562_vm15, %vm655_vm1 }
  0xc8   :  { %v3777_v10 = vsel %vm691_vm2, 1.0, %v4199_v19  ;;  %vm690_vm3 = vmor %vm561_vm0, %vm655_vm1  ;;  %4050 = vmatprep.mubr.msk.bf16.mxu0 %vm1140_vm10, %v1056_v6 }
  0xc9   :  { %v3776_v11 = vsel %vm690_vm3, 1.0, %v4199_v19  ;;  %v256_v12 = vpop.permute.xlu1 %255  ;;  %v253_v13 = vpop.permute.xlu0 %252 }
  0xca   :  { %v1057_v14 = vpack.c.bf16 %v3777_v10, %v3776_v11  ;;  %vm564_vm4 = vcmp.eq.s32.totalorder %v4429_v8, %v256_v12  ;;  %vm563_vm5 = vcmp.eq.s32.totalorder %v4429_v8, %v253_v13  ;;  %447 = vperm.xlu1 %4168, %v114_v7   ;;  %444 = vperm.xlu0 %4167, %v113_v9   ;;  %v132_v9 = vld [vmem:[%s7938_s0 + $0x3b8] sm:$0xff]  ;;  %v131_v10 = vld [vmem:[%s7938_s0 + $0x3b0] sm:$0xff] }
  0xcb   :  { %vm693_vm6 = vmor %vm564_vm4, %vm655_vm1 }
  0xcc   :  { %v3779_v17 = vsel %vm693_vm6, 1.0, %v4199_v19  ;;  %vm692_vm7 = vmor %vm563_vm5, %vm655_vm1 }
  0xcd   :  { %v3778_v18 = vsel %vm692_vm7, 1.0, %v4199_v19  ;;  %4051 = vmatmul.mubr.msk.bf16.gmra.mrb[32].mxu0 %vm1140_vm10, %v1057_v14  ;;  %v262_v20 = vpop.permute.xlu1 %261  ;;  %v259_v21 = vpop.permute.xlu0 %258 }
  0xce   :  { %v1058_v22 = vpack.c.bf16 %v3779_v17, %v3778_v18  ;;  %vm566_vm8 = vcmp.eq.s32.totalorder %v4429_v8, %v262_v20  ;;  %vm565_vm9 = vcmp.eq.s32.totalorder %v4429_v8, %v259_v21  ;;  %453 = vperm.xlu1 %4168, %v116_v15   ;;  %450 = vperm.xlu0 %4167, %v115_v16   ;;  %v134_v16 = vld [vmem:[%s7938_s0 + $0x3c8] sm:$0xff]  ;;  %v133_v17 = vld [vmem:[%s7938_s0 + $0x3c0] sm:$0xff] }
  0xcf   :  { %vm695_vm11 = vmor %vm566_vm8, %vm655_vm1 }
  0xd0   :  { %v3781_v25 = vsel %vm695_vm11, 1.0, %v4199_v19  ;;  %vm694_vm12 = vmor %vm565_vm9, %vm655_vm1  ;;  %4054 = vmatprep.mubr.msk.bf16.mxu0 %vm1140_vm10, %v1058_v22 }
  0xd1   :  { %v3780_v26 = vsel %vm694_vm12, 1.0, %v4199_v19  ;;  %v268_v27 = vpop.permute.xlu1 %267  ;;  %v265_v28 = vpop.permute.xlu0 %264 }
  0xd2   :  { %v1059_v29 = vpack.c.bf16 %v3781_v25, %v3780_v26  ;;  %vm568_vm13 = vcmp.eq.s32.totalorder %v4429_v8, %v268_v27  ;;  %vm567_vm14 = vcmp.eq.s32.totalorder %v4429_v8, %v265_v28  ;;  %459 = vperm.xlu1 %4168, %v118_v23   ;;  %456 = vperm.xlu0 %4167, %v117_v24   ;;  %v136_v24 = vld [vmem:[%s7938_s0 + $0x3d8] sm:$0xff]  ;;  %v135_v25 = vld [vmem:[%s7938_s0 + $0x3d0] sm:$0xff] }
  0xd3   :  { %vm697_vm15 = vmor %vm568_vm13, %vm655_vm1 }
  0xd4   :  { %v3783_v32 = vsel %vm697_vm15, 1.0, %v4199_v19  ;;  %vm696_vm0 = vmor %vm567_vm14, %vm655_vm1 }
  0xd5   :  { %v3782_v33 = vsel %vm696_vm0, 1.0, %v4199_v19  ;;  %4055 = vmatmul.mubr.msk.bf16.gmra.mrb[36].mxu0 %vm1140_vm10, %v1059_v29  ;;  %v274_v34 = vpop.permute.xlu1 %273  ;;  %v271_v35 = vpop.permute.xlu0 %270 }
  0xd6   :  { %v1060_v36 = vpack.c.bf16 %v3783_v32, %v3782_v33  ;;  %vm570_vm2 = vcmp.eq.s32.totalorder %v4429_v8, %v274_v34  ;;  %vm569_vm3 = vcmp.eq.s32.totalorder %v4429_v8, %v271_v35  ;;  %465 = vperm.xlu1 %4168, %v120_v30   ;;  %462 = vperm.xlu0 %4167, %v119_v31   ;;  %v138_v31 = vld [vmem:[%s7938_s0 + $0x3e8] sm:$0xff]  ;;  %v137_v32 = vld [vmem:[%s7938_s0 + $0x3e0] sm:$0xff] }
  0xd7   :  { %vm699_vm4 = vmor %vm570_vm2, %vm655_vm1 }
  0xd8   :  { %v3785_v39 = vsel %vm699_vm4, 1.0, %v4199_v19  ;;  %vm698_vm5 = vmor %vm569_vm3, %vm655_vm1  ;;  %4058 = vmatprep.mubr.msk.bf16.mxu0 %vm1140_vm10, %v1060_v36 }
  0xd9   :  { %v3784_v40 = vsel %vm698_vm5, 1.0, %v4199_v19  ;;  %v280_v41 = vpop.permute.xlu1 %279  ;;  %v277_v42 = vpop.permute.xlu0 %276 }
  0xda   :  { %v1061_v43 = vpack.c.bf16 %v3785_v39, %v3784_v40  ;;  %vm572_vm6 = vcmp.eq.s32.totalorder %v4429_v8, %v280_v41  ;;  %vm571_vm7 = vcmp.eq.s32.totalorder %v4429_v8, %v277_v42  ;;  %471 = vperm.xlu1 %4168, %v122_v37   ;;  %468 = vperm.xlu0 %4167, %v121_v38   ;;  %v140_v38 = vld [vmem:[%s7938_s0 + $0x3f8] sm:$0xff]  ;;  %v139_v39 = vld [vmem:[%s7938_s0 + $0x3f0] sm:$0xff]  ;;  %s4200_s0 = smov 120  }
  0xdb   :  { %vm701_vm8 = vmor %vm572_vm6, %vm655_vm1 }
  0xdc   :  { %v3787_v46 = vsel %vm701_vm8, 1.0, %v4199_v19  ;;  %vm700_vm9 = vmor %vm571_vm7, %vm655_vm1 }
  0xdd   :  { %v3786_v47 = vsel %vm700_vm9, 1.0, %v4199_v19  ;;  %4059 = vmatmul.mubr.msk.bf16.gmra.mrb[40].mxu0 %vm1140_vm10, %v1061_v43  ;;  %v286_v48 = vpop.permute.xlu1 %285  ;;  %v283_v49 = vpop.permute.xlu0 %282 }
  0xde   :  { %v1062_v50 = vpack.c.bf16 %v3787_v46, %v3786_v47  ;;  %vm574_vm11 = vcmp.eq.s32.totalorder %v4429_v8, %v286_v48  ;;  %vm573_vm12 = vcmp.eq.s32.totalorder %v4429_v8, %v283_v49  ;;  %477 = vperm.xlu1 %4168, %v124_v44   ;;  %474 = vperm.xlu0 %4167, %v123_v45  }
  0xdf   :  { %vm703_vm13 = vmor %vm574_vm11, %vm655_vm1 }
  0xe0   :  { %v3789_v53 = vsel %vm703_vm13, 1.0, %v4199_v19  ;;  %vm702_vm14 = vmor %vm573_vm12, %vm655_vm1  ;;  %4062 = vmatprep.mubr.msk.bf16.mxu0 %vm1140_vm10, %v1062_v50 }
  0xe1   :  { %v3788_v54 = vsel %vm702_vm14, 1.0, %v4199_v19  ;;  %v292_v55 = vpop.permute.xlu1 %291  ;;  %v289_v56 = vpop.permute.xlu0 %288 }
  0xe2   :  { %v1063_v57 = vpack.c.bf16 %v3789_v53, %v3788_v54  ;;  %vm576_vm15 = vcmp.eq.s32.totalorder %v4429_v8, %v292_v55  ;;  %vm575_vm0 = vcmp.eq.s32.totalorder %v4429_v8, %v289_v56  ;;  %483 = vperm.xlu1 %4168, %v126_v51   ;;  %480 = vperm.xlu0 %4167, %v125_v52  }
  0xe3   :  { %vm705_vm2 = vmor %vm576_vm15, %vm655_vm1 }
  0xe4   :  { %v3791_v60 = vsel %vm705_vm2, 1.0, %v4199_v19  ;;  %vm704_vm3 = vmor %vm575_vm0, %vm655_vm1 }
  0xe5   :  { %v3790_v61 = vsel %vm704_vm3, 1.0, %v4199_v19  ;;  %4063 = vmatmul.mubr.msk.bf16.gmra.mrb[44].mxu0 %vm1140_vm10, %v1063_v57  ;;  %v298_v62 = vpop.permute.xlu1 %297  ;;  %v295_v63 = vpop.permute.xlu0 %294 }
  0xe6   :  { %v1064_v0 = vpack.c.bf16 %v3791_v60, %v3790_v61  ;;  %vm578_vm4 = vcmp.eq.s32.totalorder %v4429_v8, %v298_v62  ;;  %vm577_vm5 = vcmp.eq.s32.totalorder %v4429_v8, %v295_v63  ;;  %489 = vperm.xlu1 %4168, %v128_v58   ;;  %486 = vperm.xlu0 %4167, %v127_v59  }
  0xe7   :  { %vm707_vm6 = vmor %vm578_vm4, %vm655_vm1 }
  0xe8   :  { %v3793_v3 = vsel %vm707_vm6, 1.0, %v4199_v19  ;;  %vm706_vm7 = vmor %vm577_vm5, %vm655_vm1  ;;  %4066 = vmatprep.mubr.msk.bf16.mxu0 %vm1140_vm10, %v1064_v0 }
  0xe9   :  { %v3792_v4 = vsel %vm706_vm7, 1.0, %v4199_v19  ;;  %v304_v5 = vpop.permute.xlu1 %303  ;;  %v301_v6 = vpop.permute.xlu0 %300 }
  0xea   :  { %v1065_v7 = vpack.c.bf16 %v3793_v3, %v3792_v4  ;;  %vm580_vm8 = vcmp.eq.s32.totalorder %v4429_v8, %v304_v5  ;;  %vm579_vm9 = vcmp.eq.s32.totalorder %v4429_v8, %v301_v6  ;;  %495 = vperm.xlu1 %4168, %v130_v1   ;;  %492 = vperm.xlu0 %4167, %v129_v2  }
  0xeb   :  { %vm709_vm11 = vmor %vm580_vm8, %vm655_vm1 }
  0xec   :  { %v3795_v11 = vsel %vm709_vm11, 1.0, %v4199_v19  ;;  %vm708_vm12 = vmor %vm579_vm9, %vm655_vm1 }
  0xed   :  { %v3794_v12 = vsel %vm708_vm12, 1.0, %v4199_v19  ;;  %4067 = vmatmul.mubr.msk.bf16.gmra.mrb[48].mxu0 %vm1140_vm10, %v1065_v7  ;;  %v310_v13 = vpop.permute.xlu1 %309  ;;  %v307_v14 = vpop.permute.xlu0 %306 }
  0xee   :  { %v1066_v15 = vpack.c.bf16 %v3795_v11, %v3794_v12  ;;  %vm582_vm13 = vcmp.eq.s32.totalorder %v4429_v8, %v310_v13  ;;  %vm581_vm14 = vcmp.eq.s32.totalorder %v4429_v8, %v307_v14  ;;  %501 = vperm.xlu1 %4168, %v132_v9   ;;  %498 = vperm.xlu0 %4167, %v131_v10  }
  0xef   :  { %vm711_vm15 = vmor %vm582_vm13, %vm655_vm1 }
  0xf0   :  { %v3797_v18 = vsel %vm711_vm15, 1.0, %v4199_v19  ;;  %vm710_vm0 = vmor %vm581_vm14, %vm655_vm1  ;;  %4070 = vmatprep.mubr.msk.bf16.mxu0 %vm1140_vm10, %v1066_v15 }
  0xf1   :  { %v3796_v20 = vsel %vm710_vm0, 1.0, %v4199_v19  ;;  %v316_v21 = vpop.permute.xlu1 %315  ;;  %v313_v22 = vpop.permute.xlu0 %312 }
  0xf2   :  { %v1067_v23 = vpack.c.bf16 %v3797_v18, %v3796_v20  ;;  %vm584_vm2 = vcmp.eq.s32.totalorder %v4429_v8, %v316_v21  ;;  %vm583_vm3 = vcmp.eq.s32.totalorder %v4429_v8, %v313_v22  ;;  %507 = vperm.xlu1 %4168, %v134_v16   ;;  %504 = vperm.xlu0 %4167, %v133_v17  }
  0xf3   :  { %vm713_vm4 = vmor %vm584_vm2, %vm655_vm1 }
  0xf4   :  { %v3799_v26 = vsel %vm713_vm4, 1.0, %v4199_v19  ;;  %vm712_vm5 = vmor %vm583_vm3, %vm655_vm1 }
  0xf5   :  { %v3798_v27 = vsel %vm712_vm5, 1.0, %v4199_v19  ;;  %4071 = vmatmul.mubr.msk.bf16.gmra.mrb[52].mxu0 %vm1140_vm10, %v1067_v23  ;;  %v322_v28 = vpop.permute.xlu1 %321  ;;  %v319_v29 = vpop.permute.xlu0 %318 }
  0xf6   :  { %v1068_v30 = vpack.c.bf16 %v3799_v26, %v3798_v27  ;;  %vm586_vm6 = vcmp.eq.s32.totalorder %v4429_v8, %v322_v28  ;;  %vm585_vm7 = vcmp.eq.s32.totalorder %v4429_v8, %v319_v29  ;;  %513 = vperm.xlu1 %4168, %v136_v24   ;;  %510 = vperm.xlu0 %4167, %v135_v25  }
  0xf7   :  { %vm715_vm8 = vmor %vm586_vm6, %vm655_vm1 }
  0xf8   :  { %v3801_v33 = vsel %vm715_vm8, 1.0, %v4199_v19  ;;  %vm714_vm9 = vmor %vm585_vm7, %vm655_vm1  ;;  %4074 = vmatprep.mubr.msk.bf16.mxu0 %vm1140_vm10, %v1068_v30 }
  0xf9   :  { %v3800_v34 = vsel %vm714_vm9, 1.0, %v4199_v19  ;;  %v328_v35 = vpop.permute.xlu1 %327  ;;  %v325_v36 = vpop.permute.xlu0 %324 }
  0xfa   :  { %v1069_v37 = vpack.c.bf16 %v3801_v33, %v3800_v34  ;;  %vm588_vm11 = vcmp.eq.s32.totalorder %v4429_v8, %v328_v35  ;;  %vm587_vm12 = vcmp.eq.s32.totalorder %v4429_v8, %v325_v36  ;;  %519 = vperm.xlu1 %4168, %v138_v31   ;;  %516 = vperm.xlu0 %4167, %v137_v32  }
  0xfb   :  { %vm717_vm13 = vmor %vm588_vm11, %vm655_vm1 }
  0xfc   :  { %v3803_v40 = vsel %vm717_vm13, 1.0, %v4199_v19  ;;  %vm716_vm14 = vmor %vm587_vm12, %vm655_vm1 }
  0xfd   :  { %v3802_v41 = vsel %vm716_vm14, 1.0, %v4199_v19  ;;  %4075 = vmatmul.mubr.msk.bf16.gmra.mrb[56].mxu0 %vm1140_vm10, %v1069_v37  ;;  %v334_v42 = vpop.permute.xlu1 %333  ;;  %v331_v43 = vpop.permute.xlu0 %330 }
  0xfe   :  { %v1070_v44 = vpack.c.bf16 %v3803_v40, %v3802_v41  ;;  %vm590_vm15 = vcmp.eq.s32.totalorder %v4429_v8, %v334_v42  ;;  %vm589_vm0 = vcmp.eq.s32.totalorder %v4429_v8, %v331_v43  ;;  %525 = vperm.xlu1 %4168, %v140_v38   ;;  %522 = vperm.xlu0 %4167, %v139_v39  }
  0xff   :  { %vm719_vm2 = vmor %vm590_vm15, %vm655_vm1 }
 0x100   :  { %v3805_v45 = vsel %vm719_vm2, 1.0, %v4199_v19  ;;  %vm718_vm3 = vmor %vm589_vm0, %vm655_vm1  ;;  %4078 = vmatprep.mubr.msk.bf16.mxu0 %vm1140_vm10, %v1070_v44 }
 0x101   :  { %v3804_v46 = vsel %vm718_vm3, 1.0, %v4199_v19  ;;  %v340_v47 = vpop.permute.xlu1 %339  ;;  %v337_v48 = vpop.permute.xlu0 %336 }
 0x102   :  { %v1071_v49 = vpack.c.bf16 %v3805_v45, %v3804_v46  ;;  %vm592_vm4 = vcmp.eq.s32.totalorder %v4429_v8, %v340_v47  ;;  %vm591_vm5 = vcmp.eq.s32.totalorder %v4429_v8, %v337_v48 }
 0x103   :  { %vm721_vm6 = vmor %vm592_vm4, %vm655_vm1 }
 0x104   :  { %vm720_vm7 = vmor %vm591_vm5, %vm655_vm1  ;;  %v3807_v50 = vsel %vm721_vm6, 1.0, %v4199_v19 }
 0x105   :  { %4079 = vmatmul.mubr.msk.bf16.gmra.mrb[60].mxu0 %vm1140_vm10, %v1071_v49  ;;  %v346_v51 = vpop.permute.xlu1 %345  ;;  %v343_v52 = vpop.permute.xlu0 %342  ;;  %v3806_v53 = vsel %vm720_vm7, 1.0, %v4199_v19 }
 0x106   :  { %vm594_vm8 = vcmp.eq.s32.totalorder %v4429_v8, %v346_v51  ;;  %vm593_vm9 = vcmp.eq.s32.totalorder %v4429_v8, %v343_v52  ;;  %v1072_v54 = vpack.c.bf16 %v3807_v50, %v3806_v53 }
 0x107   :  { %vm723_vm11 = vmor %vm594_vm8, %vm655_vm1 }
 0x108   :  { %v3809_v55 = vsel %vm723_vm11, 1.0, %v4199_v19  ;;  %vm722_vm12 = vmor %vm593_vm9, %vm655_vm1  ;;  %4082 = vmatprep.mubr.msk.bf16.mxu1 %vm1140_vm10, %v1072_v54 }
 0x109   :  { %v3808_v56 = vsel %vm722_vm12, 1.0, %v4199_v19  ;;  %v352_v57 = vpop.permute.xlu1 %351  ;;  %v349_v58 = vpop.permute.xlu0 %348 }
 0x10a   :  { %v1073_v59 = vpack.c.bf16 %v3809_v55, %v3808_v56  ;;  %vm596_vm13 = vcmp.eq.s32.totalorder %v4429_v8, %v352_v57  ;;  %vm595_vm14 = vcmp.eq.s32.totalorder %v4429_v8, %v349_v58 }
 0x10b   :  { %vm725_vm15 = vmor %vm596_vm13, %vm655_vm1 }
 0x10c   :  { %v3811_v60 = vsel %vm725_vm15, 1.0, %v4199_v19  ;;  %vm724_vm0 = vmor %vm595_vm14, %vm655_vm1  ;;  %4083 = vmatmul.mubr.msk.bf16.vlgmr.msra.gmra.mrb[0].mxu1 %vm1140_vm10, %v1073_v59 }
 0x10d   :  { %v3810_v61 = vsel %vm724_vm0, 1.0, %v4199_v19  ;;  %v358_v62 = vpop.permute.xlu1 %357  ;;  %v355_v63 = vpop.permute.xlu0 %354 }
 0x10e   :  { %v1074_v0 = vpack.c.bf16 %v3811_v60, %v3810_v61  ;;  %vm598_vm2 = vcmp.eq.s32.totalorder %v4429_v8, %v358_v62  ;;  %vm597_vm3 = vcmp.eq.s32.totalorder %v4429_v8, %v355_v63 }
 0x10f   :  { %vm727_vm4 = vmor %vm598_vm2, %vm655_vm1 }
 0x110   :  { %v3813_v1 = vsel %vm727_vm4, 1.0, %v4199_v19  ;;  %vm726_vm5 = vmor %vm597_vm3, %vm655_vm1  ;;  %4086 = vmatprep.mubr.msk.bf16.mxu1 %vm1140_vm10, %v1074_v0 }
 0x111   :  { %v3812_v2 = vsel %vm726_vm5, 1.0, %v4199_v19  ;;  %v364_v3 = vpop.permute.xlu1 %363  ;;  %v361_v4 = vpop.permute.xlu0 %360 }
 0x112   :  { %v1075_v5 = vpack.c.bf16 %v3813_v1, %v3812_v2  ;;  %vm600_vm6 = vcmp.eq.s32.totalorder %v4429_v8, %v364_v3  ;;  %vm599_vm7 = vcmp.eq.s32.totalorder %v4429_v8, %v361_v4 }
 0x113   :  { %vm729_vm8 = vmor %vm600_vm6, %vm655_vm1 }
 0x114   :  { %v3815_v6 = vsel %vm729_vm8, 1.0, %v4199_v19  ;;  %vm728_vm9 = vmor %vm599_vm7, %vm655_vm1  ;;  %4087 = vmatmul.mubr.msk.bf16.gmra.mrb[4].mxu1 %vm1140_vm10, %v1075_v5 }
 0x115   :  { %v3814_v7 = vsel %vm728_vm9, 1.0, %v4199_v19  ;;  %v370_v9 = vpop.permute.xlu1 %369  ;;  %v367_v10 = vpop.permute.xlu0 %366 }
 0x116   :  { %v1076_v11 = vpack.c.bf16 %v3815_v6, %v3814_v7  ;;  %vm602_vm11 = vcmp.eq.s32.totalorder %v4429_v8, %v370_v9  ;;  %vm601_vm12 = vcmp.eq.s32.totalorder %v4429_v8, %v367_v10 }
 0x117   :  { %vm731_vm13 = vmor %vm602_vm11, %vm655_vm1 }
 0x118   :  { %v3817_v12 = vsel %vm731_vm13, 1.0, %v4199_v19  ;;  %vm730_vm14 = vmor %vm601_vm12, %vm655_vm1  ;;  %4090 = vmatprep.mubr.msk.bf16.mxu1 %vm1140_vm10, %v1076_v11 }
 0x119   :  { %v3816_v13 = vsel %vm730_vm14, 1.0, %v4199_v19  ;;  %v376_v14 = vpop.permute.xlu1 %375  ;;  %v373_v15 = vpop.permute.xlu0 %372 }
 0x11a   :  { %v1077_v16 = vpack.c.bf16 %v3817_v12, %v3816_v13  ;;  %vm604_vm15 = vcmp.eq.s32.totalorder %v4429_v8, %v376_v14  ;;  %vm603_vm0 = vcmp.eq.s32.totalorder %v4429_v8, %v373_v15 }
 0x11b   :  { %vm733_vm2 = vmor %vm604_vm15, %vm655_vm1 }
 0x11c   :  { %v3819_v17 = vsel %vm733_vm2, 1.0, %v4199_v19  ;;  %vm732_vm3 = vmor %vm603_vm0, %vm655_vm1  ;;  %4091 = vmatmul.mubr.msk.bf16.gmra.mrb[8].mxu1 %vm1140_vm10, %v1077_v16 }
 0x11d   :  { %v3818_v18 = vsel %vm732_vm3, 1.0, %v4199_v19  ;;  %v382_v20 = vpop.permute.xlu1 %381  ;;  %v379_v21 = vpop.permute.xlu0 %378 }
 0x11e   :  { %v1078_v22 = vpack.c.bf16 %v3819_v17, %v3818_v18  ;;  %vm606_vm4 = vcmp.eq.s32.totalorder %v4429_v8, %v382_v20  ;;  %vm605_vm5 = vcmp.eq.s32.totalorder %v4429_v8, %v379_v21 }
 0x11f   :  { %vm735_vm6 = vmor %vm606_vm4, %vm655_vm1 }
 0x120   :  { %v3821_v23 = vsel %vm735_vm6, 1.0, %v4199_v19  ;;  %vm734_vm7 = vmor %vm605_vm5, %vm655_vm1  ;;  %4094 = vmatprep.mubr.msk.bf16.mxu1 %vm1140_vm10, %v1078_v22 }
 0x121   :  { %v3820_v24 = vsel %vm734_vm7, 1.0, %v4199_v19  ;;  %v388_v25 = vpop.permute.xlu1 %387  ;;  %v385_v26 = vpop.permute.xlu0 %384 }
 0x122   :  { %v1079_v27 = vpack.c.bf16 %v3821_v23, %v3820_v24  ;;  %vm608_vm8 = vcmp.eq.s32.totalorder %v4429_v8, %v388_v25  ;;  %vm607_vm9 = vcmp.eq.s32.totalorder %v4429_v8, %v385_v26 }
 0x123   :  { %vm737_vm11 = vmor %vm608_vm8, %vm655_vm1 }
 0x124   :  { %v3823_v28 = vsel %vm737_vm11, 1.0, %v4199_v19  ;;  %vm736_vm12 = vmor %vm607_vm9, %vm655_vm1  ;;  %4095 = vmatmul.mubr.msk.bf16.gmra.mrb[12].mxu1 %vm1140_vm10, %v1079_v27 }
 0x125   :  { %v3822_v29 = vsel %vm736_vm12, 1.0, %v4199_v19  ;;  %v394_v30 = vpop.permute.xlu1 %393  ;;  %v391_v31 = vpop.permute.xlu0 %390 }
 0x126   :  { %v1080_v32 = vpack.c.bf16 %v3823_v28, %v3822_v29  ;;  %vm610_vm13 = vcmp.eq.s32.totalorder %v4429_v8, %v394_v30  ;;  %vm609_vm14 = vcmp.eq.s32.totalorder %v4429_v8, %v391_v31 }
 0x127   :  { %vm739_vm15 = vmor %vm610_vm13, %vm655_vm1 }
 0x128   :  { %v3825_v33 = vsel %vm739_vm15, 1.0, %v4199_v19  ;;  %vm738_vm0 = vmor %vm609_vm14, %vm655_vm1  ;;  %4098 = vmatprep.mubr.msk.bf16.mxu1 %vm1140_vm10, %v1080_v32 }
 0x129   :  { %v3824_v34 = vsel %vm738_vm0, 1.0, %v4199_v19  ;;  %v400_v35 = vpop.permute.xlu1 %399  ;;  %v397_v36 = vpop.permute.xlu0 %396 }
 0x12a   :  { %v1081_v37 = vpack.c.bf16 %v3825_v33, %v3824_v34  ;;  %vm612_vm2 = vcmp.eq.s32.totalorder %v4429_v8, %v400_v35  ;;  %vm611_vm3 = vcmp.eq.s32.totalorder %v4429_v8, %v397_v36 }
 0x12b   :  { %vm741_vm4 = vmor %vm612_vm2, %vm655_vm1 }
 0x12c   :  { %v3827_v38 = vsel %vm741_vm4, 1.0, %v4199_v19  ;;  %vm740_vm5 = vmor %vm611_vm3, %vm655_vm1  ;;  %4099 = vmatmul.mubr.msk.bf16.gmra.mrb[16].mxu1 %vm1140_vm10, %v1081_v37 }
 0x12d   :  { %v3826_v39 = vsel %vm740_vm5, 1.0, %v4199_v19  ;;  %v406_v40 = vpop.permute.xlu1 %405  ;;  %v403_v41 = vpop.permute.xlu0 %402 }
 0x12e   :  { %v1082_v42 = vpack.c.bf16 %v3827_v38, %v3826_v39  ;;  %vm614_vm6 = vcmp.eq.s32.totalorder %v4429_v8, %v406_v40  ;;  %vm613_vm7 = vcmp.eq.s32.totalorder %v4429_v8, %v403_v41 }
 0x12f   :  { %vm743_vm8 = vmor %vm614_vm6, %vm655_vm1 }
 0x130   :  { %v3829_v43 = vsel %vm743_vm8, 1.0, %v4199_v19  ;;  %vm742_vm9 = vmor %vm613_vm7, %vm655_vm1  ;;  %4102 = vmatprep.mubr.msk.bf16.mxu1 %vm1140_vm10, %v1082_v42 }
 0x131   :  { %v3828_v44 = vsel %vm742_vm9, 1.0, %v4199_v19  ;;  %v412_v45 = vpop.permute.xlu1 %411  ;;  %v409_v46 = vpop.permute.xlu0 %408 }
 0x132   :  { %v1083_v47 = vpack.c.bf16 %v3829_v43, %v3828_v44  ;;  %vm616_vm11 = vcmp.eq.s32.totalorder %v4429_v8, %v412_v45  ;;  %vm615_vm12 = vcmp.eq.s32.totalorder %v4429_v8, %v409_v46 }
 0x133   :  { %vm745_vm13 = vmor %vm616_vm11, %vm655_vm1 }
 0x134   :  { %v3831_v48 = vsel %vm745_vm13, 1.0, %v4199_v19  ;;  %vm744_vm14 = vmor %vm615_vm12, %vm655_vm1  ;;  %4103 = vmatmul.mubr.msk.bf16.gmra.mrb[20].mxu1 %vm1140_vm10, %v1083_v47 }
 0x135   :  { %v3830_v49 = vsel %vm744_vm14, 1.0, %v4199_v19  ;;  %v418_v50 = vpop.permute.xlu1 %417  ;;  %v415_v51 = vpop.permute.xlu0 %414 }
 0x136   :  { %v1084_v52 = vpack.c.bf16 %v3831_v48, %v3830_v49  ;;  %vm618_vm15 = vcmp.eq.s32.totalorder %v4429_v8, %v418_v50  ;;  %vm617_vm0 = vcmp.eq.s32.totalorder %v4429_v8, %v415_v51 }
 0x137   :  { %vm747_vm2 = vmor %vm618_vm15, %vm655_vm1 }
 0x138   :  { %v3833_v53 = vsel %vm747_vm2, 1.0, %v4199_v19  ;;  %vm746_vm3 = vmor %vm617_vm0, %vm655_vm1  ;;  %4106 = vmatprep.mubr.msk.bf16.mxu1 %vm1140_vm10, %v1084_v52 }
 0x139   :  { %v3832_v54 = vsel %vm746_vm3, 1.0, %v4199_v19  ;;  %v424_v55 = vpop.permute.xlu1 %423  ;;  %v421_v56 = vpop.permute.xlu0 %420 }
 0x13a   :  { %v1085_v57 = vpack.c.bf16 %v3833_v53, %v3832_v54  ;;  %vm620_vm4 = vcmp.eq.s32.totalorder %v4429_v8, %v424_v55  ;;  %vm619_vm5 = vcmp.eq.s32.totalorder %v4429_v8, %v421_v56 }
 0x13b   :  { %vm749_vm6 = vmor %vm620_vm4, %vm655_vm1 }
 0x13c   :  { %v3835_v58 = vsel %vm749_vm6, 1.0, %v4199_v19  ;;  %vm748_vm7 = vmor %vm619_vm5, %vm655_vm1  ;;  %4107 = vmatmul.mubr.msk.bf16.gmra.mrb[24].mxu1 %vm1140_vm10, %v1085_v57 }
 0x13d   :  { %v3834_v59 = vsel %vm748_vm7, 1.0, %v4199_v19  ;;  %v430_v60 = vpop.permute.xlu1 %429  ;;  %v427_v61 = vpop.permute.xlu0 %426 }
 0x13e   :  { %v1086_v62 = vpack.c.bf16 %v3835_v58, %v3834_v59  ;;  %vm622_vm8 = vcmp.eq.s32.totalorder %v4429_v8, %v430_v60  ;;  %vm621_vm9 = vcmp.eq.s32.totalorder %v4429_v8, %v427_v61 }
 0x13f   :  { %vm751_vm11 = vmor %vm622_vm8, %vm655_vm1 }
 0x140   :  { %v3837_v63 = vsel %vm751_vm11, 1.0, %v4199_v19  ;;  %vm750_vm12 = vmor %vm621_vm9, %vm655_vm1  ;;  %4110 = vmatprep.mubr.msk.bf16.mxu1 %vm1140_vm10, %v1086_v62 }
 0x141   :  { %v3836_v0 = vsel %vm750_vm12, 1.0, %v4199_v19  ;;  %v436_v1 = vpop.permute.xlu1 %435  ;;  %v433_v2 = vpop.permute.xlu0 %432 }
 0x142   :  { %v1087_v3 = vpack.c.bf16 %v3837_v63, %v3836_v0  ;;  %vm624_vm13 = vcmp.eq.s32.totalorder %v4429_v8, %v436_v1  ;;  %vm623_vm14 = vcmp.eq.s32.totalorder %v4429_v8, %v433_v2 }
 0x143   :  { %vm753_vm15 = vmor %vm624_vm13, %vm655_vm1 }
 0x144   :  { %v3839_v4 = vsel %vm753_vm15, 1.0, %v4199_v19  ;;  %vm752_vm0 = vmor %vm623_vm14, %vm655_vm1  ;;  %4111 = vmatmul.mubr.msk.bf16.gmra.mrb[28].mxu1 %vm1140_vm10, %v1087_v3 }
 0x145   :  { %v3838_v5 = vsel %vm752_vm0, 1.0, %v4199_v19  ;;  %v442_v6 = vpop.permute.xlu1 %441  ;;  %v439_v7 = vpop.permute.xlu0 %438 }
 0x146   :  { %v1088_v9 = vpack.c.bf16 %v3839_v4, %v3838_v5  ;;  %vm626_vm2 = vcmp.eq.s32.totalorder %v4429_v8, %v442_v6  ;;  %vm625_vm3 = vcmp.eq.s32.totalorder %v4429_v8, %v439_v7 }
 0x147   :  { %vm755_vm4 = vmor %vm626_vm2, %vm655_vm1 }
 0x148   :  { %v3841_v10 = vsel %vm755_vm4, 1.0, %v4199_v19  ;;  %vm754_vm5 = vmor %vm625_vm3, %vm655_vm1  ;;  %4114 = vmatprep.mubr.msk.bf16.mxu1 %vm1140_vm10, %v1088_v9 }
 0x149   :  { %v3840_v11 = vsel %vm754_vm5, 1.0, %v4199_v19  ;;  %v448_v12 = vpop.permute.xlu1 %447  ;;  %v445_v13 = vpop.permute.xlu0 %444 }
 0x14a   :  { %v1089_v14 = vpack.c.bf16 %v3841_v10, %v3840_v11  ;;  %vm628_vm6 = vcmp.eq.s32.totalorder %v4429_v8, %v448_v12  ;;  %vm627_vm7 = vcmp.eq.s32.totalorder %v4429_v8, %v445_v13 }
 0x14b   :  { %vm757_vm8 = vmor %vm628_vm6, %vm655_vm1 }
 0x14c   :  { %v3843_v15 = vsel %vm757_vm8, 1.0, %v4199_v19  ;;  %vm756_vm9 = vmor %vm627_vm7, %vm655_vm1  ;;  %4115 = vmatmul.mubr.msk.bf16.gmra.mrb[32].mxu1 %vm1140_vm10, %v1089_v14 }
 0x14d   :  { %v3842_v16 = vsel %vm756_vm9, 1.0, %v4199_v19  ;;  %v454_v17 = vpop.permute.xlu1 %453  ;;  %v451_v18 = vpop.permute.xlu0 %450 }
 0x14e   :  { %v1090_v20 = vpack.c.bf16 %v3843_v15, %v3842_v16  ;;  %vm630_vm11 = vcmp.eq.s32.totalorder %v4429_v8, %v454_v17  ;;  %vm629_vm12 = vcmp.eq.s32.totalorder %v4429_v8, %v451_v18 }
 0x14f   :  { %vm759_vm13 = vmor %vm630_vm11, %vm655_vm1 }
 0x150   :  { %v3845_v21 = vsel %vm759_vm13, 1.0, %v4199_v19  ;;  %vm758_vm14 = vmor %vm629_vm12, %vm655_vm1  ;;  %4118 = vmatprep.mubr.msk.bf16.mxu1 %vm1140_vm10, %v1090_v20 }
 0x151   :  { %v3844_v22 = vsel %vm758_vm14, 1.0, %v4199_v19  ;;  %v460_v23 = vpop.permute.xlu1 %459  ;;  %v457_v24 = vpop.permute.xlu0 %456 }
 0x152   :  { %v1091_v25 = vpack.c.bf16 %v3845_v21, %v3844_v22  ;;  %vm632_vm15 = vcmp.eq.s32.totalorder %v4429_v8, %v460_v23  ;;  %vm631_vm0 = vcmp.eq.s32.totalorder %v4429_v8, %v457_v24 }
 0x153   :  { %vm761_vm2 = vmor %vm632_vm15, %vm655_vm1 }
 0x154   :  { %v3847_v26 = vsel %vm761_vm2, 1.0, %v4199_v19  ;;  %vm760_vm3 = vmor %vm631_vm0, %vm655_vm1  ;;  %4119 = vmatmul.mubr.msk.bf16.gmra.mrb[36].mxu1 %vm1140_vm10, %v1091_v25 }
 0x155   :  { %v3846_v27 = vsel %vm760_vm3, 1.0, %v4199_v19  ;;  %v466_v28 = vpop.permute.xlu1 %465  ;;  %v463_v29 = vpop.permute.xlu0 %462 }
 0x156   :  { %v1092_v30 = vpack.c.bf16 %v3847_v26, %v3846_v27  ;;  %vm634_vm4 = vcmp.eq.s32.totalorder %v4429_v8, %v466_v28  ;;  %vm633_vm5 = vcmp.eq.s32.totalorder %v4429_v8, %v463_v29 }
 0x157   :  { %vm763_vm6 = vmor %vm634_vm4, %vm655_vm1 }
 0x158   :  { %v3849_v31 = vsel %vm763_vm6, 1.0, %v4199_v19  ;;  %vm762_vm7 = vmor %vm633_vm5, %vm655_vm1  ;;  %4122 = vmatprep.mubr.msk.bf16.mxu1 %vm1140_vm10, %v1092_v30 }
 0x159   :  { %v3848_v32 = vsel %vm762_vm7, 1.0, %v4199_v19  ;;  %v472_v33 = vpop.permute.xlu1 %471  ;;  %v469_v34 = vpop.permute.xlu0 %468 }
 0x15a   :  { %v1093_v35 = vpack.c.bf16 %v3849_v31, %v3848_v32  ;;  %vm636_vm8 = vcmp.eq.s32.totalorder %v4429_v8, %v472_v33  ;;  %vm635_vm9 = vcmp.eq.s32.totalorder %v4429_v8, %v469_v34 }
 0x15b   :  { %vm765_vm11 = vmor %vm636_vm8, %vm655_vm1 }
 0x15c   :  { %v3851_v36 = vsel %vm765_vm11, 1.0, %v4199_v19  ;;  %vm764_vm12 = vmor %vm635_vm9, %vm655_vm1  ;;  %4123 = vmatmul.mubr.msk.bf16.gmra.mrb[40].mxu1 %vm1140_vm10, %v1093_v35 }
 0x15d   :  { %v3850_v37 = vsel %vm764_vm12, 1.0, %v4199_v19  ;;  %v478_v38 = vpop.permute.xlu1 %477  ;;  %v475_v39 = vpop.permute.xlu0 %474 }
 0x15e   :  { %v1094_v40 = vpack.c.bf16 %v3851_v36, %v3850_v37  ;;  %vm638_vm13 = vcmp.eq.s32.totalorder %v4429_v8, %v478_v38  ;;  %vm637_vm14 = vcmp.eq.s32.totalorder %v4429_v8, %v475_v39 }
 0x15f   :  { %vm767_vm15 = vmor %vm638_vm13, %vm655_vm1 }
 0x160   :  { %v3853_v41 = vsel %vm767_vm15, 1.0, %v4199_v19  ;;  %vm766_vm0 = vmor %vm637_vm14, %vm655_vm1  ;;  %v5125_v42 = vpop.f32.mrb[0].mxu0  ;;  %4126 = vmatprep.mubr.msk.bf16.mxu1 %vm1140_vm10, %v1094_v40 }
 0x161   :  { %8176 = vst [vmem:[#allocation5_spill] sm:$0xff] %v5125_v42  ;;  %v3852_v43 = vsel %vm766_vm0, 1.0, %v4199_v19  ;;  %v5129_v44 = vpop.f32.mrb[1].mxu0  ;;  %v484_v45 = vpop.permute.xlu1 %483 }
 0x162   :  { %8177 = vst [vmem:[#allocation6_spill] sm:$0xff] %v5129_v44  ;;  %v1095_v46 = vpack.c.bf16 %v3853_v41, %v3852_v43  ;;  %vm640_vm2 = vcmp.eq.s32.totalorder %v4429_v8, %v484_v45  ;;  %v5132_v47 = vpop.f32.mrb[2].mxu0  ;;  %v481_v48 = vpop.permute.xlu0 %480 }
 0x163   :  { %8178 = vst [vmem:[#allocation7_spill] sm:$0xff] %v5132_v47  ;;  %vm769_vm3 = vmor %vm640_vm2, %vm655_vm1  ;;  %vm639_vm4 = vcmp.eq.s32.totalorder %v4429_v8, %v481_v48  ;;  %v5137_v49 = vpop.f32.mrb[3].mxu0 }
 0x164   :  { %8179 = vst [vmem:[#allocation8_spill] sm:$0xff] %v5137_v49  ;;  %v3855_v50 = vsel %vm769_vm3, 1.0, %v4199_v19  ;;  %vm768_vm5 = vmor %vm639_vm4, %vm655_vm1  ;;  %4127 = vmatmul.mubr.msk.bf16.gmra.mrb[44].mxu1 %vm1140_vm10, %v1095_v46 }
 0x165   :  { %v3854_v51 = vsel %vm768_vm5, 1.0, %v4199_v19  ;;  %v490_v52 = vpop.permute.xlu1 %489 }
 0x166   :  { %v1096_v53 = vpack.c.bf16 %v3855_v50, %v3854_v51  ;;  %vm642_vm6 = vcmp.eq.s32.totalorder %v4429_v8, %v490_v52  ;;  %v487_v54 = vpop.permute.xlu0 %486 }
 0x167   :  { %vm771_vm7 = vmor %vm642_vm6, %vm655_vm1  ;;  %vm641_vm8 = vcmp.eq.s32.totalorder %v4429_v8, %v487_v54 }
 0x168   :  { %v3857_v55 = vsel %vm771_vm7, 1.0, %v4199_v19  ;;  %vm770_vm9 = vmor %vm641_vm8, %vm655_vm1  ;;  %v5151_v56 = vpop.f32.mrb[4].mxu0  ;;  %4130 = vmatprep.mubr.msk.bf16.mxu1 %vm1140_vm10, %v1096_v53 }
 0x169   :  { %8180 = vst [vmem:[#allocation9_spill] sm:$0xff] %v5151_v56  ;;  %v3856_v57 = vsel %vm770_vm9, 1.0, %v4199_v19  ;;  %v5155_v58 = vpop.f32.mrb[5].mxu0  ;;  %v496_v59 = vpop.permute.xlu1 %495 }
 0x16a   :  { %8181 = vst [vmem:[#allocation10_spill] sm:$0xff] %v5155_v58  ;;  %v1097_v60 = vpack.c.bf16 %v3857_v55, %v3856_v57  ;;  %vm644_vm11 = vcmp.eq.s32.totalorder %v4429_v8, %v496_v59  ;;  %v5158_v61 = vpop.f32.mrb[6].mxu0  ;;  %v493_v62 = vpop.permute.xlu0 %492 }
 0x16b   :  { %8182 = vst [vmem:[#allocation11_spill] sm:$0xff] %v5158_v61  ;;  %vm773_vm12 = vmor %vm644_vm11, %vm655_vm1  ;;  %vm643_vm13 = vcmp.eq.s32.totalorder %v4429_v8, %v493_v62  ;;  %v5163_v63 = vpop.f32.mrb[7].mxu0 }
 0x16c   :  { %8183 = vst [vmem:[#allocation12_spill] sm:$0xff] %v5163_v63  ;;  %v3859_v0 = vsel %vm773_vm12, 1.0, %v4199_v19  ;;  %vm772_vm14 = vmor %vm643_vm13, %vm655_vm1  ;;  %4131 = vmatmul.mubr.msk.bf16.gmra.mrb[48].mxu1 %vm1140_vm10, %v1097_v60 }
 0x16d   :  { %v3858_v1 = vsel %vm772_vm14, 1.0, %v4199_v19  ;;  %v502_v2 = vpop.permute.xlu1 %501 }
 0x16e   :  { %v1098_v3 = vpack.c.bf16 %v3859_v0, %v3858_v1  ;;  %vm646_vm15 = vcmp.eq.s32.totalorder %v4429_v8, %v502_v2  ;;  %v499_v4 = vpop.permute.xlu0 %498 }
 0x16f   :  { %vm775_vm0 = vmor %vm646_vm15, %vm655_vm1  ;;  %vm645_vm2 = vcmp.eq.s32.totalorder %v4429_v8, %v499_v4 }
 0x170   :  { %v3861_v5 = vsel %vm775_vm0, 1.0, %v4199_v19  ;;  %vm774_vm3 = vmor %vm645_vm2, %vm655_vm1  ;;  %v5177_v6 = vpop.f32.mrb[8].mxu0  ;;  %4134 = vmatprep.mubr.msk.bf16.mxu1 %vm1140_vm10, %v1098_v3 }
 0x171   :  { %8184 = vst [vmem:[#allocation13_spill] sm:$0xff] %v5177_v6  ;;  %v3860_v7 = vsel %vm774_vm3, 1.0, %v4199_v19  ;;  %v5181_v9 = vpop.f32.mrb[9].mxu0  ;;  %v508_v10 = vpop.permute.xlu1 %507 }
 0x172   :  { %8185 = vst [vmem:[#allocation14_spill] sm:$0xff] %v5181_v9  ;;  %v1099_v11 = vpack.c.bf16 %v3861_v5, %v3860_v7  ;;  %vm648_vm4 = vcmp.eq.s32.totalorder %v4429_v8, %v508_v10  ;;  %v5184_v12 = vpop.f32.mrb[10].mxu0  ;;  %v505_v13 = vpop.permute.xlu0 %504 }
 0x173   :  { %8186 = vst [vmem:[#allocation15_spill] sm:$0xff] %v5184_v12  ;;  %vm777_vm5 = vmor %vm648_vm4, %vm655_vm1  ;;  %vm647_vm6 = vcmp.eq.s32.totalorder %v4429_v8, %v505_v13  ;;  %v5189_v14 = vpop.f32.mrb[11].mxu0 }
 0x174   :  { %8187 = vst [vmem:[#allocation16_spill] sm:$0xff] %v5189_v14  ;;  %v3863_v15 = vsel %vm777_vm5, 1.0, %v4199_v19  ;;  %vm776_vm7 = vmor %vm647_vm6, %vm655_vm1  ;;  %4135 = vmatmul.mubr.msk.bf16.gmra.mrb[52].mxu1 %vm1140_vm10, %v1099_v11 }
 0x175   :  { %v3862_v16 = vsel %vm776_vm7, 1.0, %v4199_v19  ;;  %v514_v17 = vpop.permute.xlu1 %513 }
 0x176   :  { %v1100_v18 = vpack.c.bf16 %v3863_v15, %v3862_v16  ;;  %vm650_vm8 = vcmp.eq.s32.totalorder %v4429_v8, %v514_v17  ;;  %v511_v20 = vpop.permute.xlu0 %510 }
 0x177   :  { %vm779_vm9 = vmor %vm650_vm8, %vm655_vm1  ;;  %vm649_vm11 = vcmp.eq.s32.totalorder %v4429_v8, %v511_v20 }
 0x178   :  { %v3865_v21 = vsel %vm779_vm9, 1.0, %v4199_v19  ;;  %vm778_vm12 = vmor %vm649_vm11, %vm655_vm1  ;;  %v5203_v22 = vpop.f32.mrb[12].mxu0  ;;  %4138 = vmatprep.mubr.msk.bf16.mxu1 %vm1140_vm10, %v1100_v18 }
 0x179   :  { %8188 = vst [vmem:[#allocation17_spill] sm:$0xff] %v5203_v22  ;;  %v3864_v23 = vsel %vm778_vm12, 1.0, %v4199_v19  ;;  %v5207_v24 = vpop.f32.mrb[13].mxu0  ;;  %v520_v25 = vpop.permute.xlu1 %519 }
 0x17a   :  { %8189 = vst [vmem:[#allocation18_spill] sm:$0xff] %v5207_v24  ;;  %v1101_v26 = vpack.c.bf16 %v3865_v21, %v3864_v23  ;;  %vm652_vm13 = vcmp.eq.s32.totalorder %v4429_v8, %v520_v25  ;;  %v5210_v27 = vpop.f32.mrb[14].mxu0  ;;  %v517_v28 = vpop.permute.xlu0 %516 }
 0x17b   :  { %8190 = vst [vmem:[#allocation19_spill] sm:$0xff] %v5210_v27  ;;  %vm781_vm14 = vmor %vm652_vm13, %vm655_vm1  ;;  %vm651_vm15 = vcmp.eq.s32.totalorder %v4429_v8, %v517_v28  ;;  %v5215_v29 = vpop.f32.mrb[15].mxu0 }
 0x17c   :  { %8191 = vst [vmem:[#allocation20_spill] sm:$0xff] %v5215_v29  ;;  %v3867_v30 = vsel %vm781_vm14, 1.0, %v4199_v19  ;;  %vm780_vm0 = vmor %vm651_vm15, %vm655_vm1  ;;  %4139 = vmatmul.mubr.msk.bf16.gmra.mrb[56].mxu1 %vm1140_vm10, %v1101_v26 }
 0x17d   :  { %v3866_v31 = vsel %vm780_vm0, 1.0, %v4199_v19  ;;  %v526_v32 = vpop.permute.xlu1 %525 }
 0x17e   :  { %v1102_v33 = vpack.c.bf16 %v3867_v30, %v3866_v31  ;;  %vm654_vm2 = vcmp.eq.s32.totalorder %v4429_v8, %v526_v32  ;;  %v523_v34 = vpop.permute.xlu0 %522 }
 0x17f   :  { %vm783_vm3 = vmor %vm654_vm2, %vm655_vm1  ;;  %vm653_vm4 = vcmp.eq.s32.totalorder %v4429_v8, %v523_v34 }
 0x180   :  { %v3869_v35 = vsel %vm783_vm3, 1.0, %v4199_v19  ;;  %vm782_vm5 = vmor %vm653_vm4, %vm655_vm1  ;;  %v5229_v36 = vpop.f32.mrb[16].mxu0  ;;  %4142 = vmatprep.mubr.msk.bf16.mxu1 %vm1140_vm10, %v1102_v33  ;;  %vm2762_vm1 = vcmask 64512  }
 0x181   :  { %8192 = vst [vmem:[#allocation21_spill] sm:$0xff] %v5229_v36  ;;  %v3868_v37 = vsel %vm782_vm5, 1.0, %v4199_v19  ;;  %v5233_v38 = vpop.f32.mrb[17].mxu0 }
 0x182   :  { %8193 = vst [vmem:[#allocation22_spill] sm:$0xff] %v5233_v38  ;;  %v1103_v39 = vpack.c.bf16 %v3869_v35, %v3868_v37  ;;  %v5235_v40 = vpop.f32.mrb[18].mxu0 }
 0x183   :  { %8194 = vst [vmem:[#allocation23_spill] sm:$0xff] %v5235_v40  ;;  %v5237_v41 = vpop.f32.mrb[19].mxu0 }
 0x184   :  { %8195 = vst [vmem:[#allocation24_spill] sm:$0xff] %v5237_v41  ;;  %4143 = vmatmul.mubr.msk.bf16.gmra.mrb[60].mxu1 %vm1140_vm10, %v1103_v39  ;;  %vm3499_vm10 = vcmask 261312  }
 0x188   :  { %v5240_v43 = vpop.f32.mrb[20].mxu0 }
 0x189   :  { %8196 = vst [vmem:[#allocation25_spill] sm:$0xff] %v5240_v43  ;;  %v5242_v45 = vpop.f32.mrb[21].mxu0 }
 0x18a   :  { %8197 = vst [vmem:[#allocation26_spill] sm:$0xff] %v5242_v45  ;;  %v5244_v8 = vpop.f32.mrb[22].mxu0 }
 0x18b   :  { %8198 = vst [vmem:[#allocation27_spill] sm:$0xff] %v5244_v8  ;;  %v5246_v46 = vpop.f32.mrb[23].mxu0 }
 0x18c   :  { %8199 = vst [vmem:[#allocation28_spill] sm:$0xff] %v5246_v46 }
 0x190   :  { %v5248_v48 = vpop.f32.mrb[24].mxu0 }
 0x191   :  { %8200 = vst [vmem:[#allocation29_spill] sm:$0xff] %v5248_v48  ;;  %v5250_v19 = vpop.f32.mrb[25].mxu0 }
 0x192   :  { %8201 = vst [vmem:[#allocation30_spill] sm:$0xff] %v5250_v19  ;;  %v5252_v50 = vpop.f32.mrb[26].mxu0 }
 0x193   :  { %8202 = vst [vmem:[#allocation31_spill] sm:$0xff] %v5252_v50  ;;  %v5254_v51 = vpop.f32.mrb[27].mxu0 }
 0x194   :  { %8203 = vst [vmem:[#allocation32_spill] sm:$0xff] %v5254_v51 }
 0x198   :  { %v5256_v52 = vpop.f32.mrb[28].mxu0 }
 0x199   :  { %8204 = vst [vmem:[#allocation33_spill] sm:$0xff] %v5256_v52  ;;  %v5258_v53 = vpop.f32.mrb[29].mxu0 }
 0x19a   :  { %8205 = vst [vmem:[#allocation34_spill] sm:$0xff] %v5258_v53  ;;  %v5260_v54 = vpop.f32.mrb[30].mxu0 }
 0x19b   :  { %8206 = vst [vmem:[#allocation35_spill] sm:$0xff] %v5260_v54  ;;  %v5262_v55 = vpop.f32.mrb[31].mxu0 }
 0x19c   :  { %8207 = vst [vmem:[#allocation36_spill] sm:$0xff] %v5262_v55 }
 0x1a0   :  { %v5264_v57 = vpop.f32.mrb[32].mxu0 }
 0x1a1   :  { %8208 = vst [vmem:[#allocation37_spill] sm:$0xff] %v5264_v57  ;;  %v5266_v59 = vpop.f32.mrb[33].mxu0 }
 0x1a2   :  { %8209 = vst [vmem:[#allocation38_spill] sm:$0xff] %v5266_v59  ;;  %v5268_v60 = vpop.f32.mrb[34].mxu0 }
 0x1a3   :  { %8210 = vst [vmem:[#allocation39_spill] sm:$0xff] %v5268_v60  ;;  %v5270_v62 = vpop.f32.mrb[35].mxu0 }
 0x1a4   :  { %8211 = vst [vmem:[#allocation40_spill] sm:$0xff] %v5270_v62 }
 0x1a8   :  { %v5272_v0 = vpop.f32.mrb[36].mxu0 }
 0x1a9   :  { %8212 = vst [vmem:[#allocation41_spill] sm:$0xff] %v5272_v0  ;;  %v5274_v1 = vpop.f32.mrb[37].mxu0 }
 0x1aa   :  { %8213 = vst [vmem:[#allocation42_spill] sm:$0xff] %v5274_v1  ;;  %v5276_v2 = vpop.f32.mrb[38].mxu0 }
 0x1ab   :  { %8214 = vst [vmem:[#allocation43_spill] sm:$0xff] %v5276_v2  ;;  %v5278_v3 = vpop.f32.mrb[39].mxu0 }
 0x1ac   :  { %8215 = vst [vmem:[#allocation44_spill] sm:$0xff] %v5278_v3 }
 0x1b0   :  { %v5280_v4 = vpop.f32.mrb[40].mxu0 }
 0x1b1   :  { %8216 = vst [vmem:[#allocation45_spill] sm:$0xff] %v5280_v4  ;;  %v5282_v5 = vpop.f32.mrb[41].mxu0 }
 0x1b2   :  { %8217 = vst [vmem:[#allocation46_spill] sm:$0xff] %v5282_v5  ;;  %v5284_v7 = vpop.f32.mrb[42].mxu0 }
 0x1b3   :  { %8218 = vst [vmem:[#allocation47_spill] sm:$0xff] %v5284_v7  ;;  %v5286_v10 = vpop.f32.mrb[43].mxu0 }
 0x1b4   :  { %8219 = vst [vmem:[#allocation48_spill] sm:$0xff] %v5286_v10 }
 0x1b8   :  { %v5288_v11 = vpop.f32.mrb[44].mxu0 }
 0x1b9   :  { %8220 = vst [vmem:[#allocation49_spill] sm:$0xff] %v5288_v11  ;;  %v5290_v13 = vpop.f32.mrb[45].mxu0 }
 0x1ba   :  { %8221 = vst [vmem:[#allocation50_spill] sm:$0xff] %v5290_v13  ;;  %v5292_v15 = vpop.f32.mrb[46].mxu0 }
 0x1bb   :  { %8222 = vst [vmem:[#allocation51_spill] sm:$0xff] %v5292_v15  ;;  %v5294_v16 = vpop.f32.mrb[47].mxu0 }
 0x1bc   :  { %8223 = vst [vmem:[#allocation52_spill] sm:$0xff] %v5294_v16 }
 0x1c0   :  { %v5296_v17 = vpop.f32.mrb[48].mxu0 }
 0x1c1   :  { %v5298_v18 = vpop.f32.mrb[49].mxu0 }
 0x1c2   :  { %v5300_v20 = vpop.f32.mrb[50].mxu0 }
 0x1c3   :  { %v5302_v21 = vpop.f32.mrb[51].mxu0 }
 0x1c8   :  { %v5304_v23 = vpop.f32.mrb[52].mxu0 }
 0x1c9   :  { %v5306_v25 = vpop.f32.mrb[53].mxu0 }
 0x1ca   :  { %v5308_v26 = vpop.f32.mrb[54].mxu0 }
 0x1cb   :  { %v5310_v28 = vpop.f32.mrb[55].mxu0 }
 0x1d0   :  { %v5312_v30 = vpop.f32.mrb[56].mxu0 }
 0x1d1   :  { %v5314_v31 = vpop.f32.mrb[57].mxu0 }
 0x1d2   :  { %v5316_v32 = vpop.f32.mrb[58].mxu0 }
 0x1d3   :  { %v5318_v33 = vpop.f32.mrb[59].mxu0 }
 0x1d8   :  { %v5320_v34 = vpop.f32.mrb[60].mxu0 }
 0x1d9   :  { %v5322_v35 = vpop.f32.mrb[61].mxu0 }
 0x1da   :  { %v5324_v37 = vpop.f32.mrb[62].mxu0 }
 0x1db   :  { %v5326_v39 = vpop.f32.mrb[63].mxu0 }
 0x1df   :  { %v5328_v29 = vpop.f32.mrb[0].mxu1 }
 0x1e0   :  { %8224 = vst [vmem:[#allocation53_spill] sm:$0xff] %v5328_v29  ;;  %2078 = vrot.lane.b32.xlu0 %v5328_v29, %s4200_s0  ;;  %v5332_v24 = vpop.f32.mrb[1].mxu1 }
 0x1e1   :  { %8225 = vst [vmem:[#allocation54_spill] sm:$0xff] %v5332_v24  ;;  %v5334_v27 = vpop.f32.mrb[2].mxu1 }
 0x1e2   :  { %8226 = vst [vmem:[#allocation55_spill] sm:$0xff] %v5334_v27  ;;  %2080 = vrot.lane.b32.xlu1 %v5334_v27, %s4200_s0  ;;  %v5338_v22 = vpop.f32.mrb[3].mxu1 }
 0x1e3   :  { %8227 = vst [vmem:[#allocation56_spill] sm:$0xff] %v5338_v22 }
 0x1e4   :  { %2074 = vrot.lane.b32.xlu0 %v5332_v24, %s4200_s0 }
 0x1e6   :  { %2076 = vrot.lane.b32.xlu1 %v5338_v22, %s4200_s0 }
 0x1e7   :  { %v5344_v14 = vpop.f32.mrb[4].mxu1 }
 0x1e8   :  { %8228 = vst [vmem:[#allocation57_spill] sm:$0xff] %v5344_v14  ;;  %2086 = vrot.lane.b32.xlu0 %v5344_v14, %s4200_s0  ;;  %v5348_v9 = vpop.f32.mrb[5].mxu1 }
 0x1e9   :  { %8229 = vst [vmem:[#allocation58_spill] sm:$0xff] %v5348_v9  ;;  %v5350_v12 = vpop.f32.mrb[6].mxu1 }
 0x1ea   :  { %8230 = vst [vmem:[#allocation59_spill] sm:$0xff] %v5350_v12  ;;  %2088 = vrot.lane.b32.xlu1 %v5350_v12, %s4200_s0  ;;  %v5354_v6 = vpop.f32.mrb[7].mxu1 }
 0x1eb   :  { %8231 = vst [vmem:[#allocation60_spill] sm:$0xff] %v5354_v6 }
 0x1ec   :  { %2082 = vrot.lane.b32.xlu0 %v5348_v9, %s4200_s0 }
 0x1ee   :  { %2084 = vrot.lane.b32.xlu1 %v5354_v6, %s4200_s0 }
 0x1ef   :  { %v5360_v63 = vpop.f32.mrb[8].mxu1 }
 0x1f0   :  { %8232 = vst [vmem:[#allocation61_spill] sm:$0xff] %v5360_v63  ;;  %2094 = vrot.lane.b32.xlu0 %v5360_v63, %s4200_s0  ;;  %v5364_v58 = vpop.f32.mrb[9].mxu1 }
 0x1f1   :  { %8233 = vst [vmem:[#allocation62_spill] sm:$0xff] %v5364_v58  ;;  %v5366_v61 = vpop.f32.mrb[10].mxu1 }
 0x1f2   :  { %8234 = vst [vmem:[#allocation63_spill] sm:$0xff] %v5366_v61  ;;  %2096 = vrot.lane.b32.xlu1 %v5366_v61, %s4200_s0  ;;  %v5370_v56 = vpop.f32.mrb[11].mxu1 }
 0x1f3   :  { %8235 = vst [vmem:[#allocation64_spill] sm:$0xff] %v5370_v56 }
 0x1f4   :  { %2090 = vrot.lane.b32.xlu0 %v5364_v58, %s4200_s0 }
 0x1f6   :  { %2092 = vrot.lane.b32.xlu1 %v5370_v56, %s4200_s0 }
 0x1f7   :  { %v5376_v49 = vpop.f32.mrb[12].mxu1 }
 0x1f8   :  { %8236 = vst [vmem:[#allocation65_spill] sm:$0xff] %v5376_v49  ;;  %2102 = vrot.lane.b32.xlu0 %v5376_v49, %s4200_s0  ;;  %v5380_v44 = vpop.f32.mrb[13].mxu1 }
 0x1f9   :  { %8237 = vst [vmem:[#allocation66_spill] sm:$0xff] %v5380_v44  ;;  %v5382_v47 = vpop.f32.mrb[14].mxu1 }
 0x1fa   :  { %8238 = vst [vmem:[#allocation67_spill] sm:$0xff] %v5382_v47  ;;  %2104 = vrot.lane.b32.xlu1 %v5382_v47, %s4200_s0  ;;  %v5386_v42 = vpop.f32.mrb[15].mxu1 }
 0x1fb   :  { %8239 = vst [vmem:[#allocation68_spill] sm:$0xff] %v5386_v42 }
 0x1fc   :  { %2098 = vrot.lane.b32.xlu0 %v5380_v44, %s4200_s0 }
 0x1fe   :  { %2100 = vrot.lane.b32.xlu1 %v5386_v42, %s4200_s0 }
 0x1ff   :  { %v5392_v61 = vpop.f32.mrb[16].mxu1 }
 0x200   :  { %8240 = vst [vmem:[#allocation69_spill] sm:$0xff] %v5392_v61  ;;  %1982 = vrot.lane.b32.xlu0 %v5229_v36, %s4200_s0  ;;  %v5396_v49 = vpop.f32.mrb[17].mxu1 }
 0x201   :  { %8241 = vst [vmem:[#allocation70_spill] sm:$0xff] %v5396_v49  ;;  %v5398_v63 = vpop.f32.mrb[18].mxu1 }
 0x202   :  { %8242 = vst [vmem:[#allocation71_spill] sm:$0xff] %v5398_v63  ;;  %1984 = vrot.lane.b32.xlu1 %v5235_v40, %s4200_s0  ;;  %v5402_v47 = vpop.f32.mrb[19].mxu1 }
 0x203   :  { %8243 = vst [vmem:[#allocation72_spill] sm:$0xff] %v5402_v47 }
 0x204   :  { %2110 = vrot.lane.b32.xlu0 %v5392_v61, %s4200_s0 }
 0x206   :  { %2112 = vrot.lane.b32.xlu1 %v5398_v63, %s4200_s0 }
 0x207   :  { %v5408_v42 = vpop.f32.mrb[20].mxu1 }
 0x208   :  { %8244 = vst [vmem:[#allocation73_spill] sm:$0xff] %v5408_v42  ;;  %1978 = vrot.lane.b32.xlu0 %v5233_v38, %s4200_s0  ;;  %v5412_v36 = vpop.f32.mrb[21].mxu1 }
 0x209   :  { %8245 = vst [vmem:[#allocation74_spill] sm:$0xff] %v5412_v36  ;;  %v5414_v44 = vpop.f32.mrb[22].mxu1 }
 0x20a   :  { %8246 = vst [vmem:[#allocation75_spill] sm:$0xff] %v5414_v44  ;;  %1980 = vrot.lane.b32.xlu1 %v5237_v41, %s4200_s0  ;;  %v5418_v40 = vpop.f32.mrb[23].mxu1 }
 0x20b   :  { %8247 = vst [vmem:[#allocation76_spill] sm:$0xff] %v5418_v40 }
 0x20c   :  { %2106 = vrot.lane.b32.xlu0 %v5396_v49, %s4200_s0 }
 0x20e   :  { %2108 = vrot.lane.b32.xlu1 %v5402_v47, %s4200_s0 }
 0x20f   :  { %v5424_v63 = vpop.f32.mrb[24].mxu1 }
 0x210   :  { %8248 = vst [vmem:[#allocation77_spill] sm:$0xff] %v5424_v63  ;;  %1990 = vrot.lane.b32.xlu0 %v5240_v43, %s4200_s0  ;;  %v5428_v38 = vpop.f32.mrb[25].mxu1 }
 0x211   :  { %8249 = vst [vmem:[#allocation78_spill] sm:$0xff] %v5428_v38  ;;  %v5430_v61 = vpop.f32.mrb[26].mxu1 }
 0x212   :  { %8250 = vst [vmem:[#allocation79_spill] sm:$0xff] %v5430_v61  ;;  %1992 = vrot.lane.b32.xlu1 %v5244_v8, %s4200_s0  ;;  %v5434_v41 = vpop.f32.mrb[27].mxu1 }
 0x213   :  { %8251 = vst [vmem:[#allocation80_spill] sm:$0xff] %v5434_v41 }
 0x214   :  { %2118 = vrot.lane.b32.xlu0 %v5408_v42, %s4200_s0 }
 0x216   :  { %2120 = vrot.lane.b32.xlu1 %v5414_v44, %s4200_s0 }
 0x217   :  { %v5440_v47 = vpop.f32.mrb[28].mxu1 }
 0x218   :  { %8252 = vst [vmem:[#allocation81_spill] sm:$0xff] %v5440_v47  ;;  %1986 = vrot.lane.b32.xlu0 %v5242_v45, %s4200_s0  ;;  %v5444_v43 = vpop.f32.mrb[29].mxu1 }
 0x219   :  { %8253 = vst [vmem:[#allocation82_spill] sm:$0xff] %v5444_v43  ;;  %v5446_v49 = vpop.f32.mrb[30].mxu1 }
 0x21a   :  { %8254 = vst [vmem:[#allocation83_spill] sm:$0xff] %v5446_v49  ;;  %1988 = vrot.lane.b32.xlu1 %v5246_v46, %s4200_s0  ;;  %v5450_v8 = vpop.f32.mrb[31].mxu1 }
 0x21b   :  { %8255 = vst [vmem:[#allocation84_spill] sm:$0xff] %v5450_v8 }
 0x21c   :  { %2114 = vrot.lane.b32.xlu0 %v5412_v36, %s4200_s0 }
 0x21e   :  { %2116 = vrot.lane.b32.xlu1 %v5418_v40, %s4200_s0 }
 0x21f   :  { %v5456_v44 = vpop.f32.mrb[32].mxu1 }
 0x220   :  { %8256 = vst [vmem:[#allocation85_spill] sm:$0xff] %v5456_v44  ;;  %1998 = vrot.lane.b32.xlu0 %v5248_v48, %s4200_s0  ;;  %v5460_v45 = vpop.f32.mrb[33].mxu1 }
 0x221   :  { %8257 = vst [vmem:[#allocation86_spill] sm:$0xff] %v5460_v45  ;;  %v5462_v42 = vpop.f32.mrb[34].mxu1 }
 0x222   :  { %8258 = vst [vmem:[#allocation87_spill] sm:$0xff] %v5462_v42  ;;  %2000 = vrot.lane.b32.xlu1 %v5252_v50, %s4200_s0  ;;  %v5466_v46 = vpop.f32.mrb[35].mxu1 }
 0x223   :  { %8259 = vst [vmem:[#allocation88_spill] sm:$0xff] %v5466_v46 }
 0x224   :  { %2126 = vrot.lane.b32.xlu0 %v5424_v63, %s4200_s0 }
 0x226   :  { %2128 = vrot.lane.b32.xlu1 %v5430_v61, %s4200_s0 }
 0x227   :  { %v5472_v40 = vpop.f32.mrb[36].mxu1 }
 0x228   :  { %8260 = vst [vmem:[#allocation89_spill] sm:$0xff] %v5472_v40  ;;  %1994 = vrot.lane.b32.xlu0 %v5250_v19, %s4200_s0  ;;  %v5476_v48 = vpop.f32.mrb[37].mxu1 }
 0x229   :  { %8261 = vst [vmem:[#allocation90_spill] sm:$0xff] %v5476_v48  ;;  %v5478_v36 = vpop.f32.mrb[38].mxu1 }
 0x22a   :  { %8262 = vst [vmem:[#allocation91_spill] sm:$0xff] %v5478_v36  ;;  %1996 = vrot.lane.b32.xlu1 %v5254_v51, %s4200_s0  ;;  %v5482_v50 = vpop.f32.mrb[39].mxu1 }
 0x22b   :  { %8263 = vst [vmem:[#allocation92_spill] sm:$0xff] %v5482_v50 }
 0x22c   :  { %2122 = vrot.lane.b32.xlu0 %v5428_v38, %s4200_s0 }
 0x22e   :  { %2124 = vrot.lane.b32.xlu1 %v5434_v41, %s4200_s0 }
 0x22f   :  { %v5488_v61 = vpop.f32.mrb[40].mxu1 }
 0x230   :  { %8264 = vst [vmem:[#allocation93_spill] sm:$0xff] %v5488_v61  ;;  %2006 = vrot.lane.b32.xlu0 %v5256_v52, %s4200_s0  ;;  %v5492_v19 = vpop.f32.mrb[41].mxu1 }
 0x231   :  { %8265 = vst [vmem:[#allocation94_spill] sm:$0xff] %v5492_v19  ;;  %v5494_v63 = vpop.f32.mrb[42].mxu1 }
 0x232   :  { %8266 = vst [vmem:[#allocation95_spill] sm:$0xff] %v5494_v63  ;;  %2008 = vrot.lane.b32.xlu1 %v5260_v54, %s4200_s0  ;;  %v5498_v51 = vpop.f32.mrb[43].mxu1 }
 0x233   :  { %8267 = vst [vmem:[#allocation96_spill] sm:$0xff] %v5498_v51 }
 0x234   :  { %2134 = vrot.lane.b32.xlu0 %v5440_v47, %s4200_s0 }
 0x236   :  { %2136 = vrot.lane.b32.xlu1 %v5446_v49, %s4200_s0 }
 0x237   :  { %v5504_v41 = vpop.f32.mrb[44].mxu1 }
 0x238   :  { %8268 = vst [vmem:[#allocation97_spill] sm:$0xff] %v5504_v41  ;;  %2002 = vrot.lane.b32.xlu0 %v5258_v53, %s4200_s0  ;;  %v5508_v52 = vpop.f32.mrb[45].mxu1 }
 0x239   :  { %8269 = vst [vmem:[#allocation98_spill] sm:$0xff] %v5508_v52  ;;  %v5510_v38 = vpop.f32.mrb[46].mxu1 }
 0x23a   :  { %8270 = vst [vmem:[#allocation99_spill] sm:$0xff] %v5510_v38  ;;  %2004 = vrot.lane.b32.xlu1 %v5262_v55, %s4200_s0  ;;  %v5514_v54 = vpop.f32.mrb[47].mxu1 }
 0x23b   :  { %8271 = vst [vmem:[#allocation100_spill] sm:$0xff] %v5514_v54 }
 0x23c   :  { %2130 = vrot.lane.b32.xlu0 %v5444_v43, %s4200_s0 }
 0x23e   :  { %2132 = vrot.lane.b32.xlu1 %v5450_v8, %s4200_s0 }
 0x23f   :  { %v5520_v49 = vpop.f32.mrb[48].mxu1 }
 0x240   :  { %8272 = vst [vmem:[#allocation101_spill] sm:$0xff] %v5520_v49  ;;  %2014 = vrot.lane.b32.xlu0 %v5264_v57, %s4200_s0  ;;  %v5524_v53 = vpop.f32.mrb[49].mxu1 }
 0x241   :  { %8273 = vst [vmem:[#allocation102_spill] sm:$0xff] %v5524_v53  ;;  %v5526_v47 = vpop.f32.mrb[50].mxu1 }
 0x242   :  { %8274 = vst [vmem:[#allocation103_spill] sm:$0xff] %v5526_v47  ;;  %2016 = vrot.lane.b32.xlu1 %v5268_v60, %s4200_s0  ;;  %v5530_v55 = vpop.f32.mrb[51].mxu1 }
 0x243   :  { %8275 = vst [vmem:[#allocation104_spill] sm:$0xff] %v5530_v55 }
 0x244   :  { %2142 = vrot.lane.b32.xlu0 %v5456_v44, %s4200_s0 }
 0x246   :  { %2144 = vrot.lane.b32.xlu1 %v5462_v42, %s4200_s0 }
 0x247   :  { %v5536_v8 = vpop.f32.mrb[52].mxu1 }
 0x248   :  { %8276 = vst [vmem:[#allocation105_spill] sm:$0xff] %v5536_v8  ;;  %2382 = vrot.lane.b32.xlu0 %v5264_v57, %s4201_s15  ;;  %v5540_v49 = vpop.f32.mrb[53].mxu1 }
 0x249   :  { %8277 = vst [vmem:[#allocation106_spill] sm:$0xff] %v5540_v49  ;;  %v5542_v47 = vpop.f32.mrb[54].mxu1 }
 0x24a   :  { %8278 = vst [vmem:[#allocation107_spill] sm:$0xff] %v5542_v47  ;;  %2384 = vrot.lane.b32.xlu1 %v5268_v60, %s4201_s15  ;;  %v5546_v55 = vpop.f32.mrb[55].mxu1 }
 0x24b   :  { %8279 = vst [vmem:[#allocation108_spill] sm:$0xff] %v5546_v55 }
 0x24c   :  { %2010 = vrot.lane.b32.xlu0 %v5266_v59, %s4200_s0 }
 0x24e   :  { %2012 = vrot.lane.b32.xlu1 %v5270_v62, %s4200_s0 }
 0x24f   :  { %v5552_v8 = vpop.f32.mrb[56].mxu1 }
 0x250   :  { %8280 = vst [vmem:[#allocation109_spill] sm:$0xff] %v5552_v8  ;;  %2138 = vrot.lane.b32.xlu0 %v5460_v45, %s4200_s0  ;;  %v5556_v57 = vpop.f32.mrb[57].mxu1 }
 0x251   :  { %8281 = vst [vmem:[#allocation110_spill] sm:$0xff] %v5556_v57  ;;  %v5558_v49 = vpop.f32.mrb[58].mxu1 }
 0x252   :  { %8282 = vst [vmem:[#allocation111_spill] sm:$0xff] %v5558_v49  ;;  %2140 = vrot.lane.b32.xlu1 %v5466_v46, %s4200_s0  ;;  %v5562_v60 = vpop.f32.mrb[59].mxu1  ;;  %v5564_v47 = vpop.permute.xlu0 %2078 }
 0x253   :  { %8283 = vst [vmem:[#allocation112_spill] sm:$0xff] %v5562_v60  ;;  %8284 = vst [vmem:[#allocation113_spill] sm:$0xff] %v5564_v47 }
 0x254   :  { %v5566_v55 = vpop.permute.xlu1 %2080  ;;  %2378 = vrot.lane.b32.xlu0 %v5266_v59, %s4201_s15 }
 0x255   :  { %8285 = vst [vmem:[#allocation114_spill] sm:$0xff] %v5566_v55 }
 0x256   :  { %2380 = vrot.lane.b32.xlu1 %v5270_v62, %s4201_s15  ;;  %v5572_v8 = vpop.permute.xlu0 %2074 }
 0x257   :  { %8286 = vst [vmem:[#allocation115_spill] sm:$0xff] %v5572_v8  ;;  %v5574_v57 = vpop.f32.mrb[60].mxu1 }
 0x258   :  { %8287 = vst [vmem:[#allocation116_spill] sm:$0xff] %v5574_v57  ;;  %v5576_v49 = vpop.permute.xlu1 %2076  ;;  %2022 = vrot.lane.b32.xlu0 %v5272_v0, %s4200_s0  ;;  %v5580_v60 = vpop.f32.mrb[61].mxu1 }
 0x259   :  { %8288 = vst [vmem:[#allocation117_spill] sm:$0xff] %v5576_v49  ;;  %8289 = vst [vmem:[#allocation118_spill] sm:$0xff] %v5580_v60  ;;  %v5582_v47 = vpop.f32.mrb[62].mxu1 }
 0x25a   :  { %8290 = vst [vmem:[#allocation119_spill] sm:$0xff] %v5582_v47  ;;  %2024 = vrot.lane.b32.xlu1 %v5276_v2, %s4200_s0  ;;  %v5586_v59 = vpop.f32.mrb[63].mxu1  ;;  %v5588_v55 = vpop.permute.xlu0 %2086 }
 0x25b   :  { %8291 = vst [vmem:[#allocation120_spill] sm:$0xff] %v5586_v59  ;;  %8292 = vst [vmem:[#allocation121_spill] sm:$0xff] %v5588_v55 }
 0x25c   :  { %v5590_v62 = vpop.permute.xlu1 %2088  ;;  %2150 = vrot.lane.b32.xlu0 %v5472_v40, %s4200_s0 }
 0x25d   :  { %8293 = vst [vmem:[#allocation122_spill] sm:$0xff] %v5590_v62 }
 0x25e   :  { %2152 = vrot.lane.b32.xlu1 %v5478_v36, %s4200_s0  ;;  %v5596_v49 = vpop.permute.xlu0 %2082 }
 0x25f   :  { %8294 = vst [vmem:[#allocation123_spill] sm:$0xff] %v5596_v49 }
 0x260   :  { %v5598_v8 = vpop.permute.xlu1 %2084  ;;  %2390 = vrot.lane.b32.xlu0 %v5272_v0, %s4201_s15 }
 0x262   :  { %2392 = vrot.lane.b32.xlu1 %v5276_v2, %s4201_s15  ;;  %v5604_v47 = vpop.permute.xlu0 %2094 }
 0x264   :  { %v5606_v55 = vpop.permute.xlu1 %2096  ;;  %2018 = vrot.lane.b32.xlu0 %v5274_v1, %s4200_s0 }
 0x265   :  { %8295 = vst [vmem:[#allocation124_spill] sm:$0xff] %v5606_v55 }
 0x266   :  { %2020 = vrot.lane.b32.xlu1 %v5278_v3, %s4200_s0  ;;  %v5612_v62 = vpop.permute.xlu0 %2090 }
 0x267   :  { %8296 = vst [vmem:[#allocation125_spill] sm:$0xff] %v5612_v62 }
 0x268   :  { %v5614_v49 = vpop.permute.xlu1 %2092  ;;  %2146 = vrot.lane.b32.xlu0 %v5476_v48, %s4200_s0 }
 0x269   :  { %8297 = vst [vmem:[#allocation126_spill] sm:$0xff] %v5614_v49 }
 0x26a   :  { %2148 = vrot.lane.b32.xlu1 %v5482_v50, %s4200_s0  ;;  %v5620_v2 = vpop.permute.xlu0 %2102 }
 0x26b   :  { %8298 = vst [vmem:[#allocation127_spill] sm:$0xff] %v5620_v2 }
 0x26c   :  { %v5622_v0 = vpop.permute.xlu1 %2104  ;;  %2386 = vrot.lane.b32.xlu0 %v5274_v1, %s4201_s15 }
 0x26e   :  { %2388 = vrot.lane.b32.xlu1 %v5278_v3, %s4201_s15  ;;  %v5628_v55 = vpop.permute.xlu0 %2098 }
 0x270   :  { %v5630_v62 = vpop.permute.xlu1 %2100  ;;  %2030 = vrot.lane.b32.xlu0 %v5280_v4, %s4200_s0 }
 0x271   :  { %8299 = vst [vmem:[#allocation128_spill] sm:$0xff] %v5630_v62 }
 0x272   :  { %2032 = vrot.lane.b32.xlu1 %v5284_v7, %s4200_s0  ;;  %v5636_v49 = vpop.permute.xlu0 %1982 }
 0x273   :  { %8300 = vst [vmem:[#allocation129_spill] sm:$0xff] %v5636_v49 }
 0x274   :  { %v5638_v2 = vpop.permute.xlu1 %1984  ;;  %2158 = vrot.lane.b32.xlu0 %v5488_v61, %s4200_s0 }
 0x275   :  { %8301 = vst [vmem:[#allocation130_spill] sm:$0xff] %v5638_v2 }
 0x276   :  { %2160 = vrot.lane.b32.xlu1 %v5494_v63, %s4200_s0  ;;  %v5644_v3 = vpop.permute.xlu0 %2110 }
 0x277   :  { %8302 = vst [vmem:[#allocation131_spill] sm:$0xff] %v5644_v3 }
 0x278   :  { %v5646_v1 = vpop.permute.xlu1 %2112  ;;  %2398 = vrot.lane.b32.xlu0 %v5280_v4, %s4201_s15 }
 0x27a   :  { %2400 = vrot.lane.b32.xlu1 %v5284_v7, %s4201_s15  ;;  %v5652_v62 = vpop.permute.xlu0 %1978 }
 0x27c   :  { %v5654_v49 = vpop.permute.xlu1 %1980  ;;  %2026 = vrot.lane.b32.xlu0 %v5282_v5, %s4200_s0 }
 0x27d   :  { %8303 = vst [vmem:[#allocation132_spill] sm:$0xff] %v5654_v49 }
 0x27e   :  { %2028 = vrot.lane.b32.xlu1 %v5286_v10, %s4200_s0  ;;  %v5660_v2 = vpop.permute.xlu0 %2106 }
 0x27f   :  { %8304 = vst [vmem:[#allocation133_spill] sm:$0xff] %v5660_v2 }
 0x280   :  { %v5662_v3 = vpop.permute.xlu1 %2108  ;;  %2154 = vrot.lane.b32.xlu0 %v5492_v19, %s4200_s0 }
 0x281   :  { %8305 = vst [vmem:[#allocation134_spill] sm:$0xff] %v5662_v3 }
 0x282   :  { %2156 = vrot.lane.b32.xlu1 %v5498_v51, %s4200_s0  ;;  %v5668_v7 = vpop.permute.xlu0 %1990 }
 0x283   :  { %8306 = vst [vmem:[#allocation135_spill] sm:$0xff] %v5668_v7 }
 0x284   :  { %v5670_v4 = vpop.permute.xlu1 %1992  ;;  %2394 = vrot.lane.b32.xlu0 %v5282_v5, %s4201_s15 }
 0x286   :  { %2396 = vrot.lane.b32.xlu1 %v5286_v10, %s4201_s15  ;;  %v5676_v49 = vpop.permute.xlu0 %2118 }
 0x288   :  { %v5678_v2 = vpop.permute.xlu1 %2120  ;;  %2038 = vrot.lane.b32.xlu0 %v5288_v11, %s4200_s0 }
 0x289   :  { %8307 = vst [vmem:[#allocation136_spill] sm:$0xff] %v5678_v2 }
 0x28a   :  { %2040 = vrot.lane.b32.xlu1 %v5292_v15, %s4200_s0  ;;  %v5684_v3 = vpop.permute.xlu0 %1986 }
 0x28b   :  { %8308 = vst [vmem:[#allocation137_spill] sm:$0xff] %v5684_v3 }
 0x28c   :  { %v5686_v7 = vpop.permute.xlu1 %1988  ;;  %2166 = vrot.lane.b32.xlu0 %v5504_v41, %s4200_s0 }
 0x28d   :  { %8309 = vst [vmem:[#allocation138_spill] sm:$0xff] %v5686_v7 }
 0x28e   :  { %2168 = vrot.lane.b32.xlu1 %v5510_v38, %s4200_s0  ;;  %v5692_v10 = vpop.permute.xlu0 %2114 }
 0x28f   :  { %8310 = vst [vmem:[#allocation139_spill] sm:$0xff] %v5692_v10 }
 0x290   :  { %v5694_v5 = vpop.permute.xlu1 %2116  ;;  %2034 = vrot.lane.b32.xlu0 %v5290_v13, %s4200_s0 }
 0x291   :  { %8311 = vst [vmem:[#allocation140_spill] sm:$0xff] %v5694_v5 }
 0x292   :  { %2036 = vrot.lane.b32.xlu1 %v5294_v16, %s4200_s0  ;;  %v5700_v2 = vpop.permute.xlu0 %1998 }
 0x293   :  { %8312 = vst [vmem:[#allocation141_spill] sm:$0xff] %v5700_v2 }
 0x294   :  { %v5702_v3 = vpop.permute.xlu1 %2000  ;;  %2162 = vrot.lane.b32.xlu0 %v5508_v52, %s4200_s0 }
 0x295   :  { %8313 = vst [vmem:[#allocation142_spill] sm:$0xff] %v5702_v3 }
 0x296   :  { %2164 = vrot.lane.b32.xlu1 %v5514_v54, %s4200_s0  ;;  %v5708_v7 = vpop.permute.xlu0 %2126 }
 0x297   :  { %8314 = vst [vmem:[#allocation143_spill] sm:$0xff] %v5708_v7 }
 0x298   :  { %v5710_v10 = vpop.permute.xlu1 %2128  ;;  %2046 = vrot.lane.b32.xlu0 %v5296_v17, %s4200_s0 }
 0x299   :  { %8315 = vst [vmem:[#allocation144_spill] sm:$0xff] %v5710_v10 }
 0x29a   :  { %2048 = vrot.lane.b32.xlu1 %v5300_v20, %s4200_s0  ;;  %v5716_v5 = vpop.permute.xlu0 %1994 }
 0x29b   :  { %8316 = vst [vmem:[#allocation145_spill] sm:$0xff] %v5716_v5 }
 0x29c   :  { %v5718_v2 = vpop.permute.xlu1 %1996  ;;  %2042 = vrot.lane.b32.xlu0 %v5298_v18, %s4200_s0 }
 0x29d   :  { %8317 = vst [vmem:[#allocation146_spill] sm:$0xff] %v5718_v2 }
 0x29e   :  { %2044 = vrot.lane.b32.xlu1 %v5302_v21, %s4200_s0  ;;  %v5724_v3 = vpop.permute.xlu0 %2122 }
 0x29f   :  { %8318 = vst [vmem:[#allocation147_spill] sm:$0xff] %v5724_v3 }
 0x2a0   :  { %v5726_v7 = vpop.permute.xlu1 %2124  ;;  %2054 = vrot.lane.b32.xlu0 %v5304_v23, %s4200_s0 }
 0x2a1   :  { %8319 = vst [vmem:[#allocation148_spill] sm:$0xff] %v5726_v7 }
 0x2a2   :  { %2056 = vrot.lane.b32.xlu1 %v5308_v26, %s4200_s0  ;;  %v5732_v10 = vpop.permute.xlu0 %2006 }
 0x2a3   :  { %8320 = vst [vmem:[#allocation149_spill] sm:$0xff] %v5732_v10 }
 0x2a4   :  { %v5734_v5 = vpop.permute.xlu1 %2008  ;;  %2050 = vrot.lane.b32.xlu0 %v5306_v25, %s4200_s0 }
 0x2a5   :  { %8321 = vst [vmem:[#allocation150_spill] sm:$0xff] %v5734_v5 }
 0x2a6   :  { %2052 = vrot.lane.b32.xlu1 %v5310_v28, %s4200_s0  ;;  %v5740_v2 = vpop.permute.xlu0 %2134 }
 0x2a7   :  { %8322 = vst [vmem:[#allocation151_spill] sm:$0xff] %v5740_v2 }
 0x2a8   :  { %v5742_v3 = vpop.permute.xlu1 %2136  ;;  %2062 = vrot.lane.b32.xlu0 %v5312_v30, %s4200_s0 }
 0x2a9   :  { %8323 = vst [vmem:[#allocation152_spill] sm:$0xff] %v5742_v3 }
 0x2aa   :  { %2064 = vrot.lane.b32.xlu1 %v5316_v32, %s4200_s0  ;;  %v5748_v7 = vpop.permute.xlu0 %2002 }
 0x2ab   :  { %8324 = vst [vmem:[#allocation153_spill] sm:$0xff] %v5748_v7 }
 0x2ac   :  { %v5750_v10 = vpop.permute.xlu1 %2004  ;;  %2058 = vrot.lane.b32.xlu0 %v5314_v31, %s4200_s0 }
 0x2ad   :  { %8325 = vst [vmem:[#allocation154_spill] sm:$0xff] %v5750_v10 }
 0x2ae   :  { %2060 = vrot.lane.b32.xlu1 %v5318_v33, %s4200_s0  ;;  %v5756_v5 = vpop.permute.xlu0 %2130 }
 0x2af   :  { %8326 = vst [vmem:[#allocation155_spill] sm:$0xff] %v5756_v5 }
 0x2b0   :  { %v5758_v2 = vpop.permute.xlu1 %2132  ;;  %2070 = vrot.lane.b32.xlu0 %v5320_v34, %s4200_s0 }
 0x2b1   :  { %8327 = vst [vmem:[#allocation156_spill] sm:$0xff] %v5758_v2 }
 0x2b2   :  { %2072 = vrot.lane.b32.xlu1 %v5324_v37, %s4200_s0  ;;  %v5764_v3 = vpop.permute.xlu0 %2014 }
 0x2b3   :  { %8328 = vst [vmem:[#allocation157_spill] sm:$0xff] %v5764_v3 }
 0x2b4   :  { %v5766_v7 = vpop.permute.xlu1 %2016  ;;  %2066 = vrot.lane.b32.xlu0 %v5322_v35, %s4200_s0 }
 0x2b5   :  { %8329 = vst [vmem:[#allocation158_spill] sm:$0xff] %v5766_v7 }
 0x2b6   :  { %2068 = vrot.lane.b32.xlu1 %v5326_v39, %s4200_s0  ;;  %v5772_v10 = vpop.permute.xlu0 %2142 }
 0x2b7   :  { %8330 = vst [vmem:[#allocation159_spill] sm:$0xff] %v5772_v10 }
 0x2b8   :  { %v5774_v5 = vpop.permute.xlu1 %2144  ;;  %2402 = vrot.lane.b32.xlu0 %v5290_v13, %s4201_s15 }
 0x2b9   :  { %8331 = vst [vmem:[#allocation160_spill] sm:$0xff] %v5774_v5 }
 0x2ba   :  { %2404 = vrot.lane.b32.xlu1 %v5294_v16, %s4201_s15  ;;  %v5780_v2 = vpop.permute.xlu0 %2382 }
 0x2bb   :  { %8332 = vst [vmem:[#allocation161_spill] sm:$0xff] %v5780_v2 }
 0x2bc   :  { %v5782_v3 = vpop.permute.xlu1 %2384  ;;  %2406 = vrot.lane.b32.xlu0 %v5288_v11, %s4201_s15 }
 0x2bd   :  { %8333 = vst [vmem:[#allocation162_spill] sm:$0xff] %v5782_v3  ;;  %v8367_v3 = vld [vmem:[#allocation68_spill] sm:$0xff] }
 0x2be   :  { %2408 = vrot.lane.b32.xlu1 %v5292_v15, %s4201_s15  ;;  %v5788_v7 = vpop.permute.xlu0 %2010 }
 0x2bf   :  { %8334 = vst [vmem:[#allocation163_spill] sm:$0xff] %v5788_v7 }
 0x2c0   :  { %v5790_v10 = vpop.permute.xlu1 %2012  ;;  %2410 = vrot.lane.b32.xlu0 %v5298_v18, %s4201_s15 }
 0x2c1   :  { %8335 = vst [vmem:[#allocation164_spill] sm:$0xff] %v5790_v10 }
 0x2c2   :  { %2412 = vrot.lane.b32.xlu1 %v5302_v21, %s4201_s15  ;;  %v5796_v16 = vpop.permute.xlu0 %2138 }
 0x2c3   :  { %8336 = vst [vmem:[#allocation165_spill] sm:$0xff] %v5796_v16 }
 0x2c4   :  { %v5798_v13 = vpop.permute.xlu1 %2140  ;;  %2414 = vrot.lane.b32.xlu0 %v5296_v17, %s4201_s15 }
 0x2c5   :  { %8337 = vst [vmem:[#allocation166_spill] sm:$0xff] %v5798_v13 }
 0x2c6   :  { %2416 = vrot.lane.b32.xlu1 %v5300_v20, %s4201_s15  ;;  %v5804_v15 = vpop.permute.xlu0 %2378 }
 0x2c7   :  { %8338 = vst [vmem:[#allocation167_spill] sm:$0xff] %v5804_v15 }
 0x2c8   :  { %v5806_v11 = vpop.permute.xlu1 %2380  ;;  %2418 = vrot.lane.b32.xlu0 %v5306_v25, %s4201_s15 }
 0x2c9   :  { %8339 = vst [vmem:[#allocation168_spill] sm:$0xff] %v5806_v11  ;;  %v8363_v11 = vld [vmem:[#allocation63_spill] sm:$0xff] }
 0x2ca   :  { %2420 = vrot.lane.b32.xlu1 %v5310_v28, %s4201_s15  ;;  %v5812_v10 = vpop.permute.xlu0 %2022 }
 0x2cb   :  { %8340 = vst [vmem:[#allocation169_spill] sm:$0xff] %v5812_v10 }
 0x2cc   :  { %v5814_v16 = vpop.permute.xlu1 %2024  ;;  %2422 = vrot.lane.b32.xlu0 %v5304_v23, %s4201_s15 }
 0x2cd   :  { %8341 = vst [vmem:[#allocation170_spill] sm:$0xff] %v5814_v16 }
 0x2ce   :  { %2424 = vrot.lane.b32.xlu1 %v5308_v26, %s4201_s15  ;;  %v5820_v13 = vpop.permute.xlu0 %2150 }
 0x2cf   :  { %8342 = vst [vmem:[#allocation171_spill] sm:$0xff] %v5820_v13 }
 0x2d0   :  { %v5822_v7 = vpop.permute.xlu1 %2152  ;;  %2426 = vrot.lane.b32.xlu0 %v5314_v31, %s4201_s15 }
 0x2d1   :  { %8343 = vst [vmem:[#allocation172_spill] sm:$0xff] %v5822_v7 }
 0x2d2   :  { %2428 = vrot.lane.b32.xlu1 %v5318_v33, %s4201_s15  ;;  %v5828_v5 = vpop.permute.xlu0 %2390 }
 0x2d3   :  { %8344 = vst [vmem:[#allocation173_spill] sm:$0xff] %v5828_v5 }
 0x2d4   :  { %v5830_v10 = vpop.permute.xlu1 %2392  ;;  %2430 = vrot.lane.b32.xlu0 %v5312_v30, %s4201_s15 }
 0x2d5   :  { %8345 = vst [vmem:[#allocation174_spill] sm:$0xff] %v5830_v10 }
 0x2d6   :  { %2432 = vrot.lane.b32.xlu1 %v5316_v32, %s4201_s15  ;;  %v5836_v16 = vpop.permute.xlu0 %2018 }
 0x2d7   :  { %8346 = vst [vmem:[#allocation175_spill] sm:$0xff] %v5836_v16 }
 0x2d8   :  { %v5838_v13 = vpop.permute.xlu1 %2020  ;;  %2434 = vrot.lane.b32.xlu0 %v5322_v35, %s4201_s15 }
 0x2d9   :  { %8347 = vst [vmem:[#allocation176_spill] sm:$0xff] %v5838_v13 }
 0x2da   :  { %2436 = vrot.lane.b32.xlu1 %v5326_v39, %s4201_s15  ;;  %v5844_v7 = vpop.permute.xlu0 %2146 }
 0x2db   :  { %8348 = vst [vmem:[#allocation177_spill] sm:$0xff] %v5844_v7 }
 0x2dc   :  { %v5846_v5 = vpop.permute.xlu1 %2148  ;;  %2438 = vrot.lane.b32.xlu0 %v5320_v34, %s4201_s15 }
 0x2dd   :  { %8349 = vst [vmem:[#allocation178_spill] sm:$0xff] %v5846_v5 }
 0x2de   :  { %2440 = vrot.lane.b32.xlu1 %v5324_v37, %s4201_s15  ;;  %v5852_v10 = vpop.permute.xlu0 %2386 }
 0x2df   :  { %8350 = vst [vmem:[#allocation179_spill] sm:$0xff] %v5852_v10 }
 0x2e0   :  { %v5854_v16 = vpop.permute.xlu1 %2388  ;;  %2442 = vrot.lane.b32.xlu0 %v5332_v24, %s4201_s15 }
 0x2e1   :  { %8351 = vst [vmem:[#allocation180_spill] sm:$0xff] %v5854_v16 }
 0x2e2   :  { %2444 = vrot.lane.b32.xlu1 %v5338_v22, %s4201_s15  ;;  %v5860_v13 = vpop.permute.xlu0 %2030 }
 0x2e3   :  { %8352 = vst [vmem:[#allocation181_spill] sm:$0xff] %v5860_v13 }
 0x2e4   :  { %v5862_v7 = vpop.permute.xlu1 %2032  ;;  %2446 = vrot.lane.b32.xlu0 %v5328_v29, %s4201_s15 }
 0x2e5   :  { %8353 = vst [vmem:[#allocation182_spill] sm:$0xff] %v5862_v7 }
 0x2e6   :  { %2448 = vrot.lane.b32.xlu1 %v5334_v27, %s4201_s15  ;;  %v5868_v5 = vpop.permute.xlu0 %2158 }
 0x2e7   :  { %8354 = vst [vmem:[#allocation183_spill] sm:$0xff] %v5868_v5 }
 0x2e8   :  { %v5870_v10 = vpop.permute.xlu1 %2160  ;;  %2450 = vrot.lane.b32.xlu0 %v5348_v9, %s4201_s15  ;;  %v8401_v9 = vld [vmem:[#allocation83_spill] sm:$0xff] }
 0x2e9   :  { %8355 = vst [vmem:[#allocation184_spill] sm:$0xff] %v5870_v10 }
 0x2ea   :  { %2452 = vrot.lane.b32.xlu1 %v5354_v6, %s4201_s15  ;;  %v5876_v16 = vpop.permute.xlu0 %2398  ;;  %v8395_v6 = vld [vmem:[#allocation79_spill] sm:$0xff] }
 0x2eb   :  { %8356 = vst [vmem:[#allocation185_spill] sm:$0xff] %v5876_v16 }
 0x2ec   :  { %v5878_v13 = vpop.permute.xlu1 %2400  ;;  %2454 = vrot.lane.b32.xlu0 %v5344_v14, %s4201_s15 }
 0x2ed   :  { %8357 = vst [vmem:[#allocation186_spill] sm:$0xff] %v5878_v13  ;;  %v8362_v13 = vld [vmem:[#allocation61_spill] sm:$0xff] }
 0x2ee   :  { %2456 = vrot.lane.b32.xlu1 %v5350_v12, %s4201_s15  ;;  %v5884_v7 = vpop.permute.xlu0 %2026 }
 0x2ef   :  { %8358 = vst [vmem:[#allocation187_spill] sm:$0xff] %v5884_v7 }
 0x2f0   :  { %v5886_v5 = vpop.permute.xlu1 %2028  ;;  %2458 = vrot.lane.b32.xlu0 %v5364_v58, %s4201_s15 }
 0x2f1   :  { %8359 = vst [vmem:[#allocation188_spill] sm:$0xff] %v5886_v5  ;;  %v8366_v5 = vld [vmem:[#allocation66_spill] sm:$0xff] }
 0x2f2   :  { %2460 = vrot.lane.b32.xlu1 %v5370_v56, %s4201_s15  ;;  %v5892_v10 = vpop.permute.xlu0 %2154  ;;  %v8371_v56 = vld [vmem:[#allocation67_spill] sm:$0xff] }
 0x2f3   :  { %8360 = vst [vmem:[#allocation189_spill] sm:$0xff] %v5892_v10 }
 0x2f4   :  { %v5894_v16 = vpop.permute.xlu1 %2156  ;;  %2462 = vrot.lane.b32.xlu0 %v8362_v13, %s4201_s15  ;;  %v8391_v13 = vld [vmem:[#allocation80_spill] sm:$0xff] }
 0x2f5   :  { %8361 = vst [vmem:[#allocation190_spill] sm:$0xff] %v5894_v16  ;;  %v8370_v16 = vld [vmem:[#allocation65_spill] sm:$0xff] }
 0x2f6   :  { %2464 = vrot.lane.b32.xlu1 %v8363_v11, %s4201_s15  ;;  %v5900_v15 = vpop.permute.xlu0 %2394  ;;  %v8387_v11 = vld [vmem:[#allocation75_spill] sm:$0xff] }
 0x2f7   :  { %8364 = vst [vmem:[#allocation191_spill] sm:$0xff] %v5900_v15 }
 0x2f8   :  { %v5902_v7 = vpop.permute.xlu1 %2396  ;;  %2466 = vrot.lane.b32.xlu0 %v8366_v5, %s4201_s15  ;;  %v8375_v5 = vld [vmem:[#allocation72_spill] sm:$0xff] }
 0x2f9   :  { %8365 = vst [vmem:[#allocation192_spill] sm:$0xff] %v5902_v7  ;;  %v8374_v7 = vld [vmem:[#allocation70_spill] sm:$0xff] }
 0x2fa   :  { %2468 = vrot.lane.b32.xlu1 %v8367_v3, %s4201_s15  ;;  %v5908_v2 = vpop.permute.xlu0 %2038 }
 0x2fb   :  { %8368 = vst [vmem:[#allocation193_spill] sm:$0xff] %v5908_v2 }
 0x2fc   :  { %v5910_v10 = vpop.permute.xlu1 %2040  ;;  %2470 = vrot.lane.b32.xlu0 %v8370_v16, %s4201_s15  ;;  %v8379_v16 = vld [vmem:[#allocation71_spill] sm:$0xff] }
 0x2fd   :  { %8369 = vst [vmem:[#allocation194_spill] sm:$0xff] %v5910_v10  ;;  %v8378_v10 = vld [vmem:[#allocation69_spill] sm:$0xff] }
 0x2fe   :  { %2472 = vrot.lane.b32.xlu1 %v8371_v56, %s4201_s15  ;;  %v5916_v58 = vpop.permute.xlu0 %2166 }
 0x2ff   :  { %8372 = vst [vmem:[#allocation195_spill] sm:$0xff] %v5916_v58 }
 0x300   :  { %v5918_v15 = vpop.permute.xlu1 %2168  ;;  %2474 = vrot.lane.b32.xlu0 %v8374_v7, %s4201_s15  ;;  %v8383_v7 = vld [vmem:[#allocation76_spill] sm:$0xff] }
 0x301   :  { %8373 = vst [vmem:[#allocation196_spill] sm:$0xff] %v5918_v15  ;;  %v8382_v15 = vld [vmem:[#allocation74_spill] sm:$0xff] }
 0x302   :  { %2476 = vrot.lane.b32.xlu1 %v8375_v5, %s4201_s15  ;;  %v5924_v3 = vpop.permute.xlu0 %2034 }
 0x303   :  { %8376 = vst [vmem:[#allocation197_spill] sm:$0xff] %v5924_v3 }
 0x304   :  { %v5926_v2 = vpop.permute.xlu1 %2036  ;;  %2478 = vrot.lane.b32.xlu0 %v8378_v10, %s4201_s15 }
 0x305   :  { %8377 = vst [vmem:[#allocation198_spill] sm:$0xff] %v5926_v2  ;;  %v8386_v2 = vld [vmem:[#allocation73_spill] sm:$0xff] }
 0x306   :  { %2480 = vrot.lane.b32.xlu1 %v8379_v16, %s4201_s15  ;;  %v5932_v56 = vpop.permute.xlu0 %2162 }
 0x307   :  { %8380 = vst [vmem:[#allocation199_spill] sm:$0xff] %v5932_v56 }
 0x308   :  { %v5934_v58 = vpop.permute.xlu1 %2164  ;;  %2482 = vrot.lane.b32.xlu0 %v8382_v15, %s4201_s15 }
 0x309   :  { %8381 = vst [vmem:[#allocation200_spill] sm:$0xff] %v5934_v58  ;;  %v8390_v58 = vld [vmem:[#allocation78_spill] sm:$0xff] }
 0x30a   :  { %2484 = vrot.lane.b32.xlu1 %v8383_v7, %s4201_s15  ;;  %v5940_v5 = vpop.permute.xlu0 %2046 }
 0x30b   :  { %8384 = vst [vmem:[#allocation201_spill] sm:$0xff] %v5940_v5 }
 0x30c   :  { %v5942_v3 = vpop.permute.xlu1 %2048  ;;  %2486 = vrot.lane.b32.xlu0 %v8386_v2, %s4201_s15 }
 0x30d   :  { %8385 = vst [vmem:[#allocation202_spill] sm:$0xff] %v5942_v3  ;;  %v8394_v3 = vld [vmem:[#allocation77_spill] sm:$0xff] }
 0x30e   :  { %2488 = vrot.lane.b32.xlu1 %v8387_v11, %s4201_s15  ;;  %v5948_v16 = vpop.permute.xlu0 %2042 }
 0x30f   :  { %8388 = vst [vmem:[#allocation203_spill] sm:$0xff] %v5948_v16 }
 0x310   :  { %v5950_v56 = vpop.permute.xlu1 %2044  ;;  %2490 = vrot.lane.b32.xlu0 %v8390_v58, %s4201_s15 }
 0x311   :  { %8389 = vst [vmem:[#allocation204_spill] sm:$0xff] %v5950_v56  ;;  %v8398_v56 = vld [vmem:[#allocation84_spill] sm:$0xff] }
 0x312   :  { %2492 = vrot.lane.b32.xlu1 %v8391_v13, %s4201_s15  ;;  %v5956_v7 = vpop.permute.xlu0 %2054 }
 0x313   :  { %8392 = vst [vmem:[#allocation205_spill] sm:$0xff] %v5956_v7 }
 0x314   :  { %v5958_v5 = vpop.permute.xlu1 %2056  ;;  %2494 = vrot.lane.b32.xlu0 %v8394_v3, %s4201_s15 }
 0x315   :  { %8393 = vst [vmem:[#allocation206_spill] sm:$0xff] %v5958_v5  ;;  %v8400_v5 = vld [vmem:[#allocation81_spill] sm:$0xff] }
 0x316   :  { %2496 = vrot.lane.b32.xlu1 %v8395_v6, %s4201_s15  ;;  %v5964_v11 = vpop.permute.xlu0 %2050 }
 0x317   :  { %8396 = vst [vmem:[#allocation207_spill] sm:$0xff] %v5964_v11 }
 0x318   :  { %v5966_v16 = vpop.permute.xlu1 %2052  ;;  %2498 = vrot.lane.b32.xlu0 %v5444_v43, %s4201_s15 }
 0x319   :  { %8397 = vst [vmem:[#allocation208_spill] sm:$0xff] %v5966_v16 }
 0x31a   :  { %2500 = vrot.lane.b32.xlu1 %v8398_v56, %s4201_s15  ;;  %v5972_v13 = vpop.permute.xlu0 %2062 }
 0x31b   :  { %8399 = vst [vmem:[#allocation209_spill] sm:$0xff] %v5972_v13 }
 0x31c   :  { %v5974_v7 = vpop.permute.xlu1 %2064  ;;  %2502 = vrot.lane.b32.xlu0 %v8400_v5, %s4201_s15 }
 0x31e   :  { %2504 = vrot.lane.b32.xlu1 %v8401_v9, %s4201_s15  ;;  %v5980_v6 = vpop.permute.xlu0 %2058 }
 0x31f   :  { %8402 = vst [vmem:[#allocation210_spill] sm:$0xff] %v5980_v6 }
 0x320   :  { %v5982_v11 = vpop.permute.xlu1 %2060  ;;  %2506 = vrot.lane.b32.xlu0 %v5460_v45, %s4201_s15 }
 0x322   :  { %2508 = vrot.lane.b32.xlu1 %v5466_v46, %s4201_s15  ;;  %v5988_v16 = vpop.permute.xlu0 %2070 }
 0x323   :  { %8403 = vst [vmem:[#allocation211_spill] sm:$0xff] %v5988_v16 }
 0x324   :  { %v5990_v13 = vpop.permute.xlu1 %2072  ;;  %2510 = vrot.lane.b32.xlu0 %v5456_v44, %s4201_s15 }
 0x325   :  { %8404 = vst [vmem:[#allocation212_spill] sm:$0xff] %v5990_v13 }
 0x326   :  { %2512 = vrot.lane.b32.xlu1 %v5462_v42, %s4201_s15  ;;  %v5996_v9 = vpop.permute.xlu0 %2066 }
 0x327   :  { %8405 = vst [vmem:[#allocation213_spill] sm:$0xff] %v5996_v9 }
 0x328   :  { %v5998_v6 = vpop.permute.xlu1 %2068  ;;  %2514 = vrot.lane.b32.xlu0 %v5476_v48, %s4201_s15 }
 0x329   :  { %8406 = vst [vmem:[#allocation214_spill] sm:$0xff] %v5998_v6 }
 0x32a   :  { %2516 = vrot.lane.b32.xlu1 %v5482_v50, %s4201_s15  ;;  %v6004_v46 = vpop.permute.xlu0 %2402 }
 0x32c   :  { %v6006_v16 = vpop.permute.xlu1 %2404  ;;  %2518 = vrot.lane.b32.xlu0 %v5472_v40, %s4201_s15 }
 0x32e   :  { %2520 = vrot.lane.b32.xlu1 %v5478_v36, %s4201_s15  ;;  %v6012_v42 = vpop.permute.xlu0 %2406 }
 0x330   :  { %v6014_v9 = vpop.permute.xlu1 %2408  ;;  %2522 = vrot.lane.b32.xlu0 %v5492_v19, %s4201_s15 }
 0x331   :  { %8407 = vst [vmem:[#allocation215_spill] sm:$0xff] %v6014_v9 }
 0x332   :  { %2524 = vrot.lane.b32.xlu1 %v5498_v51, %s4201_s15  ;;  %v6020_v50 = vpop.permute.xlu0 %2410 }
 0x334   :  { %v6022_v6 = vpop.permute.xlu1 %2412  ;;  %2526 = vrot.lane.b32.xlu0 %v5488_v61, %s4201_s15 }
 0x336   :  { %2528 = vrot.lane.b32.xlu1 %v5494_v63, %s4201_s15  ;;  %v6028_v36 = vpop.permute.xlu0 %2414 }
 0x338   :  { %v6030_v13 = vpop.permute.xlu1 %2416  ;;  %2530 = vrot.lane.b32.xlu0 %v5508_v52, %s4201_s15  ;;  %v8412_v52 = vld [vmem:[#allocation104_spill] sm:$0xff] }
 0x33a   :  { %2532 = vrot.lane.b32.xlu1 %v5514_v54, %s4201_s15  ;;  %v6036_v51 = vpop.permute.xlu0 %2418 }
 0x33b   :  { %8408 = vst [vmem:[#allocation216_spill] sm:$0xff] %v6036_v51 }
 0x33c   :  { %v6038_v9 = vpop.permute.xlu1 %2420  ;;  %2534 = vrot.lane.b32.xlu0 %v5504_v41, %s4201_s15  ;;  %v8416_v41 = vld [vmem:[#allocation103_spill] sm:$0xff] }
 0x33d   :  { %8409 = vst [vmem:[#allocation217_spill] sm:$0xff] %v6038_v9  ;;  %v8415_v9 = vld [vmem:[#allocation101_spill] sm:$0xff] }
 0x33e   :  { %2536 = vrot.lane.b32.xlu1 %v5510_v38, %s4201_s15  ;;  %v6044_v63 = vpop.permute.xlu0 %2422 }
 0x33f   :  { %8410 = vst [vmem:[#allocation218_spill] sm:$0xff] %v6044_v63 }
 0x340   :  { %v6046_v61 = vpop.permute.xlu1 %2424  ;;  %2538 = vrot.lane.b32.xlu0 %v5524_v53, %s4201_s15  ;;  %v8420_v53 = vld [vmem:[#allocation108_spill] sm:$0xff] }
 0x341   :  { %8411 = vst [vmem:[#allocation219_spill] sm:$0xff] %v6046_v61  ;;  %v8419_v61 = vld [vmem:[#allocation106_spill] sm:$0xff] }
 0x342   :  { %2540 = vrot.lane.b32.xlu1 %v8412_v52, %s4201_s15  ;;  %v6052_v54 = vpop.permute.xlu0 %2426 }
 0x343   :  { %8413 = vst [vmem:[#allocation220_spill] sm:$0xff] %v6052_v54 }
 0x344   :  { %v6054_v51 = vpop.permute.xlu1 %2428  ;;  %2542 = vrot.lane.b32.xlu0 %v8415_v9, %s4201_s15  ;;  %v8424_v9 = vld [vmem:[#allocation107_spill] sm:$0xff] }
 0x345   :  { %8414 = vst [vmem:[#allocation221_spill] sm:$0xff] %v6054_v51  ;;  %v8423_v51 = vld [vmem:[#allocation105_spill] sm:$0xff] }
 0x346   :  { %2544 = vrot.lane.b32.xlu1 %v8416_v41, %s4201_s15  ;;  %v6060_v38 = vpop.permute.xlu0 %2430 }
 0x347   :  { %8417 = vst [vmem:[#allocation222_spill] sm:$0xff] %v6060_v38 }
 0x348   :  { %v6062_v63 = vpop.permute.xlu1 %2432  ;;  %2546 = vrot.lane.b32.xlu0 %v8419_v61, %s4201_s15  ;;  %v8427_v61 = vld [vmem:[#allocation112_spill] sm:$0xff] }
 0x349   :  { %8418 = vst [vmem:[#allocation223_spill] sm:$0xff] %v6062_v63  ;;  %v8426_v63 = vld [vmem:[#allocation110_spill] sm:$0xff] }
 0x34a   :  { %2548 = vrot.lane.b32.xlu1 %v8420_v53, %s4201_s15  ;;  %v6068_v52 = vpop.permute.xlu0 %2434 }
 0x34b   :  { %8421 = vst [vmem:[#allocation224_spill] sm:$0xff] %v6068_v52 }
 0x34c   :  { %v6070_v54 = vpop.permute.xlu1 %2436  ;;  %2550 = vrot.lane.b32.xlu0 %v8423_v51, %s4201_s15  ;;  %v8430_v51 = vld [vmem:[#allocation111_spill] sm:$0xff] }
 0x34d   :  { %8422 = vst [vmem:[#allocation225_spill] sm:$0xff] %v6070_v54  ;;  %v8429_v54 = vld [vmem:[#allocation109_spill] sm:$0xff] }
 0x34e   :  { %2552 = vrot.lane.b32.xlu1 %v8424_v9, %s4201_s15  ;;  %v6076_v41 = vpop.permute.xlu0 %2438 }
 0x34f   :  { %8425 = vst [vmem:[#allocation226_spill] sm:$0xff] %v6076_v41 }
 0x350   :  { %v6078_v38 = vpop.permute.xlu1 %2440  ;;  %2554 = vrot.lane.b32.xlu0 %v8426_v63, %s4201_s15 }
 0x352   :  { %2556 = vrot.lane.b32.xlu1 %v8427_v61, %s4201_s15  ;;  %v6084_v53 = vpop.permute.xlu0 %2442 }
 0x354   :  { %v6086_v52 = vpop.permute.xlu1 %2444  ;;  %2558 = vrot.lane.b32.xlu0 %v8429_v54, %s4201_s15  ;;  %v8435_v54 = vld [vmem:[#allocation119_spill] sm:$0xff] }
 0x355   :  { %8428 = vst [vmem:[#allocation227_spill] sm:$0xff] %v6086_v52  ;;  %v8457_v52 = vld [vmem:[#allocation121_spill] sm:$0xff] }
 0x356   :  { %2560 = vrot.lane.b32.xlu1 %v8430_v51, %s4201_s15  ;;  %v6092_v9 = vpop.permute.xlu0 %2446 }
 0x357   :  { %8431 = vst [vmem:[#allocation228_spill] sm:$0xff] %v6092_v9 }
 0x358   :  { %v6094_v41 = vpop.permute.xlu1 %2448  ;;  %2562 = vrot.lane.b32.xlu0 %v5580_v60, %s4201_s15 }
 0x359   :  { %8432 = vst [vmem:[#allocation229_spill] sm:$0xff] %v6094_v41 }
 0x35a   :  { %2564 = vrot.lane.b32.xlu1 %v5586_v59, %s4201_s15  ;;  %v6100_v61 = vpop.permute.xlu0 %2450 }
 0x35b   :  { %8433 = vst [vmem:[#allocation230_spill] sm:$0xff] %v6100_v61 }
 0x35c   :  { %v6102_v63 = vpop.permute.xlu1 %2452  ;;  %2566 = vrot.lane.b32.xlu0 %v5574_v57, %s4201_s15 }
 0x35d   :  { %8434 = vst [vmem:[#allocation231_spill] sm:$0xff] %v6102_v63  ;;  %v8452_v63 = vld [vmem:[#allocation115_spill] sm:$0xff] }
 0x35e   :  { %2568 = vrot.lane.b32.xlu1 %v8435_v54, %s4201_s15  ;;  %v6108_v51 = vpop.permute.xlu0 %2454  ;;  %v6164_v61 = vadd.f32 %v8452_v63, %v5298_v18  ;;  %v8461_v63 = vld [vmem:[#allocation123_spill] sm:$0xff] }
 0x35f   :  { %8436 = vst [vmem:[#allocation232_spill] sm:$0xff] %v6108_v51 }
 0x360   :  { %v6110_v9 = vpop.permute.xlu1 %2456  ;;  %3033 = vrot.lane.b32.xlu0 %v5350_v12, %s4202_s16  ;;  %8453 = vst [vmem:[#allocation115_spill] sm:$0xff] %v6164_v61 }
 0x361   :  { %8437 = vst [vmem:[#allocation233_spill] sm:$0xff] %v6110_v9 }
 0x362   :  { %2987 = vrot.lane.b32.xlu1 %v5298_v18, %s4202_s16  ;;  %v6116_v59 = vpop.permute.xlu0 %2458  ;;  %v6184_v18 = vadd.f32 %v8461_v63, %v5306_v25  ;;  %v6216_v63 = vadd.f32 %v5324_v37, %v5622_v0  ;;  %v6240_v0 = vadd.f32 %v5334_v27, %v5646_v1  ;;  %v8495_v1 = vld [vmem:[#allocation11_spill] sm:$0xff] }
 0x363   :  { %8438 = vst [vmem:[#allocation234_spill] sm:$0xff] %v6116_v59 }
 0x364   :  { %v6118_v60 = vpop.permute.xlu1 %2460  ;;  %3055 = vrot.lane.b32.xlu0 %v8378_v10, %s4202_s16  ;;  %8462 = vst [vmem:[#allocation123_spill] sm:$0xff] %v6184_v18  ;;  %8474 = vst [vmem:[#allocation248_spill] sm:$0xff] %v6216_v63 }
 0x365   :  { %8439 = vst [vmem:[#allocation235_spill] sm:$0xff] %v6118_v60 }
 0x366   :  { %2989 = vrot.lane.b32.xlu1 %v5302_v21, %s4202_s16  ;;  %v6124_v54 = vpop.permute.xlu0 %2462 }
 0x367   :  { %8440 = vst [vmem:[#allocation236_spill] sm:$0xff] %v6124_v54 }
 0x368   :  { %v6126_v57 = vpop.permute.xlu1 %2464  ;;  %3059 = vrot.lane.b32.xlu0 %v8382_v15, %s4202_s16 }
 0x369   :  { %8441 = vst [vmem:[#allocation237_spill] sm:$0xff] %v6126_v57 }
 0x36a   :  { %2991 = vrot.lane.b32.xlu1 %v5296_v17, %s4202_s16  ;;  %v6132_v9 = vpop.permute.xlu0 %2466 }
 0x36b   :  { %8442 = vst [vmem:[#allocation238_spill] sm:$0xff] %v6132_v9 }
 0x36c   :  { %v6134_v59 = vpop.permute.xlu1 %2468  ;;  %3063 = vrot.lane.b32.xlu0 %v8386_v2, %s4202_s16 }
 0x36d   :  { %8443 = vst [vmem:[#allocation239_spill] sm:$0xff] %v6134_v59  ;;  %v8448_v59 = vld [vmem:[#allocation113_spill] sm:$0xff] }
 0x36e   :  { %2993 = vrot.lane.b32.xlu1 %v5300_v20, %s4202_s16  ;;  %v6140_v60 = vpop.permute.xlu0 %2470  ;;  %v6156_v51 = vadd.f32 %v5296_v17, %v8448_v59  ;;  %v6176_v59 = vadd.f32 %v5304_v23, %v8457_v52  ;;  %v8459_v17 = vld [vmem:[#allocation122_spill] sm:$0xff] }
 0x36f   :  { %8444 = vst [vmem:[#allocation240_spill] sm:$0xff] %v6140_v60  ;;  %v8450_v60 = vld [vmem:[#allocation114_spill] sm:$0xff] }
 0x370   :  { %v6142_v54 = vpop.permute.xlu1 %2472  ;;  %3067 = vrot.lane.b32.xlu0 %v8390_v58, %s4202_s16  ;;  %8449 = vst [vmem:[#allocation113_spill] sm:$0xff] %v6156_v51  ;;  %8458 = vst [vmem:[#allocation121_spill] sm:$0xff] %v6176_v59  ;;  %v8467_v59 = vld [vmem:[#allocation125_spill] sm:$0xff] }
 0x371   :  { %8445 = vst [vmem:[#allocation241_spill] sm:$0xff] %v6142_v54  ;;  %v6160_v54 = vadd.f32 %v5300_v20, %v8450_v60  ;;  %v6180_v60 = vadd.f32 %v5308_v26, %v8459_v17  ;;  %v6188_v20 = vadd.f32 %v5598_v8, %v5310_v28  ;;  %v6200_v17 = vadd.f32 %v8467_v59, %v5314_v31  ;;  %v8470_v8 = vld [vmem:[#allocation126_spill] sm:$0xff]  ;;  %v8515_v51 = vld [vmem:[#allocation61_spill] sm:$0xff] }
 0x372   :  { %2995 = vrot.lane.b32.xlu1 %v5306_v25, %s4202_s16  ;;  %v6148_v57 = vpop.permute.xlu0 %2474  ;;  %v6208_v25 = vadd.f32 %v8470_v8, %v5318_v33  ;;  %v6220_v59 = vadd.f32 %v5628_v55, %v5322_v35  ;;  %v8479_v8 = vld [vmem:[#allocation5_spill] sm:$0xff] }
 0x373   :  { %8446 = vst [vmem:[#allocation242_spill] sm:$0xff] %v6148_v57  ;;  %8451 = vst [vmem:[#allocation114_spill] sm:$0xff] %v6160_v54 }
 0x374   :  { %v6150_v9 = vpop.permute.xlu1 %2476  ;;  %3071 = vrot.lane.b32.xlu0 %v8394_v3, %s4202_s16  ;;  %8460 = vst [vmem:[#allocation122_spill] sm:$0xff] %v6180_v60  ;;  %8463 = vst [vmem:[#allocation245_spill] sm:$0xff] %v6188_v20  ;;  %v8481_v20 = vld [vmem:[#allocation7_spill] sm:$0xff] }
 0x375   :  { %8447 = vst [vmem:[#allocation243_spill] sm:$0xff] %v6150_v9  ;;  %v8455_v9 = vld [vmem:[#allocation117_spill] sm:$0xff]  ;;  %8468 = vst [vmem:[#allocation125_spill] sm:$0xff] %v6200_v17  ;;  %v8480_v17 = vld [vmem:[#allocation130_spill] sm:$0xff] }
 0x376   :  { %2997 = vrot.lane.b32.xlu1 %v5310_v28, %s4202_s16  ;;  %v6168_v57 = vpop.permute.xlu0 %2478  ;;  %v6172_v41 = vadd.f32 %v8455_v9, %v5302_v21  ;;  %v6192_v9 = vadd.f32 %v5312_v30, %v5604_v47  ;;  %v8465_v21 = vld [vmem:[#allocation124_spill] sm:$0xff]  ;;  %8471 = vst [vmem:[#allocation126_spill] sm:$0xff] %v6208_v25  ;;  %v8472_v28 = vld [vmem:[#allocation127_spill] sm:$0xff]  ;;  %8475 = vst [vmem:[#allocation249_spill] sm:$0xff] %v6220_v59 }
 0x377   :  { %8454 = vst [vmem:[#allocation244_spill] sm:$0xff] %v6168_v57  ;;  %v6196_v52 = vadd.f32 %v5316_v32, %v8465_v21  ;;  %v6212_v47 = vadd.f32 %v5320_v34, %v8472_v28  ;;  %v8476_v21 = vld [vmem:[#allocation128_spill] sm:$0xff]  ;;  %v2269_v28 = vadd.f32 %v8481_v20, %v8480_v17  ;;  %8485 = vst [vmem:[#allocation130_spill] sm:$0xff] %v6240_v0  ;;  %v8489_v20 = vld [vmem:[#allocation133_spill] sm:$0xff] }
 0x378   :  { %8456 = vst [vmem:[#allocation117_spill] sm:$0xff] %v6172_v41  ;;  %8464 = vst [vmem:[#allocation246_spill] sm:$0xff] %v6192_v9  ;;  %v6202_v60 = vpop.permute.xlu1 %2480  ;;  %3075 = vrot.lane.b32.xlu0 %v5444_v43, %s4202_s16  ;;  %v8478_v9 = vld [vmem:[#allocation129_spill] sm:$0xff]  ;;  %v6248_v17 = vadd.f32 %v8489_v20, %v5332_v24  ;;  %v2273_v0 = vadd.f32 %v8495_v1, %v5670_v4  ;;  %v8500_v20 = vld [vmem:[#allocation10_spill] sm:$0xff] }
 0x379   :  { %8466 = vst [vmem:[#allocation124_spill] sm:$0xff] %v6196_v52  ;;  %8469 = vst [vmem:[#allocation247_spill] sm:$0xff] %v6202_v60  ;;  %v6224_v52 = vadd.f32 %v8476_v21, %v5326_v39  ;;  %v2268_v25 = vadd.f32 %v8479_v8, %v8478_v9  ;;  %v8486_v21 = vld [vmem:[#allocation6_spill] sm:$0xff]  ;;  %v8487_v9 = vld [vmem:[#allocation8_spill] sm:$0xff] }
 0x37a   :  { %8473 = vst [vmem:[#allocation127_spill] sm:$0xff] %v6212_v47  ;;  %v8482_v47 = vld [vmem:[#allocation131_spill] sm:$0xff]  ;;  %2999 = vrot.lane.b32.xlu1 %v5304_v23, %s4202_s16  ;;  %v6236_v55 = vpop.permute.xlu0 %2482  ;;  %v2266_v63 = vadd.f32 %v5652_v62, %v8486_v21  ;;  %v8488_v8 = vld [vmem:[#allocation132_spill] sm:$0xff]  ;;  %8490 = vst [vmem:[#allocation7_spill] sm:$0xff] %v6248_v17  ;;  %v6260_v62 = vadd.f32 %v5344_v14, %v5676_v49 }
 0x37b   :  { %8477 = vst [vmem:[#allocation128_spill] sm:$0xff] %v6224_v52  ;;  %v6232_v18 = vadd.f32 %v5328_v29, %v8482_v47  ;;  %8484 = vst [vmem:[#allocation5_spill] sm:$0xff] %v6236_v55  ;;  %v2267_v52 = vadd.f32 %v8488_v8, %v8487_v9  ;;  %v8491_v47 = vld [vmem:[#allocation134_spill] sm:$0xff]  ;;  %v8493_v23 = vld [vmem:[#allocation135_spill] sm:$0xff] }
 0x37c   :  { %v6252_v59 = vadd.f32 %v8491_v47, %v5338_v22  ;;  %8496 = vst [vmem:[#allocation6_spill] sm:$0xff] %v6260_v62  ;;  %v6262_v21 = vpop.permute.xlu1 %2484  ;;  %3079 = vrot.lane.b32.xlu0 %v8400_v5, %s4202_s16  ;;  %v8498_v9 = vld [vmem:[#allocation136_spill] sm:$0xff]  ;;  %v8501_v47 = vld [vmem:[#allocation137_spill] sm:$0xff]  ;;  %v8504_v4 = vld [vmem:[#allocation58_spill] sm:$0xff] }
 0x37d   :  { %8483 = vst [vmem:[#allocation129_spill] sm:$0xff] %v6232_v18  ;;  %v8494_v18 = vld [vmem:[#allocation9_spill] sm:$0xff]  ;;  %8497 = vst [vmem:[#allocation8_spill] sm:$0xff] %v6262_v21  ;;  %v6268_v8 = vadd.f32 %v5350_v12, %v8498_v9  ;;  %v8505_v1 = vld [vmem:[#allocation139_spill] sm:$0xff] }
 0x37e   :  { %8492 = vst [vmem:[#allocation131_spill] sm:$0xff] %v6252_v59  ;;  %v2272_v55 = vadd.f32 %v8494_v18, %v8493_v23  ;;  %v2270_v59 = vadd.f32 %v8501_v47, %v8500_v20  ;;  %v8502_v18 = vld [vmem:[#allocation12_spill] sm:$0xff]  ;;  %v8503_v23 = vld [vmem:[#allocation138_spill] sm:$0xff]  ;;  %v6276_v17 = vadd.f32 %v8505_v1, %v8504_v4  ;;  %v8510_v21 = vld [vmem:[#allocation141_spill] sm:$0xff]  ;;  %3001 = vrot.lane.b32.xlu1 %v5308_v26, %s4202_s16  ;;  %v6292_v47 = vpop.permute.xlu0 %2486 }
 0x37f   :  { %8499 = vst [vmem:[#allocation132_spill] sm:$0xff] %v6268_v8  ;;  %v2271_v27 = vadd.f32 %v8503_v23, %v8502_v18  ;;  %v8507_v49 = vld [vmem:[#allocation60_spill] sm:$0xff]  ;;  %v8511_v60 = vld [vmem:[#allocation13_spill] sm:$0xff]  ;;  %v8512_v57 = vld [vmem:[#allocation142_spill] sm:$0xff] }
 0x380   :  { %8506 = vst [vmem:[#allocation133_spill] sm:$0xff] %v6276_v17  ;;  %v8508_v14 = vld [vmem:[#allocation140_spill] sm:$0xff]  ;;  %v2276_v54 = vadd.f32 %v8511_v60, %v8510_v21  ;;  %v8513_v9 = vld [vmem:[#allocation15_spill] sm:$0xff]  ;;  %8517 = vst [vmem:[#allocation9_spill] sm:$0xff] %v6292_v47  ;;  %3083 = vrot.lane.b32.xlu0 %v5460_v45, %s4202_s16 }
 0x381   :  { %v6280_v62 = vadd.f32 %v8508_v14, %v8507_v49  ;;  %v2277_v12 = vadd.f32 %v8513_v9, %v8512_v57  ;;  %v8514_v8 = vld [vmem:[#allocation143_spill] sm:$0xff]  ;;  %v8518_v18 = vld [vmem:[#allocation144_spill] sm:$0xff]  ;;  %v8521_v14 = vld [vmem:[#allocation14_spill] sm:$0xff] }
 0x382   :  { %v6288_v20 = vadd.f32 %v8515_v51, %v8514_v8  ;;  %v8519_v23 = vld [vmem:[#allocation63_spill] sm:$0xff]  ;;  %v8523_v60 = vld [vmem:[#allocation16_spill] sm:$0xff]  ;;  %v8524_v21 = vld [vmem:[#allocation146_spill] sm:$0xff]  ;;  %3003 = vrot.lane.b32.xlu1 %v5314_v31, %s4202_s16 }
 0x383   :  { %8509 = vst [vmem:[#allocation134_spill] sm:$0xff] %v6280_v62  ;;  %v6296_v1 = vadd.f32 %v8519_v23, %v8518_v18  ;;  %v8522_v62 = vld [vmem:[#allocation145_spill] sm:$0xff]  ;;  %v2275_v17 = vadd.f32 %v8524_v21, %v8523_v60  ;;  %v8525_v57 = vld [vmem:[#allocation62_spill] sm:$0xff]  ;;  %v8526_v9 = vld [vmem:[#allocation147_spill] sm:$0xff] }
 0x384   :  { %8516 = vst [vmem:[#allocation135_spill] sm:$0xff] %v6288_v20  ;;  %v2274_v49 = vadd.f32 %v8522_v62, %v8521_v14  ;;  %v6304_v41 = vadd.f32 %v8526_v9, %v8525_v57  ;;  %v8528_v8 = vld [vmem:[#allocation64_spill] sm:$0xff]  ;;  %v8531_v26 = vld [vmem:[#allocation149_spill] sm:$0xff]  ;;  %v6320_v14 = vpop.permute.xlu1 %2488  ;;  %v8538_v60 = vld [vmem:[#allocation150_spill] sm:$0xff]  ;;  %3087 = vrot.lane.b32.xlu0 %v5456_v44, %s4202_s16 }
 0x385   :  { %8520 = vst [vmem:[#allocation11_spill] sm:$0xff] %v6296_v1  ;;  %v8529_v51 = vld [vmem:[#allocation148_spill] sm:$0xff]  ;;  %v8532_v47 = vld [vmem:[#allocation17_spill] sm:$0xff]  ;;  %v8535_v1 = vld [vmem:[#allocation162_spill] sm:$0xff] }
 0x386   :  { %8527 = vst [vmem:[#allocation136_spill] sm:$0xff] %v6304_v41  ;;  %v6308_v20 = vadd.f32 %v8529_v51, %v8528_v8  ;;  %v6312_v61 = vadd.f32 %v8532_v47, %v8531_v26  ;;  %v8533_v18 = vld [vmem:[#allocation161_spill] sm:$0xff]  ;;  %v6318_v62 = vadd.f32 %v8535_v1, %v2269_v28  ;;  %8537 = vst [vmem:[#allocation138_spill] sm:$0xff] %v6320_v14  ;;  %v8539_v21 = vld [vmem:[#allocation19_spill] sm:$0xff]  ;;  %3005 = vrot.lane.b32.xlu1 %v5318_v33, %s4202_s16 }
 0x387   :  { %v6315_v23 = vadd.f32 %v8533_v18, %v2268_v25  ;;  %v6326_v9 = vadd.f32 %v8539_v21, %v8538_v60  ;;  %v8540_v51 = vld [vmem:[#allocation151_spill] sm:$0xff]  ;;  %v8541_v8 = vld [vmem:[#allocation65_spill] sm:$0xff]  ;;  %v8543_v47 = vld [vmem:[#allocation152_spill] sm:$0xff] }
 0x388   :  { %8530 = vst [vmem:[#allocation10_spill] sm:$0xff] %v6308_v20  ;;  %8536 = vst [vmem:[#allocation12_spill] sm:$0xff] %v6318_v62  ;;  %v6330_v20 = vadd.f32 %v8541_v8, %v8540_v51  ;;  %v8544_v26 = vld [vmem:[#allocation67_spill] sm:$0xff]  ;;  %v8546_v18 = vld [vmem:[#allocation18_spill] sm:$0xff]  ;;  %3091 = vrot.lane.b32.xlu0 %v5476_v48, %s4202_s16 }
 0x389   :  { %8534 = vst [vmem:[#allocation137_spill] sm:$0xff] %v6315_v23  ;;  %v6334_v25 = vadd.f32 %v8544_v26, %v8543_v47  ;;  %v8547_v28 = vld [vmem:[#allocation153_spill] sm:$0xff]  ;;  %v8548_v57 = vld [vmem:[#allocation20_spill] sm:$0xff]  ;;  %v8549_v41 = vld [vmem:[#allocation154_spill] sm:$0xff]  ;;  %v6356_v47 = vpop.permute.xlu0 %2490 }
 0x38a   :  { %8542 = vst [vmem:[#allocation139_spill] sm:$0xff] %v6330_v20  ;;  %v6338_v1 = vadd.f32 %v8547_v28, %v8546_v18  ;;  %v6342_v14 = vadd.f32 %v8549_v41, %v8548_v57  ;;  %v8550_v45 = vld [vmem:[#allocation66_spill] sm:$0xff]  ;;  %v8551_v4 = vld [vmem:[#allocation155_spill] sm:$0xff]  ;;  %v8555_v51 = vld [vmem:[#allocation168_spill] sm:$0xff]  ;;  %3007 = vrot.lane.b32.xlu1 %v5312_v30, %s4202_s16 }
 0x38b   :  { %8545 = vst [vmem:[#allocation140_spill] sm:$0xff] %v6334_v25  ;;  %v6346_v60 = vadd.f32 %v8551_v4, %v8550_v45  ;;  %v8553_v21 = vld [vmem:[#allocation167_spill] sm:$0xff]  ;;  %v6352_v8 = vadd.f32 %v8555_v51, %v2267_v52  ;;  %8557 = vst [vmem:[#allocation15_spill] sm:$0xff] %v6356_v47  ;;  %v8558_v18 = vld [vmem:[#allocation68_spill] sm:$0xff] }
 0x38c   :  { %v6349_v22 = vadd.f32 %v8553_v21, %v2266_v63  ;;  %v8559_v28 = vld [vmem:[#allocation156_spill] sm:$0xff]  ;;  %v8561_v41 = vld [vmem:[#allocation157_spill] sm:$0xff]  ;;  %v8563_v4 = vld [vmem:[#allocation158_spill] sm:$0xff]  ;;  %3095 = vrot.lane.b32.xlu0 %v5472_v40, %s4202_s16 }
 0x38d   :  { %8552 = vst [vmem:[#allocation141_spill] sm:$0xff] %v6346_v60  ;;  %8556 = vst [vmem:[#allocation142_spill] sm:$0xff] %v6352_v8  ;;  %v6360_v26 = vadd.f32 %v8559_v28, %v8558_v18  ;;  %v8562_v57 = vld [vmem:[#allocation21_spill] sm:$0xff]  ;;  %v8564_v45 = vld [vmem:[#allocation23_spill] sm:$0xff]  ;;  %v6380_v28 = vsel %vm2762_vm1, %v6315_v23, -inf }
 0x38e   :  { %8554 = vst [vmem:[#allocation13_spill] sm:$0xff] %v6349_v22  ;;  %v6364_v25 = vadd.f32 %v8562_v57, %v8561_v41  ;;  %v6368_v63 = vadd.f32 %v8564_v45, %v8563_v4  ;;  %v8565_v21 = vld [vmem:[#allocation159_spill] sm:$0xff]  ;;  %v8567_v51 = vld [vmem:[#allocation160_spill] sm:$0xff]  ;;  %v6384_v41 = vsel %vm2762_vm1, %v6318_v62, -inf  ;;  %v8570_v57 = vld [vmem:[#allocation173_spill] sm:$0xff]  ;;  %v6389_v45 = vpop.permute.xlu1 %2492  ;;  %v6414_v44 = vsel %vm2762_vm1, %v6349_v22, -inf  ;;  %3009 = vrot.lane.b32.xlu1 %v5316_v32, %s4202_s16 }
 0x38f   :  { %8560 = vst [vmem:[#allocation143_spill] sm:$0xff] %v6360_v26  ;;  %v6372_v52 = vadd.f32 %v8378_v10, %v8565_v21  ;;  %v8568_v31 = vld [vmem:[#allocation71_spill] sm:$0xff]  ;;  %v6387_v18 = vadd.f32 %v8570_v57, %v2272_v55  ;;  %8572 = vst [vmem:[#allocation16_spill] sm:$0xff] %v6389_v45  ;;  %v8573_v4 = vld [vmem:[#allocation22_spill] sm:$0xff] }
 0x390   :  { %v6376_v20 = vadd.f32 %v8568_v31, %v8567_v51  ;;  %v8574_v21 = vld [vmem:[#allocation163_spill] sm:$0xff]  ;;  %v8575_v10 = vld [vmem:[#allocation24_spill] sm:$0xff]  ;;  %v8577_v60 = vld [vmem:[#allocation70_spill] sm:$0xff]  ;;  %3099 = vrot.lane.b32.xlu0 %v5492_v19, %s4202_s16 }
 0x391   :  { %8566 = vst [vmem:[#allocation144_spill] sm:$0xff] %v6372_v52  ;;  %8571 = vst [vmem:[#allocation145_spill] sm:$0xff] %v6387_v18  ;;  %v6395_v51 = vadd.f32 %v8574_v21, %v8573_v4  ;;  %v8576_v26 = vld [vmem:[#allocation164_spill] sm:$0xff]  ;;  %v8580_v31 = vld [vmem:[#allocation174_spill] sm:$0xff]  ;;  %v6418_v4 = vsel %vm2762_vm1, %v6352_v8, -inf }
 0x392   :  { %8569 = vst [vmem:[#allocation14_spill] sm:$0xff] %v6376_v20  ;;  %v6399_v23 = vadd.f32 %v8576_v26, %v8575_v10  ;;  %v8578_v20 = vld [vmem:[#allocation165_spill] sm:$0xff]  ;;  %v6406_v55 = vadd.f32 %v8580_v31, %v2273_v0  ;;  %v8582_v57 = vld [vmem:[#allocation72_spill] sm:$0xff]  ;;  %v8583_v45 = vld [vmem:[#allocation166_spill] sm:$0xff]  ;;  %v6425_v0 = vpop.permute.xlu0 %2494  ;;  %3011 = vrot.lane.b32.xlu1 %v5322_v35, %s4202_s16  ;;  %v6648_v35 = vadd.f32 %v6006_v16, %v6342_v14 }
 0x393   :  { %v6403_v62 = vadd.f32 %v8578_v20, %v8577_v60  ;;  %v6410_v52 = vadd.f32 %v8583_v45, %v8582_v57  ;;  %v8585_v10 = vld [vmem:[#allocation179_spill] sm:$0xff]  ;;  %8587 = vst [vmem:[#allocation17_spill] sm:$0xff] %v6425_v0  ;;  %v8588_v20 = vld [vmem:[#allocation169_spill] sm:$0xff]  ;;  %v8590_v21 = vld [vmem:[#allocation170_spill] sm:$0xff]  ;;  %v6448_v0 = vsel %vm2762_vm1, %v6387_v18, -inf  ;;  %v6456_v60 = vpop.permute.xlu1 %2496 }
 0x394   :  { %8581 = vst [vmem:[#allocation147_spill] sm:$0xff] %v6406_v55  ;;  %v6421_v26 = vadd.f32 %v8585_v10, %v2270_v59  ;;  %v8589_v31 = vld [vmem:[#allocation25_spill] sm:$0xff]  ;;  %v8591_v57 = vld [vmem:[#allocation27_spill] sm:$0xff]  ;;  %v8596_v10 = vld [vmem:[#allocation172_spill] sm:$0xff] }
 0x395   :  { %8579 = vst [vmem:[#allocation146_spill] sm:$0xff] %v6403_v62  ;;  %8584 = vst [vmem:[#allocation148_spill] sm:$0xff] %v6410_v52  ;;  %v6429_v45 = vadd.f32 %v8589_v31, %v8588_v20  ;;  %v6433_v22 = vadd.f32 %v8591_v57, %v8590_v21  ;;  %v8592_v47 = vld [vmem:[#allocation171_spill] sm:$0xff]  ;;  %v8594_v52 = vld [vmem:[#allocation180_spill] sm:$0xff] }
 0x396   :  { %8586 = vst [vmem:[#allocation149_spill] sm:$0xff] %v6421_v26  ;;  %v6437_v8 = vadd.f32 %v8386_v2, %v8592_v47  ;;  %v6440_v59 = vadd.f32 %v8594_v52, %v2271_v27  ;;  %v8597_v62 = vld [vmem:[#allocation75_spill] sm:$0xff]  ;;  %v8599_v20 = vld [vmem:[#allocation185_spill] sm:$0xff]  ;;  %v8601_v57 = vld [vmem:[#allocation186_spill] sm:$0xff]  ;;  %v6462_v27 = vsel %vm2762_vm1, %v6406_v55, -inf  ;;  %v6481_v55 = vsel %vm2762_vm1, %v6421_v26, -inf  ;;  %3013 = vrot.lane.b32.xlu1 %v5326_v39, %s4202_s16 }
 0x397   :  { %v6444_v33 = vadd.f32 %v8597_v62, %v8596_v10  ;;  %v6451_v31 = vadd.f32 %v8599_v20, %v2276_v54  ;;  %v6454_v21 = vadd.f32 %v8601_v57, %v2277_v12  ;;  %8603 = vst [vmem:[#allocation152_spill] sm:$0xff] %v6456_v60  ;;  %v8604_v47 = vld [vmem:[#allocation26_spill] sm:$0xff]  ;;  %v8605_v52 = vld [vmem:[#allocation175_spill] sm:$0xff]  ;;  %v8606_v18 = vld [vmem:[#allocation28_spill] sm:$0xff]  ;;  %v6717_v39 = vsel %vm2762_vm1, %v6648_v35, -inf }
 0x398   :  { %8593 = vst [vmem:[#allocation161_spill] sm:$0xff] %v6437_v8  ;;  %8595 = vst [vmem:[#allocation162_spill] sm:$0xff] %v6440_v59  ;;  %v2286_v10 = vadd.f32 %v8605_v52, %v8604_v47  ;;  %v8607_v62 = vld [vmem:[#allocation176_spill] sm:$0xff]  ;;  %v8608_v54 = vld [vmem:[#allocation191_spill] sm:$0xff] }
 0x399   :  { %8598 = vst [vmem:[#allocation150_spill] sm:$0xff] %v6444_v33  ;;  %8600 = vst [vmem:[#allocation19_spill] sm:$0xff] %v6451_v31  ;;  %v2287_v2 = vadd.f32 %v8607_v62, %v8606_v18  ;;  %v6469_v20 = vadd.f32 %v8608_v54, %v2274_v49  ;;  %v8610_v12 = vld [vmem:[#allocation177_spill] sm:$0xff]  ;;  %v8612_v33 = vld [vmem:[#allocation76_spill] sm:$0xff]  ;;  %v6488_v49 = vpop.permute.xlu0 %2498  ;;  %v6492_v62 = vsel %vm2762_vm1, %v6440_v59, -inf  ;;  %v6512_v59 = vsel %vm2762_vm1, %v6451_v31, -inf }
 0x39a   :  { %8602 = vst [vmem:[#allocation151_spill] sm:$0xff] %v6454_v21  ;;  %v6473_v57 = vadd.f32 %v8610_v12, %v8382_v15  ;;  %v8613_v8 = vld [vmem:[#allocation178_spill] sm:$0xff]  ;;  %v8615_v60 = vld [vmem:[#allocation192_spill] sm:$0xff]  ;;  %8617 = vst [vmem:[#allocation155_spill] sm:$0xff] %v6488_v49  ;;  %3015 = vrot.lane.b32.xlu1 %v5320_v34, %s4202_s16 }
 0x39b   :  { %8609 = vst [vmem:[#allocation18_spill] sm:$0xff] %v6469_v20  ;;  %v6477_v48 = vadd.f32 %v8613_v8, %v8612_v33  ;;  %v6484_v47 = vadd.f32 %v8615_v60, %v2275_v17  ;;  %v8618_v18 = vld [vmem:[#allocation181_spill] sm:$0xff]  ;;  %v8620_v54 = vld [vmem:[#allocation182_spill] sm:$0xff]  ;;  %v8621_v12 = vld [vmem:[#allocation31_spill] sm:$0xff] }
 0x39c   :  { %8611 = vst [vmem:[#allocation153_spill] sm:$0xff] %v6473_v57  ;;  %v8619_v52 = vld [vmem:[#allocation29_spill] sm:$0xff]  ;;  %v6500_v26 = vadd.f32 %v8621_v12, %v8620_v54  ;;  %v8622_v15 = vld [vmem:[#allocation183_spill] sm:$0xff]  ;;  %v8624_v60 = vld [vmem:[#allocation184_spill] sm:$0xff]  ;;  %v6520_v12 = vpop.permute.xlu1 %2500 }
 0x39d   :  { %8614 = vst [vmem:[#allocation20_spill] sm:$0xff] %v6477_v48  ;;  %8616 = vst [vmem:[#allocation154_spill] sm:$0xff] %v6484_v47  ;;  %v6496_v8 = vadd.f32 %v8619_v52, %v8618_v18  ;;  %v6504_v17 = vadd.f32 %v8394_v3, %v8622_v15  ;;  %v8625_v30 = vld [vmem:[#allocation79_spill] sm:$0xff]  ;;  %v6516_v18 = vsel %vm2762_vm1, %v6454_v21, -inf  ;;  %v8628_v52 = vld [vmem:[#allocation30_spill] sm:$0xff]  ;;  %v6536_v21 = vsel %vm2762_vm1, %v6469_v20, -inf  ;;  %v6556_v20 = vpop.permute.xlu0 %2502 }
 0x39e   :  { %v6508_v33 = vadd.f32 %v8625_v30, %v8624_v60  ;;  %8627 = vst [vmem:[#allocation156_spill] sm:$0xff] %v6516_v18  ;;  %v8629_v49 = vld [vmem:[#allocation187_spill] sm:$0xff]  ;;  %8630 = vst [vmem:[#allocation157_spill] sm:$0xff] %v6520_v12  ;;  %v8631_v15 = vld [vmem:[#allocation32_spill] sm:$0xff]  ;;  %3017 = vrot.lane.b32.xlu1 %v5324_v37, %s4202_s16 }
 0x39f   :  { %8623 = vst [vmem:[#allocation167_spill] sm:$0xff] %v6504_v17  ;;  %v2290_v54 = vadd.f32 %v8629_v49, %v8628_v52  ;;  %v8632_v3 = vld [vmem:[#allocation188_spill] sm:$0xff]  ;;  %v8633_v30 = vld [vmem:[#allocation189_spill] sm:$0xff]  ;;  %v8636_v17 = vld [vmem:[#allocation190_spill] sm:$0xff]  ;;  %v6540_v49 = vsel %vm2762_vm1, %v6484_v47, -inf }
 0x3a0   :  { %8626 = vst [vmem:[#allocation168_spill] sm:$0xff] %v6508_v33  ;;  %v2291_v60 = vadd.f32 %v8632_v3, %v8631_v15  ;;  %v6528_v33 = vadd.f32 %v8633_v30, %v8390_v58  ;;  %v8635_v31 = vld [vmem:[#allocation80_spill] sm:$0xff]  ;;  %v8638_v52 = vld [vmem:[#allocation193_spill] sm:$0xff]  ;;  %v8640_v3 = vld [vmem:[#allocation194_spill] sm:$0xff] }
 0x3a1   :  { %v6532_v48 = vadd.f32 %v8636_v17, %v8635_v31  ;;  %v8639_v40 = vld [vmem:[#allocation33_spill] sm:$0xff]  ;;  %v8641_v15 = vld [vmem:[#allocation35_spill] sm:$0xff]  ;;  %8644 = vst [vmem:[#allocation159_spill] sm:$0xff] %v6556_v20  ;;  %v8645_v31 = vld [vmem:[#allocation34_spill] sm:$0xff] }
 0x3a2   :  { %8634 = vst [vmem:[#allocation21_spill] sm:$0xff] %v6528_v33  ;;  %v6544_v12 = vadd.f32 %v8639_v40, %v8638_v52  ;;  %v6548_v30 = vadd.f32 %v8641_v15, %v8640_v3  ;;  %v8642_v58 = vld [vmem:[#allocation195_spill] sm:$0xff]  ;;  %v8646_v47 = vld [vmem:[#allocation197_spill] sm:$0xff]  ;;  %v8647_v33 = vld [vmem:[#allocation36_spill] sm:$0xff] }
 0x3a3   :  { %8637 = vst [vmem:[#allocation158_spill] sm:$0xff] %v6532_v48  ;;  %v6552_v17 = vadd.f32 %v8400_v5, %v8642_v58  ;;  %v6560_v48 = vadd.f32 %v8646_v47, %v8645_v31  ;;  %v8648_v40 = vld [vmem:[#allocation198_spill] sm:$0xff]  ;;  %v8649_v3 = vld [vmem:[#allocation199_spill] sm:$0xff]  ;;  %v8651_v58 = vld [vmem:[#allocation200_spill] sm:$0xff] }
 0x3a4   :  { %v6564_v52 = vadd.f32 %v8648_v40, %v8647_v33  ;;  %v6568_v15 = vadd.f32 %v8649_v3, %v5444_v43  ;;  %v6572_v5 = vadd.f32 %v8651_v58, %v8398_v56  ;;  %v8654_v32 = vld [vmem:[#allocation37_spill] sm:$0xff]  ;;  %v8656_v20 = vld [vmem:[#allocation202_spill] sm:$0xff]  ;;  %v8657_v29 = vld [vmem:[#allocation39_spill] sm:$0xff]  ;;  %v6590_v43 = vpop.permute.xlu1 %2504  ;;  %8684 = vst [vmem:[#allocation179_spill] sm:$0xff] %v6648_v35 }
 0x3a5   :  { %8643 = vst [vmem:[#allocation23_spill] sm:$0xff] %v6552_v17  ;;  %v8653_v17 = vld [vmem:[#allocation201_spill] sm:$0xff]  ;;  %v6580_v31 = vadd.f32 %v8657_v29, %v8656_v20  ;;  %v8659_v47 = vld [vmem:[#allocation38_spill] sm:$0xff]  ;;  %v8660_v18 = vld [vmem:[#allocation203_spill] sm:$0xff] }
 0x3a6   :  { %8650 = vst [vmem:[#allocation160_spill] sm:$0xff] %v6568_v15  ;;  %8652 = vst [vmem:[#allocation173_spill] sm:$0xff] %v6572_v5  ;;  %v6576_v57 = vadd.f32 %v8654_v32, %v8653_v17  ;;  %v6584_v33 = vadd.f32 %v8660_v18, %v8659_v47  ;;  %v8661_v40 = vld [vmem:[#allocation40_spill] sm:$0xff]  ;;  %v8664_v58 = vld [vmem:[#allocation205_spill] sm:$0xff] }
 0x3a7   :  { %8658 = vst [vmem:[#allocation163_spill] sm:$0xff] %v6580_v31  ;;  %v8662_v24 = vld [vmem:[#allocation204_spill] sm:$0xff]  ;;  %8663 = vst [vmem:[#allocation24_spill] sm:$0xff] %v6590_v43  ;;  %v8665_v17 = vld [vmem:[#allocation41_spill] sm:$0xff] }
 0x3a8   :  { %8655 = vst [vmem:[#allocation22_spill] sm:$0xff] %v6576_v57  ;;  %v6588_v3 = vadd.f32 %v8662_v24, %v8661_v40  ;;  %v6596_v32 = vadd.f32 %v8665_v17, %v8664_v58  ;;  %v8667_v56 = vld [vmem:[#allocation206_spill] sm:$0xff]  ;;  %v8668_v29 = vld [vmem:[#allocation43_spill] sm:$0xff]  ;;  %v8671_v15 = vld [vmem:[#allocation44_spill] sm:$0xff] }
 0x3a9   :  { %v6600_v20 = vadd.f32 %v8668_v29, %v8667_v56  ;;  %v8669_v5 = vld [vmem:[#allocation42_spill] sm:$0xff]  ;;  %v8670_v18 = vld [vmem:[#allocation207_spill] sm:$0xff]  ;;  %v8672_v24 = vld [vmem:[#allocation208_spill] sm:$0xff] }
 0x3aa   :  { %8666 = vst [vmem:[#allocation164_spill] sm:$0xff] %v6596_v32  ;;  %v6604_v47 = vadd.f32 %v8670_v18, %v8669_v5  ;;  %v6608_v40 = vadd.f32 %v8672_v24, %v8671_v15  ;;  %v8673_v43 = vld [vmem:[#allocation209_spill] sm:$0xff]  ;;  %v8675_v19 = vld [vmem:[#allocation47_spill] sm:$0xff]  ;;  %v8676_v17 = vld [vmem:[#allocation46_spill] sm:$0xff]  ;;  %v6624_v5 = vadd.f32 %v6004_v46, %v6338_v1  ;;  %v6628_v15 = vpop.permute.xlu0 %2506  ;;  %v6644_v46 = vadd.f32 %v6022_v6, %v6399_v23 }
 0x3ab   :  { %v8674_v31 = vld [vmem:[#allocation45_spill] sm:$0xff]  ;;  %v6616_v58 = vadd.f32 %v8675_v19, %v5974_v7  ;;  %v8677_v32 = vld [vmem:[#allocation210_spill] sm:$0xff]  ;;  %v8679_v29 = vld [vmem:[#allocation48_spill] sm:$0xff]  ;;  %v6656_v1 = vadd.f32 %v6028_v36, %v6364_v25 }
 0x3ac   :  { %v6612_v57 = vadd.f32 %v8674_v31, %v8673_v43  ;;  %v6620_v56 = vadd.f32 %v8677_v32, %v8676_v17  ;;  %8678 = vst [vmem:[#allocation165_spill] sm:$0xff] %v6624_v5  ;;  %v6632_v43 = vadd.f32 %v5982_v11, %v8679_v29  ;;  %v8680_v31 = vld [vmem:[#allocation211_spill] sm:$0xff]  ;;  %v8681_v19 = vld [vmem:[#allocation49_spill] sm:$0xff]  ;;  %v6640_v32 = vadd.f32 %v6020_v50, %v6395_v51  ;;  %v6662_v51 = vpop.permute.xlu1 %2508  ;;  %v8688_v23 = vld [vmem:[#allocation212_spill] sm:$0xff] }
 0x3ad   :  { %v6636_v7 = vadd.f32 %v8681_v19, %v8680_v31  ;;  %8683 = vst [vmem:[#allocation166_spill] sm:$0xff] %v6644_v46  ;;  %v6652_v11 = vadd.f32 %v6012_v42, %v6312_v61  ;;  %8686 = vst [vmem:[#allocation25_spill] sm:$0xff] %v6656_v1  ;;  %v6660_v50 = vadd.f32 %v6030_v13, %v6368_v63  ;;  %v8687_v6 = vld [vmem:[#allocation93_spill] sm:$0xff]  ;;  %v8689_v16 = vld [vmem:[#allocation51_spill] sm:$0xff]  ;;  %v6686_v31 = vsel %vm2762_vm1, %v6624_v5, -inf }
 0x3ae   :  { %8682 = vst [vmem:[#allocation174_spill] sm:$0xff] %v6640_v32  ;;  %3103 = vrot.lane.b32.xlu0 %v8687_v6, %s4202_s16  ;;  %v6668_v14 = vadd.f32 %v8689_v16, %v8688_v23  ;;  %v8690_v18 = vld [vmem:[#allocation50_spill] sm:$0xff]  ;;  %v8691_v42 = vld [vmem:[#allocation213_spill] sm:$0xff]  ;;  %v8692_v24 = vld [vmem:[#allocation216_spill] sm:$0xff] }
 0x3af   :  { %8685 = vst [vmem:[#allocation169_spill] sm:$0xff] %v6652_v11  ;;  %v6672_v61 = vadd.f32 %v8691_v42, %v8690_v18  ;;  %v6675_v36 = vadd.f32 %v8692_v24, %v2286_v10  ;;  %v8694_v25 = vld [vmem:[#allocation217_spill] sm:$0xff]  ;;  %v8696_v13 = vld [vmem:[#allocation52_spill] sm:$0xff]  ;;  %v8697_v63 = vld [vmem:[#allocation214_spill] sm:$0xff]  ;;  %v6702_v10 = vsel %vm2762_vm1, %v6640_v32, -inf  ;;  %v6706_v42 = vsel %vm2762_vm1, %v6644_v46, -inf }
 0x3b0   :  { %v6678_v17 = vadd.f32 %v8694_v25, %v2287_v2  ;;  %v6682_v29 = vadd.f32 %v8697_v63, %v8696_v13  ;;  %v8698_v19 = vld [vmem:[#allocation215_spill] sm:$0xff]  ;;  %v8700_v16 = vld [vmem:[#allocation218_spill] sm:$0xff]  ;;  %v6698_v2 = vpop.permute.xlu0 %2510  ;;  %v8704_v25 = vld [vmem:[#allocation220_spill] sm:$0xff]  ;;  %v6721_v13 = vsel %vm2762_vm1, %v6652_v11, -inf  ;;  %v6725_v63 = vsel %vm2762_vm1, %v6656_v1, -inf }
 0x3b1   :  { %8693 = vst [vmem:[#allocation170_spill] sm:$0xff] %v6675_v36  ;;  %v6690_v23 = vadd.f32 %v8698_v19, %v6326_v9  ;;  %v6694_v18 = vadd.f32 %v8700_v16, %v6429_v45  ;;  %v8702_v9 = vld [vmem:[#allocation219_spill] sm:$0xff]  ;;  %v6713_v45 = vadd.f32 %v8704_v25, %v2290_v54  ;;  %v6729_v19 = vsel %vm2762_vm1, %v6660_v50, -inf  ;;  %v8706_v54 = vld [vmem:[#allocation98_spill] sm:$0xff]  ;;  %v8707_v25 = vld [vmem:[#allocation221_spill] sm:$0xff] }
 0x3b2   :  { %8695 = vst [vmem:[#allocation27_spill] sm:$0xff] %v6678_v17  ;;  %v6710_v24 = vadd.f32 %v8702_v9, %v6433_v22  ;;  %v6731_v22 = vpop.permute.xlu1 %2512  ;;  %3107 = vrot.lane.b32.xlu0 %v8706_v54, %s4202_s16  ;;  %v6737_v16 = vsel %vm2762_vm1, %v6675_v36, -inf  ;;  %v6741_v9 = vsel %vm2762_vm1, %v6678_v17, -inf  ;;  %v6744_v11 = vadd.f32 %v8707_v25, %v2291_v60  ;;  %v8709_v35 = vld [vmem:[#allocation222_spill] sm:$0xff] }
 0x3b3   :  { %8699 = vst [vmem:[#allocation171_spill] sm:$0xff] %v6690_v23  ;;  %8701 = vst [vmem:[#allocation180_spill] sm:$0xff] %v6694_v18  ;;  %v6748_v5 = vadd.f32 %v8709_v35, %v6496_v8  ;;  %v6752_v1 = vsel %vm2762_vm1, %v6690_v23, -inf  ;;  %v2765_v46 = vmax.f32 %v6414_v44, %v6702_v10  ;;  %v2776_v36 = vmax.f32 %v6418_v4, %v6706_v42  ;;  %v8711_v44 = vld [vmem:[#allocation223_spill] sm:$0xff]  ;;  %v8713_v10 = vld [vmem:[#allocation224_spill] sm:$0xff] }
 0x3b4   :  { %8703 = vst [vmem:[#allocation172_spill] sm:$0xff] %v6710_v24  ;;  %8705 = vst [vmem:[#allocation185_spill] sm:$0xff] %v6713_v45  ;;  %v6760_v17 = vsel %vm2762_vm1, %v6694_v18, -inf  ;;  %v6764_v60 = vpop.permute.xlu0 %2514  ;;  %v6768_v8 = vsel %vm2762_vm1, %v6710_v24, -inf  ;;  %v6772_v35 = vsel %vm2762_vm1, %v6713_v45, -inf  ;;  %v6776_v4 = vadd.f32 %v8711_v44, %v6500_v26  ;;  %v8715_v26 = vld [vmem:[#allocation97_spill] sm:$0xff] }
 0x3b5   :  { %8708 = vst [vmem:[#allocation186_spill] sm:$0xff] %v6744_v11  ;;  %8710 = vst [vmem:[#allocation26_spill] sm:$0xff] %v6748_v5  ;;  %v6780_v42 = vadd.f32 %v8713_v10, %v6560_v48  ;;  %v2787_v34 = vmax.f32 %v6380_v28, %v6725_v63  ;;  %v2798_v25 = vmax.f32 %v6384_v41, %v6729_v19  ;;  %v6796_v48 = vsel %vm2762_vm1, %v6744_v11, -inf  ;;  %v8716_v41 = vld [vmem:[#allocation225_spill] sm:$0xff]  ;;  %v8726_v10 = vld [vmem:[#allocation163_spill] sm:$0xff] }
 0x3b6   :  { %8712 = vst [vmem:[#allocation175_spill] sm:$0xff] %v6776_v4  ;;  %v2809_v23 = vmax.f32 %v6481_v55, %v6737_v16  ;;  %v2820_v45 = vmax.f32 %v6492_v62, %v6741_v9  ;;  %v6790_v24 = vpop.permute.xlu1 %2516  ;;  %3111 = vrot.lane.b32.xlu0 %v8715_v26, %s4202_s16  ;;  %v6800_v28 = vsel %vm2762_vm1, %v6748_v5, -inf  ;;  %v6804_v63 = vadd.f32 %v8716_v41, %v6564_v52  ;;  %v8718_v55 = vld [vmem:[#allocation226_spill] sm:$0xff]  ;;  %v8727_v41 = vld [vmem:[#allocation229_spill] sm:$0xff] }
 0x3b7   :  { %8714 = vst [vmem:[#allocation28_spill] sm:$0xff] %v6780_v42  ;;  %v6808_v62 = vadd.f32 %v8718_v55, %v6544_v12  ;;  %v2831_v19 = vmax.f32 %v6448_v0, %v6760_v17  ;;  %v2842_v16 = vmax.f32 %v6462_v27, %v6768_v8  ;;  %v2853_v9 = vmax.f32 %v6536_v21, %v6772_v35  ;;  %v8723_v17 = vld [vmem:[#allocation22_spill] sm:$0xff]  ;;  %v8724_v8 = vld [vmem:[#allocation228_spill] sm:$0xff] }
 0x3b8   :  { %8717 = vst [vmem:[#allocation176_spill] sm:$0xff] %v6804_v63  ;;  %v6818_v44 = vadd.f32 %v6078_v38, %v6548_v30  ;;  %v6822_v52 = vpop.permute.xlu0 %2518  ;;  %v6826_v12 = vsel %vm2762_vm1, %v6776_v4, -inf  ;;  %v6830_v0 = vsel %vm2762_vm1, %v6780_v42, -inf  ;;  %v6834_v21 = vadd.f32 %v6084_v53, %v6584_v33  ;;  %v8722_v38 = vld [vmem:[#allocation227_spill] sm:$0xff]  ;;  %v8728_v33 = vld [vmem:[#allocation54_spill] sm:$0xff] }
 0x3b9   :  { %8719 = vst [vmem:[#allocation191_spill] sm:$0xff] %v6808_v62  ;;  %v6838_v27 = vadd.f32 %v8722_v38, %v6588_v3  ;;  %v2864_v37 = vmax.f32 %v6540_v49, %v6796_v48  ;;  %v2875_v30 = vmax.f32 %v6512_v59, %v6800_v28  ;;  %v6846_v35 = vadd.f32 %v8724_v8, %v8723_v17  ;;  %v8729_v3 = vld [vmem:[#allocation230_spill] sm:$0xff]  ;;  %v8731_v28 = vld [vmem:[#allocation231_spill] sm:$0xff]  ;;  %v8733_v17 = vld [vmem:[#allocation156_spill] sm:$0xff] }
 0x3ba   :  { %8720 = vst [vmem:[#allocation177_spill] sm:$0xff] %v6818_v44  ;;  %8721 = vst [vmem:[#allocation178_spill] sm:$0xff] %v6834_v21  ;;  %v6850_v55 = vadd.f32 %v8727_v41, %v8726_v10  ;;  %v6852_v53 = vpop.permute.xlu1 %2520  ;;  %3243 = vrot.lane.b32.xlu0 %v8728_v33, %s4203_s17  ;;  %v6858_v49 = vsel %vm2762_vm1, %v6804_v63, -inf  ;;  %v6862_v59 = vsel %vm2762_vm1, %v6808_v62, -inf  ;;  %v6866_v48 = vadd.f32 %v8729_v3, %v6604_v47  ;;  %v8734_v62 = vld [vmem:[#allocation164_spill] sm:$0xff]  ;;  %v8739_v3 = vld [vmem:[#allocation234_spill] sm:$0xff] }
 0x3bb   :  { %8725 = vst [vmem:[#allocation192_spill] sm:$0xff] %v6846_v35  ;;  %v6870_v38 = vadd.f32 %v8731_v28, %v6608_v40  ;;  %v2886_v8 = vmax.f32 %v8733_v17, %v6826_v12  ;;  %v2897_v10 = vmax.f32 %v6686_v31, %v6830_v0  ;;  %v6878_v41 = vsel %vm2762_vm1, %v6818_v44, -inf  ;;  %v8735_v63 = vld [vmem:[#allocation232_spill] sm:$0xff]  ;;  %3019 = vrot.lane.b32.xlu1 %v8728_v33, %s4202_s16  ;;  %v8737_v31 = vld [vmem:[#allocation233_spill] sm:$0xff] }
 0x3bc   :  { %8730 = vst [vmem:[#allocation181_spill] sm:$0xff] %v6866_v48  ;;  %v6882_v42 = vadd.f32 %v8735_v63, %v8734_v62  ;;  %v6886_v47 = vpop.permute.xlu0 %2522  ;;  %v2766_v40 = vsel %vm2762_vm1, %v6834_v21, -inf  ;;  %v2777_v12 = vsel %vm2762_vm1, %v6838_v27, -inf  ;;  %v6894_v0 = vadd.f32 %v8737_v31, %v6600_v20  ;;  %v8741_v20 = vld [vmem:[#allocation53_spill] sm:$0xff]  ;;  %v8783_v21 = vld [vmem:[#allocation138_spill] sm:$0xff] }
 0x3bd   :  { %8732 = vst [vmem:[#allocation29_spill] sm:$0xff] %v6870_v38  ;;  %v6898_v28 = vadd.f32 %v8739_v3, %v6620_v56  ;;  %v2908_v63 = vmax.f32 %v6717_v39, %v6858_v49  ;;  %v2788_v33 = vsel %vm2762_vm1, %v6846_v35, -inf  ;;  %v2799_v17 = vsel %vm2762_vm1, %v6850_v55, -inf  ;;  %v8742_v49 = vld [vmem:[#allocation235_spill] sm:$0xff]  ;;  %v8744_v3 = vld [vmem:[#allocation236_spill] sm:$0xff] }
 0x3be   :  { %8736 = vst [vmem:[#allocation182_spill] sm:$0xff] %v6882_v42  ;;  %8738 = vst [vmem:[#allocation31_spill] sm:$0xff] %v6894_v0  ;;  %v6908_v44 = vpop.permute.xlu1 %2524  ;;  %3247 = vrot.lane.b32.xlu0 %v8741_v20, %s4203_s17  ;;  %v2810_v56 = vsel %vm2762_vm1, %v6866_v48, -inf  ;;  %v2821_v39 = vsel %vm2762_vm1, %v6870_v38, -inf  ;;  %v6918_v31 = vadd.f32 %v8742_v49, %v6632_v43  ;;  %v6922_v62 = vadd.f32 %v8744_v3, %v6612_v57  ;;  %v8746_v38 = vld [vmem:[#allocation56_spill] sm:$0xff]  ;;  %v8747_v49 = vld [vmem:[#allocation237_spill] sm:$0xff] }
 0x3bf   :  { %8740 = vst [vmem:[#allocation183_spill] sm:$0xff] %v6898_v28  ;;  %v6926_v5 = vmax.f32 %v2765_v46, %v2766_v40  ;;  %v6928_v11 = vmax.f32 %v2776_v36, %v2777_v12  ;;  %v2832_v18 = vsel %vm2762_vm1, %v6882_v42, -inf  ;;  %3021 = vrot.lane.b32.xlu1 %v8746_v38, %s4202_s16  ;;  %v2843_v43 = vsel %vm2762_vm1, %v6894_v0, -inf  ;;  %v8749_v36 = vld [vmem:[#allocation238_spill] sm:$0xff] }
 0x3c0   :  { %8743 = vst [vmem:[#allocation184_spill] sm:$0xff] %v6918_v31  ;;  %8745 = vst [vmem:[#allocation30_spill] sm:$0xff] %v6922_v62  ;;  %v6934_v48 = vpop.permute.xlu0 %2526  ;;  %v2854_v57 = vsel %vm2762_vm1, %v6898_v28, -inf  ;;  %v6942_v46 = vadd.f32 %v8747_v49, %v6616_v58  ;;  %v6946_v40 = vadd.f32 %v8749_v36, %v6672_v61  ;;  %v6948_v12 = vmax.f32 %v2787_v34, %v2788_v33  ;;  %v8751_v28 = vld [vmem:[#allocation58_spill] sm:$0xff]  ;;  %v8752_v34 = vld [vmem:[#allocation239_spill] sm:$0xff] }
 0x3c1   :  { %v6950_v3 = vmax.f32 %v2798_v25, %v2799_v17  ;;  %v6952_v4 = vmax.f32 %v2809_v23, %v2810_v56  ;;  %v6954_v42 = vmax.f32 %v2820_v45, %v2821_v39  ;;  %v6960_v35 = vmax.f32 %v2831_v19, %v2832_v18  ;;  %v8754_v33 = vld [vmem:[#allocation115_spill] sm:$0xff]  ;;  %v8755_v17 = vld [vmem:[#allocation242_spill] sm:$0xff]  ;;  %v8757_v18 = vld [vmem:[#allocation117_spill] sm:$0xff] }
 0x3c2   :  { %8748 = vst [vmem:[#allocation187_spill] sm:$0xff] %v6942_v46  ;;  %8750 = vst [vmem:[#allocation32_spill] sm:$0xff] %v6946_v40  ;;  %v6956_v0 = vpop.permute.xlu1 %2528  ;;  %3251 = vrot.lane.b32.xlu0 %v8751_v28, %s4203_s17  ;;  %v2865_v58 = vsel %vm2762_vm1, %v6918_v31, -inf  ;;  %v2876_v61 = vsel %vm2762_vm1, %v6922_v62, -inf  ;;  %v6968_v25 = vadd.f32 %v8752_v34, %v6682_v29  ;;  %v6970_v23 = vmax.f32 %v2842_v16, %v2843_v43  ;;  %v8758_v19 = vld [vmem:[#allocation243_spill] sm:$0xff]  ;;  %v8761_v43 = vld [vmem:[#allocation244_spill] sm:$0xff] }
 0x3c3   :  { %v6972_v45 = vmax.f32 %v2853_v9, %v2854_v57  ;;  %v6976_v56 = vadd.f32 %v8755_v17, %v8754_v33  ;;  %v6980_v39 = vadd.f32 %v8758_v19, %v8757_v18  ;;  %3023 = vrot.lane.b32.xlu1 %v8741_v20, %s4202_s16  ;;  %v2887_v29 = vsel %vm2762_vm1, %v6942_v46, -inf  ;;  %v8760_v9 = vld [vmem:[#allocation113_spill] sm:$0xff]  ;;  %v8763_v36 = vld [vmem:[#allocation114_spill] sm:$0xff]  ;;  %v8764_v34 = vld [vmem:[#allocation247_spill] sm:$0xff] }
 0x3c4   :  { %8753 = vst [vmem:[#allocation188_spill] sm:$0xff] %v6968_v25  ;;  %v6984_v49 = vpop.permute.xlu0 %2530  ;;  %v2898_v16 = vsel %vm2762_vm1, %v6946_v40, -inf  ;;  %v6992_v57 = vadd.f32 %v8761_v43, %v8760_v9  ;;  %v6996_v33 = vadd.f32 %v8764_v34, %v8763_v36  ;;  %v6998_v17 = vmax.f32 %v2864_v37, %v2865_v58  ;;  %v8766_v20 = vld [vmem:[#allocation240_spill] sm:$0xff]  ;;  %v8768_v46 = vld [vmem:[#allocation241_spill] sm:$0xff]  ;;  %v8770_v9 = vld [vmem:[#allocation70_spill] sm:$0xff] }
 0x3c5   :  { %8756 = vst [vmem:[#allocation189_spill] sm:$0xff] %v6976_v56  ;;  %8759 = vst [vmem:[#allocation190_spill] sm:$0xff] %v6980_v39  ;;  %v7000_v18 = vmax.f32 %v2875_v30, %v2876_v61  ;;  %v7004_v19 = vadd.f32 %v8766_v20, %v6636_v7  ;;  %v7008_v62 = vadd.f32 %v8768_v46, %v6668_v14  ;;  %v2909_v43 = vsel %vm2762_vm1, %v6968_v25, -inf  ;;  %v8771_v37 = vld [vmem:[#allocation123_spill] sm:$0xff]  ;;  %v8772_v58 = vld [vmem:[#allocation5_spill] sm:$0xff] }
 0x3c6   :  { %8762 = vst [vmem:[#allocation193_spill] sm:$0xff] %v6992_v57  ;;  %8765 = vst [vmem:[#allocation33_spill] sm:$0xff] %v6996_v33  ;;  %v7010_v40 = vpop.permute.xlu1 %2532  ;;  %3275 = vrot.lane.b32.xlu0 %v8770_v9, %s4203_s17  ;;  %v7018_v30 = vadd.f32 %v8772_v58, %v8771_v37  ;;  %v8774_v61 = vld [vmem:[#allocation245_spill] sm:$0xff]  ;;  %v8775_v36 = vld [vmem:[#allocation8_spill] sm:$0xff]  ;;  %v7026_v46 = vmax.f32 %v2886_v8, %v2887_v29  ;;  %v7028_v20 = vmax.f32 %v2897_v10, %v2898_v16 }
 0x3c7   :  { %8767 = vst [vmem:[#allocation194_spill] sm:$0xff] %v7004_v19  ;;  %8769 = vst [vmem:[#allocation35_spill] sm:$0xff] %v7008_v62  ;;  %v7022_v7 = vadd.f32 %v8775_v36, %v8774_v61  ;;  %v8777_v34 = vld [vmem:[#allocation7_spill] sm:$0xff]  ;;  %v2768_v31 = vsel %vm2762_vm1, %v6976_v56, -inf  ;;  %v2779_v25 = vsel %vm2762_vm1, %v6980_v39, -inf  ;;  %v2790_v61 = vsel %vm2762_vm1, %v6992_v57, -inf }
 0x3c8   :  { %8773 = vst [vmem:[#allocation195_spill] sm:$0xff] %v7018_v30  ;;  %v2730_v14 = vadd.f32 %v6628_v15, %v8777_v34  ;;  %v8778_v37 = vld [vmem:[#allocation55_spill] sm:$0xff]  ;;  %v7036_v58 = vpop.permute.xlu0 %2534  ;;  %v2801_v15 = vsel %vm2762_vm1, %v6996_v33, -inf  ;;  %v8779_v8 = vld [vmem:[#allocation121_spill] sm:$0xff]  ;;  %v7048_v34 = vmax.f32 %v2908_v63, %v2909_v43  ;;  %v7052_v56 = vsel %vm2762_vm1, %v7004_v19, -inf  ;;  %v8782_v57 = vld [vmem:[#allocation122_spill] sm:$0xff] }
 0x3c9   :  { %8776 = vst [vmem:[#allocation34_spill] sm:$0xff] %v7022_v7  ;;  %3025 = vrot.lane.b32.xlu1 %v8778_v37, %s4202_s16  ;;  %v8780_v10 = vld [vmem:[#allocation9_spill] sm:$0xff]  ;;  %v8781_v16 = vld [vmem:[#allocation131_spill] sm:$0xff]  ;;  %v7056_v39 = vsel %vm2762_vm1, %v7008_v62, -inf  ;;  %v7060_v33 = vadd.f32 %v8783_v21, %v8782_v57  ;;  %v7070_v63 = vsel %vm2762_vm1, %v7022_v7, -inf  ;;  %v2769_v21 = vmax.f32 %v6926_v5, %v2768_v31  ;;  %v8787_v5 = vld [vmem:[#allocation146_spill] sm:$0xff] }
 0x3ca   :  { %v7044_v29 = vadd.f32 %v8780_v10, %v8779_v8  ;;  %v2731_v36 = vadd.f32 %v6662_v51, %v8781_v16  ;;  %v7062_v32 = vpop.permute.xlu1 %2536  ;;  %v8784_v8 = vld [vmem:[#allocation86_spill] sm:$0xff]  ;;  %v2812_v51 = vsel %vm2762_vm1, %v7018_v30, -inf  ;;  %v2770_v43 = vsel %vm2762_vm1, %v2730_v14, -inf  ;;  %v8785_v10 = vld [vmem:[#allocation129_spill] sm:$0xff] }
 0x3cb   :  { %3307 = vrot.lane.b32.xlu0 %v8784_v8, %s4203_s17  ;;  %v2732_v16 = vadd.f32 %v6698_v2, %v8785_v10  ;;  %v2780_v57 = vmax.f32 %v6928_v11, %v2779_v25  ;;  %v2791_v62 = vmax.f32 %v6948_v12, %v2790_v61  ;;  %v2802_v8 = vmax.f32 %v6950_v3, %v2801_v15  ;;  %v8786_v30 = vld [vmem:[#allocation130_spill] sm:$0xff]  ;;  %v8789_v61 = vld [vmem:[#allocation88_spill] sm:$0xff] }
 0x3cc   :  { %v2539_v19 = vpop.permute.xlu0 %2538  ;;  %v7083_v7 = vsel %vm2762_vm1, %v7044_v29, -inf  ;;  %v2781_v14 = vsel %vm2762_vm1, %v2731_v36, -inf  ;;  %v2733_v2 = vadd.f32 %v6731_v22, %v8786_v30  ;;  %v2813_v11 = vmax.f32 %v6952_v4, %v2812_v51  ;;  %v8790_v22 = vld [vmem:[#allocation133_spill] sm:$0xff]  ;;  %v8792_v30 = vld [vmem:[#allocation148_spill] sm:$0xff] }
 0x3cd   :  { %3027 = vrot.lane.b32.xlu1 %v8751_v28, %s4202_s16  ;;  %v2746_v31 = vadd.f32 %v2539_v19, %v8787_v5  ;;  %v2824_v12 = vmax.f32 %v6954_v42, %v7070_v63  ;;  %v7094_v28 = vsel %vm2762_vm1, %v7060_v33, -inf  ;;  %v7096_v3 = vmax.f32 %v2769_v21, %v2770_v43  ;;  %v8793_v51 = vld [vmem:[#allocation125_spill] sm:$0xff]  ;;  %v8794_v63 = vld [vmem:[#allocation15_spill] sm:$0xff]  ;;  %v8797_v21 = vld [vmem:[#allocation60_spill] sm:$0xff] }
 0x3ce   :  { %v2541_v25 = vpop.permute.xlu1 %2540  ;;  %v2792_v15 = vsel %vm2762_vm1, %v2732_v16, -inf  ;;  %v2734_v19 = vadd.f32 %v6764_v60, %v8790_v22  ;;  %v2835_v36 = vmax.f32 %v6960_v35, %v7083_v7  ;;  %v7111_v43 = vadd.f32 %v8794_v63, %v8793_v51  ;;  %v8800_v7 = vld [vmem:[#allocation144_spill] sm:$0xff] }
 0x3cf   :  { %8788 = vst [vmem:[#allocation197_spill] sm:$0xff] %v7096_v3  ;;  %3309 = vrot.lane.b32.xlu0 %v8789_v61, %s4203_s17  ;;  %v7104_v4 = vsel %vm2762_vm1, %v2746_v31, -inf  ;;  %v2747_v42 = vadd.f32 %v2541_v25, %v8792_v30  ;;  %v7113_v10 = vmax.f32 %v2780_v57, %v2781_v14  ;;  %v2803_v5 = vsel %vm2762_vm1, %v2733_v2, -inf  ;;  %v8798_v31 = vld [vmem:[#allocation134_spill] sm:$0xff]  ;;  %v8802_v30 = vld [vmem:[#allocation16_spill] sm:$0xff] }
 0x3d0   :  { %8791 = vst [vmem:[#allocation36_spill] sm:$0xff] %v7104_v4  ;;  %8795 = vst [vmem:[#allocation198_spill] sm:$0xff] %v7111_v43  ;;  %v2543_v60 = vpop.permute.xlu0 %2542  ;;  %v2735_v25 = vadd.f32 %v6790_v24, %v8798_v31  ;;  %v2846_v57 = vmax.f32 %v6970_v23, %v7094_v28  ;;  %v8801_v14 = vld [vmem:[#allocation126_spill] sm:$0xff]  ;;  %v7132_v63 = vmax.f32 %v2791_v62, %v2792_v15  ;;  %v8805_v24 = vld [vmem:[#allocation71_spill] sm:$0xff]  ;;  %v2856_v62 = vsel %vm2762_vm1, %v7111_v43, -inf }
 0x3d1   :  { %8796 = vst [vmem:[#allocation199_spill] sm:$0xff] %v7113_v10  ;;  %3029 = vrot.lane.b32.xlu1 %v8797_v21, %s4202_s16  ;;  %v7123_v35 = vsel %vm2762_vm1, %v2747_v42, -inf  ;;  %v2748_v22 = vadd.f32 %v2543_v60, %v8800_v7  ;;  %v7130_v51 = vadd.f32 %v8802_v30, %v8801_v14  ;;  %v2814_v42 = vsel %vm2762_vm1, %v2734_v19, -inf  ;;  %v8806_v31 = vld [vmem:[#allocation6_spill] sm:$0xff]  ;;  %v8810_v14 = vld [vmem:[#allocation17_spill] sm:$0xff]  ;;  %v8824_v4 = vld [vmem:[#allocation20_spill] sm:$0xff] }
 0x3d2   :  { %8799 = vst [vmem:[#allocation200_spill] sm:$0xff] %v7123_v35  ;;  %8804 = vst [vmem:[#allocation37_spill] sm:$0xff] %v7132_v63  ;;  %v2545_v16 = vpop.permute.xlu1 %2544  ;;  %v2736_v60 = vadd.f32 %v6822_v52, %v8806_v31  ;;  %v8808_v28 = vld [vmem:[#allocation14_spill] sm:$0xff]  ;;  %v7151_v2 = vmax.f32 %v2802_v8, %v2803_v5  ;;  %v8813_v35 = vld [vmem:[#allocation57_spill] sm:$0xff] }
 0x3d3   :  { %8803 = vst [vmem:[#allocation201_spill] sm:$0xff] %v7130_v51  ;;  %3281 = vrot.lane.b32.xlu0 %v8805_v24, %s4203_s17  ;;  %v7142_v23 = vsel %vm2762_vm1, %v2748_v22, -inf  ;;  %v2749_v7 = vadd.f32 %v2545_v16, %v8808_v28  ;;  %v8809_v15 = vld [vmem:[#allocation246_spill] sm:$0xff]  ;;  %v2825_v22 = vsel %vm2762_vm1, %v2735_v25, -inf  ;;  %v8814_v31 = vld [vmem:[#allocation132_spill] sm:$0xff]  ;;  %v8816_v10 = vld [vmem:[#allocation153_spill] sm:$0xff] }
 0x3d4   :  { %8807 = vst [vmem:[#allocation202_spill] sm:$0xff] %v7142_v23  ;;  %v7149_v30 = vadd.f32 %v8810_v14, %v8809_v15  ;;  %8812 = vst [vmem:[#allocation38_spill] sm:$0xff] %v7151_v2  ;;  %v2547_v52 = vpop.permute.xlu0 %2546  ;;  %v2737_v16 = vadd.f32 %v6852_v53, %v8814_v31  ;;  %v2867_v8 = vsel %vm2762_vm1, %v7130_v51, -inf  ;;  %v8817_v5 = vld [vmem:[#allocation124_spill] sm:$0xff]  ;;  %v7170_v23 = vmax.f32 %v2813_v11, %v2814_v42 }
 0x3d5   :  { %3031 = vrot.lane.b32.xlu1 %v8813_v35, %s4202_s16  ;;  %v7161_v28 = vsel %vm2762_vm1, %v2749_v7, -inf  ;;  %v2750_v15 = vadd.f32 %v2547_v52, %v8816_v10  ;;  %v8818_v14 = vld [vmem:[#allocation152_spill] sm:$0xff]  ;;  %v2836_v7 = vsel %vm2762_vm1, %v2736_v60, -inf  ;;  %v2857_v11 = vmax.f32 %v6972_v45, %v2856_v62  ;;  %v8826_v60 = vld [vmem:[#allocation62_spill] sm:$0xff]  ;;  %v8829_v45 = vld [vmem:[#allocation161_spill] sm:$0xff] }
 0x3d6   :  { %8811 = vst [vmem:[#allocation39_spill] sm:$0xff] %v7149_v30  ;;  %8815 = vst [vmem:[#allocation203_spill] sm:$0xff] %v7161_v28  ;;  %v7168_v19 = vadd.f32 %v8818_v14, %v8817_v5  ;;  %v2549_v63 = vpop.permute.xlu1 %2548  ;;  %v8821_v53 = vld [vmem:[#allocation104_spill] sm:$0xff]  ;;  %v2878_v42 = vsel %vm2762_vm1, %v7149_v30, -inf  ;;  %v7186_v14 = vmax.f32 %v2824_v12, %v2825_v22  ;;  %v2868_v12 = vmax.f32 %v6998_v17, %v2867_v8  ;;  %v8834_v17 = vld [vmem:[#allocation150_spill] sm:$0xff] }
 0x3d7   :  { %8820 = vst [vmem:[#allocation204_spill] sm:$0xff] %v7170_v23  ;;  %3341 = vrot.lane.b32.xlu0 %v8821_v53, %s4203_s17  ;;  %v8822_v31 = vld [vmem:[#allocation136_spill] sm:$0xff]  ;;  %v7180_v52 = vsel %vm2762_vm1, %v2750_v15, -inf  ;;  %v2751_v5 = vadd.f32 %v2549_v63, %v8824_v4  ;;  %v8827_v15 = vld [vmem:[#allocation10_spill] sm:$0xff]  ;;  %v7202_v22 = vmax.f32 %v2835_v36, %v2836_v7  ;;  %v2879_v36 = vmax.f32 %v7000_v18, %v2878_v42  ;;  %v8835_v7 = vld [vmem:[#allocation249_spill] sm:$0xff] }
 0x3d8   :  { %8819 = vst [vmem:[#allocation40_spill] sm:$0xff] %v7168_v19  ;;  %v2738_v10 = vadd.f32 %v6886_v47, %v8822_v31  ;;  %8823 = vst [vmem:[#allocation205_spill] sm:$0xff] %v7180_v52  ;;  %v2551_v25 = vpop.permute.xlu0 %2550  ;;  %v2847_v47 = vsel %vm2762_vm1, %v2737_v16, -inf  ;;  %v2739_v31 = vadd.f32 %v6908_v44, %v8827_v15  ;;  %v2889_v62 = vsel %vm2762_vm1, %v7168_v19, -inf  ;;  %v8831_v16 = vld [vmem:[#allocation87_spill] sm:$0xff]  ;;  %v8842_v42 = vld [vmem:[#allocation21_spill] sm:$0xff] }
 0x3d9   :  { %8825 = vst [vmem:[#allocation41_spill] sm:$0xff] %v7186_v14  ;;  %3035 = vrot.lane.b32.xlu1 %v8826_v60, %s4202_s16  ;;  %v7196_v4 = vsel %vm2762_vm1, %v2751_v5, -inf  ;;  %v2752_v63 = vadd.f32 %v2551_v25, %v8829_v45  ;;  %8830 = vst [vmem:[#allocation43_spill] sm:$0xff] %v7202_v22  ;;  %v8832_v5 = vld [vmem:[#allocation135_spill] sm:$0xff]  ;;  %v7220_v53 = vmax.f32 %v2846_v57, %v2847_v47  ;;  %v8843_v47 = vld [vmem:[#allocation128_spill] sm:$0xff] }
 0x3da   :  { %8828 = vst [vmem:[#allocation206_spill] sm:$0xff] %v7196_v4  ;;  %v2553_v52 = vpop.permute.xlu1 %2552  ;;  %v2858_v44 = vsel %vm2762_vm1, %v2738_v10, -inf  ;;  %v2740_v15 = vadd.f32 %v6934_v48, %v8832_v5  ;;  %v8836_v45 = vld [vmem:[#allocation155_spill] sm:$0xff]  ;;  %v8839_v10 = vld [vmem:[#allocation64_spill] sm:$0xff]  ;;  %v2890_v57 = vmax.f32 %v7026_v46, %v2889_v62  ;;  %v8850_v62 = vld [vmem:[#allocation158_spill] sm:$0xff] }
 0x3db   :  { %3313 = vrot.lane.b32.xlu0 %v8831_v16, %s4203_s17  ;;  %v7212_v25 = vsel %vm2762_vm1, %v2752_v63, -inf  ;;  %v2753_v8 = vadd.f32 %v2553_v52, %v8834_v17  ;;  %v7218_v23 = vadd.f32 %v8836_v45, %v8835_v7  ;;  %8838 = vst [vmem:[#allocation44_spill] sm:$0xff] %v7220_v53  ;;  %v2869_v63 = vsel %vm2762_vm1, %v2739_v31, -inf  ;;  %v8840_v5 = vld [vmem:[#allocation11_spill] sm:$0xff]  ;;  %v8844_v7 = vld [vmem:[#allocation157_spill] sm:$0xff]  ;;  %v8847_v22 = vld [vmem:[#allocation76_spill] sm:$0xff] }
 0x3dc   :  { %8833 = vst [vmem:[#allocation42_spill] sm:$0xff] %v7212_v25  ;;  %v2555_v48 = vpop.permute.xlu0 %2554  ;;  %v2741_v52 = vadd.f32 %v6956_v0, %v8840_v5  ;;  %v7236_v45 = vadd.f32 %v8844_v7, %v8843_v47  ;;  %v7238_v4 = vmax.f32 %v2857_v11, %v2858_v44  ;;  %v2880_v0 = vsel %vm2762_vm1, %v2740_v15, -inf  ;;  %v8851_v44 = vld [vmem:[#allocation127_spill] sm:$0xff]  ;;  %v8855_v25 = vld [vmem:[#allocation61_spill] sm:$0xff]  ;;  %v8866_v53 = vld [vmem:[#allocation168_spill] sm:$0xff] }
 0x3dd   :  { %8837 = vst [vmem:[#allocation207_spill] sm:$0xff] %v7218_v23  ;;  %3037 = vrot.lane.b32.xlu1 %v8839_v10, %s4202_s16  ;;  %v7230_v18 = vsel %vm2762_vm1, %v2753_v8, -inf  ;;  %v2754_v17 = vadd.f32 %v2555_v48, %v8842_v42  ;;  %v8848_v8 = vld [vmem:[#allocation141_spill] sm:$0xff]  ;;  %v2900_v11 = vsel %vm2762_vm1, %v7218_v23, -inf  ;;  %v8852_v42 = vld [vmem:[#allocation159_spill] sm:$0xff]  ;;  %v7257_v7 = vmax.f32 %v2868_v12, %v2869_v63  ;;  %v8859_v63 = vld [vmem:[#allocation248_spill] sm:$0xff] }
 0x3de   :  { %8841 = vst [vmem:[#allocation208_spill] sm:$0xff] %v7230_v18  ;;  %8845 = vst [vmem:[#allocation209_spill] sm:$0xff] %v7236_v45  ;;  %v2557_v31 = vpop.permute.xlu1 %2556  ;;  %v2742_v48 = vadd.f32 %v6984_v49, %v8848_v8  ;;  %v7255_v47 = vadd.f32 %v8852_v42, %v8851_v44  ;;  %v8856_v8 = vld [vmem:[#allocation143_spill] sm:$0xff]  ;;  %v2911_v12 = vsel %vm2762_vm1, %v7236_v45, -inf  ;;  %v8860_v42 = vld [vmem:[#allocation24_spill] sm:$0xff] }
 0x3df   :  { %8846 = vst [vmem:[#allocation45_spill] sm:$0xff] %v7238_v4  ;;  %3285 = vrot.lane.b32.xlu0 %v8847_v22, %s4203_s17  ;;  %v7248_v46 = vsel %vm2762_vm1, %v2754_v17, -inf  ;;  %v2755_v5 = vadd.f32 %v2557_v31, %v8850_v62  ;;  %8854 = vst [vmem:[#allocation210_spill] sm:$0xff] %v7257_v7  ;;  %v2891_v17 = vsel %vm2762_vm1, %v2741_v52, -inf  ;;  %v2743_v31 = vadd.f32 %v7010_v40, %v8856_v8  ;;  %v8858_v18 = vld [vmem:[#allocation167_spill] sm:$0xff]  ;;  %v8925_v28 = vld [vmem:[#allocation120_spill] sm:$0xff] }
 0x3e0   :  { %8849 = vst [vmem:[#allocation47_spill] sm:$0xff] %v7248_v46  ;;  %8853 = vst [vmem:[#allocation46_spill] sm:$0xff] %v7255_v47  ;;  %v2559_v49 = vpop.permute.xlu0 %2558  ;;  %v7274_v15 = vadd.f32 %v8860_v42, %v8859_v63  ;;  %v7276_v46 = vmax.f32 %v2879_v36, %v2880_v0  ;;  %v8863_v40 = vld [vmem:[#allocation103_spill] sm:$0xff]  ;;  %v2901_v36 = vmax.f32 %v7028_v20, %v2900_v11  ;;  %v2922_v0 = vsel %vm2762_vm1, %v7255_v47, -inf  ;;  %v8871_v20 = vld [vmem:[#allocation160_spill] sm:$0xff] }
 0x3e1   :  { %3039 = vrot.lane.b32.xlu1 %v8855_v25, %s4202_s16  ;;  %v7267_v62 = vsel %vm2762_vm1, %v2755_v5, -inf  ;;  %v2756_v44 = vadd.f32 %v2559_v49, %v8858_v18  ;;  %v2902_v5 = vsel %vm2762_vm1, %v2742_v48, -inf  ;;  %v8864_v8 = vld [vmem:[#allocation139_spill] sm:$0xff]  ;;  %v7292_v42 = vmax.f32 %v2890_v57, %v2891_v17  ;;  %v8936_v19 = vld [vmem:[#allocation85_spill] sm:$0xff] }
 0x3e2   :  { %8857 = vst [vmem:[#allocation48_spill] sm:$0xff] %v7267_v62  ;;  %8861 = vst [vmem:[#allocation211_spill] sm:$0xff] %v7274_v15  ;;  %v2561_v4 = vpop.permute.xlu1 %2560  ;;  %v2744_v18 = vadd.f32 %v7036_v58, %v8864_v8  ;;  %v8868_v48 = vld [vmem:[#allocation63_spill] sm:$0xff]  ;;  %v2913_v58 = vsel %vm2762_vm1, %v2743_v31, -inf  ;;  %v8872_v57 = vmax.f32 %v6721_v13, %v6862_v59  ;;  %v2912_v17 = vmax.f32 %v7048_v34, %v2911_v12  ;;  %v8876_v13 = vld [vmem:[#allocation173_spill] sm:$0xff] }
 0x3e3   :  { %8862 = vst [vmem:[#allocation49_spill] sm:$0xff] %v7276_v46  ;;  %3345 = vrot.lane.b32.xlu0 %v8863_v40, %s4203_s17  ;;  %v7286_v49 = vsel %vm2762_vm1, %v2756_v44, -inf  ;;  %v2757_v63 = vadd.f32 %v2561_v4, %v8866_v53  ;;  %8867 = vst [vmem:[#allocation212_spill] sm:$0xff] %v7292_v42  ;;  %v8869_v44 = vld [vmem:[#allocation140_spill] sm:$0xff]  ;;  %v7310_v40 = vmax.f32 %v2901_v36, %v2902_v5  ;;  %v8899_v36 = vld [vmem:[#allocation77_spill] sm:$0xff] }
 0x3e4   :  { %8865 = vst [vmem:[#allocation93_spill] sm:$0xff] %v7286_v49  ;;  %v2563_v52 = vpop.permute.xlu0 %2562  ;;  %v2745_v8 = vadd.f32 %v7062_v32, %v8869_v44  ;;  %v2921_v11 = vmax.f32 %v8872_v57, %v7052_v56  ;;  %v8874_v32 = vld [vmem:[#allocation73_spill] sm:$0xff]  ;;  %v8877_v56 = vmax.f32 %v6752_v1, %v6878_v41  ;;  %v7327_v5 = vmax.f32 %v2912_v17, %v2913_v58  ;;  %v8880_v57 = vld [vmem:[#allocation196_spill] sm:$0xff]  ;;  %v8883_v1 = vld [vmem:[#allocation23_spill] sm:$0xff] }
 0x3e5   :  { %3041 = vrot.lane.b32.xlu1 %v8868_v48, %s4202_s16  ;;  %v7302_v53 = vsel %vm2762_vm1, %v2757_v63, -inf  ;;  %v2758_v4 = vadd.f32 %v2563_v52, %v8871_v20  ;;  %8873 = vst [vmem:[#allocation50_spill] sm:$0xff] %v7310_v40  ;;  %v2933_v63 = vsel %vm2762_vm1, %v7274_v15, -inf  ;;  %v2924_v52 = vsel %vm2762_vm1, %v2744_v18, -inf  ;;  %v8879_v20 = vld [vmem:[#allocation66_spill] sm:$0xff]  ;;  %v8927_v15 = vld [vmem:[#allocation116_spill] sm:$0xff] }
 0x3e6   :  { %8870 = vst [vmem:[#allocation51_spill] sm:$0xff] %v7302_v53  ;;  %v2565_v49 = vpop.permute.xlu1 %2564  ;;  %v2932_v34 = vmax.f32 %v8877_v56, %v7056_v39  ;;  %v2923_v12 = vmax.f32 %v2921_v11, %v2922_v0  ;;  %8878 = vst [vmem:[#allocation216_spill] sm:$0xff] %v7327_v5  ;;  %v8885_v17 = vld [vmem:[#allocation106_spill] sm:$0xff]  ;;  %v8917_v53 = vld [vmem:[#allocation81_spill] sm:$0xff] }
 0x3e7   :  { %3287 = vrot.lane.b32.xlu0 %v8874_v32, %s4203_s17  ;;  %v7320_v44 = vsel %vm2762_vm1, %v2758_v4, -inf  ;;  %v2759_v59 = vadd.f32 %v2565_v49, %v8876_v13  ;;  %v8881_v4 = vld [vmem:[#allocation83_spill] sm:$0xff]  ;;  %v2935_v49 = vsel %vm2762_vm1, %v2745_v8, -inf  ;;  %v8921_v46 = vld [vmem:[#allocation118_spill] sm:$0xff] }
 0x3e8   :  { %8875 = vst [vmem:[#allocation213_spill] sm:$0xff] %v7320_v44  ;;  %v2567_v18 = vpop.permute.xlu0 %2566  ;;  %v2361_v32 = vadd.f32 %v8881_v4, %v8880_v57  ;;  %v2934_v39 = vmax.f32 %v2932_v34, %v2933_v63  ;;  %v7340_v0 = vmax.f32 %v2923_v12, %v2924_v52  ;;  %v8888_v63 = vld [vmem:[#allocation68_spill] sm:$0xff]  ;;  %v8913_v44 = vld [vmem:[#allocation111_spill] sm:$0xff] }
 0x3e9   :  { %3043 = vrot.lane.b32.xlu1 %v8879_v20, %s4202_s16  ;;  %v7337_v13 = vsel %vm2762_vm1, %v2759_v59, -inf  ;;  %v2760_v41 = vadd.f32 %v2567_v18, %v8883_v1  ;;  %v8890_v18 = vld [vmem:[#allocation75_spill] sm:$0xff]  ;;  %v8892_v1 = vld [vmem:[#allocation108_spill] sm:$0xff] }
 0x3ea   :  { %8882 = vst [vmem:[#allocation217_spill] sm:$0xff] %v7337_v13  ;;  %8884 = vst [vmem:[#allocation52_spill] sm:$0xff] %v7340_v0  ;;  %v2569_v11 = vpop.permute.xlu1 %2568  ;;  %v7349_v8 = vmax.f32 %v2934_v39, %v2935_v49  ;;  %v8896_v34 = vld [vmem:[#allocation72_spill] sm:$0xff]  ;;  %v8909_v13 = vld [vmem:[#allocation109_spill] sm:$0xff] }
 0x3eb   :  { %3347 = vrot.lane.b32.xlu0 %v8885_v17, %s4203_s17  ;;  %v7347_v56 = vsel %vm2762_vm1, %v2760_v41, -inf  ;;  %v2761_v57 = vadd.f32 %v2569_v11, %v2361_v32  ;;  %v8891_v32 = vld [vmem:[#allocation65_spill] sm:$0xff]  ;;  %v8893_v41 = vld [vmem:[#allocation67_spill] sm:$0xff]  ;;  %v8894_v11 = vld [vmem:[#allocation78_spill] sm:$0xff] }
 0x3ec   :  { %8886 = vst [vmem:[#allocation214_spill] sm:$0xff] %v7347_v56  ;;  %8887 = vst [vmem:[#allocation215_spill] sm:$0xff] %v7349_v8  ;;  %v8897_v59 = vld [vmem:[#allocation80_spill] sm:$0xff] }
 0x3ed   :  { %3045 = vrot.lane.b32.xlu1 %v8888_v63, %s4202_s16  ;;  %v7356_v52 = vsel %vm2762_vm1, %v2761_v57, -inf  ;;  %v8895_v57 = vld [vmem:[#allocation105_spill] sm:$0xff]  ;;  %v8904_v8 = vld [vmem:[#allocation112_spill] sm:$0xff] }
 0x3ee   :  { %8889 = vst [vmem:[#allocation218_spill] sm:$0xff] %v7356_v52  ;;  %v7360_v12 = vpop.permute.xlu1 %2987 }
 0x3ef   :  { %3289 = vrot.lane.b32.xlu0 %v8890_v18, %s4203_s17 }
 0x3f1   :  { %3047 = vrot.lane.b32.xlu1 %v8891_v32, %s4202_s16 }
 0x3f2   :  { %v7366_v49 = vpop.permute.xlu1 %2989 }
 0x3f3   :  { %3349 = vrot.lane.b32.xlu0 %v8892_v1, %s4203_s17 }
 0x3f5   :  { %3049 = vrot.lane.b32.xlu1 %v8893_v41, %s4202_s16 }
 0x3f6   :  { %v7372_v39 = vpop.permute.xlu1 %2991 }
 0x3f7   :  { %3291 = vrot.lane.b32.xlu0 %v8894_v11, %s4203_s17 }
 0x3f9   :  { %3051 = vrot.lane.b32.xlu1 %v8770_v9, %s4202_s16  ;;  %v8898_v9 = vld [vmem:[#allocation107_spill] sm:$0xff] }
 0x3fa   :  { %v7378_v17 = vpop.permute.xlu1 %2993 }
 0x3fb   :  { %3351 = vrot.lane.b32.xlu0 %v8895_v57, %s4203_s17  ;;  %v7396_v57 = vpop.permute.xlu0 %3033 }
 0x3fd   :  { %3053 = vrot.lane.b32.xlu1 %v8896_v34, %s4202_s16 }
 0x3fe   :  { %v7384_v1 = vpop.permute.xlu1 %2995 }
 0x3ff   :  { %3293 = vrot.lane.b32.xlu0 %v8897_v59, %s4203_s17  ;;  %v7408_v52 = vpop.permute.xlu0 %3055 }
 0x401   :  { %3057 = vrot.lane.b32.xlu1 %v8805_v24, %s4202_s16  ;;  %v8900_v24 = vld [vmem:[#allocation110_spill] sm:$0xff] }
 0x402   :  { %v7390_v11 = vpop.permute.xlu1 %2997 }
 0x403   :  { %3353 = vrot.lane.b32.xlu0 %v8898_v9, %s4203_s17  ;;  %v8902_v9 = vld [vmem:[#allocation79_spill] sm:$0xff] }
 0x405   :  { %3061 = vrot.lane.b32.xlu1 %v8847_v22, %s4202_s16 }
 0x406   :  { %v7398_v58 = vpop.permute.xlu1 %2999 }
 0x407   :  { %3295 = vrot.lane.b32.xlu0 %v8899_v36, %s4203_s17  ;;  %v7418_v36 = vpop.permute.xlu0 %3059 }
 0x409   :  { %3065 = vrot.lane.b32.xlu1 %v8890_v18, %s4202_s16 }
 0x40a   :  { %v7404_v31 = vpop.permute.xlu1 %3001 }
 0x40b   :  { %3355 = vrot.lane.b32.xlu0 %v8900_v24, %s4203_s17  ;;  %v8905_v24 = vld [vmem:[#allocation84_spill] sm:$0xff]  ;;  %v7430_v0 = vpop.permute.xlu0 %3063 }
 0x40d   :  { %3069 = vrot.lane.b32.xlu1 %v8897_v59, %s4202_s16  ;;  %v8907_v59 = vld [vmem:[#allocation82_spill] sm:$0xff] }
 0x40e   :  { %v7412_v22 = vpop.permute.xlu1 %3003 }
 0x40f   :  { %8901 = vst [vmem:[#allocation219_spill] sm:$0xff] %v7412_v22  ;;  %3297 = vrot.lane.b32.xlu0 %v8902_v9, %s4203_s17 }
 0x411   :  { %3073 = vrot.lane.b32.xlu1 %v8902_v9, %s4202_s16 }
 0x412   :  { %v7420_v18 = vpop.permute.xlu1 %3005 }
 0x413   :  { %8903 = vst [vmem:[#allocation220_spill] sm:$0xff] %v7420_v18  ;;  %3357 = vrot.lane.b32.xlu0 %v8904_v8, %s4203_s17  ;;  %v7440_v8 = vpop.permute.xlu0 %3067 }
 0x414   :  { %8910 = vst [vmem:[#allocation222_spill] sm:$0xff] %v7440_v8  ;;  %v8961_v8 = vld [vmem:[#allocation142_spill] sm:$0xff] }
 0x415   :  { %3077 = vrot.lane.b32.xlu1 %v8905_v24, %s4202_s16 }
 0x416   :  { %v7426_v56 = vpop.permute.xlu1 %3007 }
 0x417   :  { %8906 = vst [vmem:[#allocation98_spill] sm:$0xff] %v7426_v56  ;;  %3299 = vrot.lane.b32.xlu0 %v8907_v59, %s4203_s17  ;;  %v7452_v40 = vpop.permute.xlu0 %3071  ;;  %v8951_v56 = vld [vmem:[#allocation94_spill] sm:$0xff] }
 0x418   :  { %8914 = vst [vmem:[#allocation97_spill] sm:$0xff] %v7452_v40  ;;  %v8941_v40 = vld [vmem:[#allocation101_spill] sm:$0xff] }
 0x419   :  { %3081 = vrot.lane.b32.xlu1 %v8881_v4, %s4202_s16 }
 0x41a   :  { %v7434_v9 = vpop.permute.xlu1 %3009 }
 0x41b   :  { %8908 = vst [vmem:[#allocation221_spill] sm:$0xff] %v7434_v9  ;;  %3359 = vrot.lane.b32.xlu0 %v8909_v13, %s4203_s17  ;;  %v8915_v13 = vld [vmem:[#allocation92_spill] sm:$0xff]  ;;  %v7462_v42 = vpop.permute.xlu0 %3075  ;;  %v8938_v9 = vld [vmem:[#allocation74_spill] sm:$0xff] }
 0x41c   :  { %8919 = vst [vmem:[#allocation226_spill] sm:$0xff] %v7462_v42  ;;  %v8933_v42 = vld [vmem:[#allocation102_spill] sm:$0xff] }
 0x41d   :  { %3085 = vrot.lane.b32.xlu1 %v8789_v61, %s4202_s16 }
 0x41e   :  { %v7442_v5 = vpop.permute.xlu1 %3011 }
 0x41f   :  { %8911 = vst [vmem:[#allocation223_spill] sm:$0xff] %v7442_v5  ;;  %3301 = vrot.lane.b32.xlu0 %v8905_v24, %s4203_s17  ;;  %v8918_v24 = vld [vmem:[#allocation91_spill] sm:$0xff]  ;;  %v7474_v7 = vpop.permute.xlu0 %3079 }
 0x420   :  { %8923 = vst [vmem:[#allocation22_spill] sm:$0xff] %v7474_v7 }
 0x421   :  { %3089 = vrot.lane.b32.xlu1 %v8831_v16, %s4202_s16 }
 0x422   :  { %v7448_v59 = vpop.permute.xlu1 %3013 }
 0x423   :  { %8912 = vst [vmem:[#allocation224_spill] sm:$0xff] %v7448_v59  ;;  %3361 = vrot.lane.b32.xlu0 %v8913_v44, %s4203_s17  ;;  %v8922_v44 = vld [vmem:[#allocation96_spill] sm:$0xff]  ;;  %v7484_v2 = vpop.permute.xlu0 %3083  ;;  %v8930_v59 = vld [vmem:[#allocation69_spill] sm:$0xff] }
 0x425   :  { %3093 = vrot.lane.b32.xlu1 %v8915_v13, %s4202_s16 }
 0x426   :  { %v7456_v61 = vpop.permute.xlu1 %3015 }
 0x427   :  { %8916 = vst [vmem:[#allocation225_spill] sm:$0xff] %v7456_v61  ;;  %3303 = vrot.lane.b32.xlu0 %v8917_v53, %s4203_s17  ;;  %v8924_v53 = vld [vmem:[#allocation95_spill] sm:$0xff]  ;;  %v7494_v47 = vpop.permute.xlu0 %3087 }
 0x429   :  { %3097 = vrot.lane.b32.xlu1 %v8918_v24, %s4202_s16 }
 0x42a   :  { %v7464_v16 = vpop.permute.xlu1 %3017 }
 0x42b   :  { %8920 = vst [vmem:[#allocation227_spill] sm:$0xff] %v7464_v16  ;;  %3363 = vrot.lane.b32.xlu0 %v8921_v46, %s4203_s17  ;;  %v8926_v46 = vld [vmem:[#allocation100_spill] sm:$0xff]  ;;  %v7502_v7 = vpop.permute.xlu0 %3091 }
 0x42d   :  { %3101 = vrot.lane.b32.xlu1 %v8922_v44, %s4202_s16 }
 0x42e   :  { %v7470_v62 = vpop.permute.xlu1 %3019 }
 0x42f   :  { %3305 = vrot.lane.b32.xlu0 %v8881_v4, %s4203_s17  ;;  %v8928_v4 = vld [vmem:[#allocation99_spill] sm:$0xff]  ;;  %v7510_v45 = vpop.permute.xlu0 %3095 }
 0x431   :  { %3105 = vrot.lane.b32.xlu1 %v8924_v53, %s4202_s16 }
 0x432   :  { %v7478_v14 = vpop.permute.xlu1 %3021 }
 0x433   :  { %3365 = vrot.lane.b32.xlu0 %v8925_v28, %s4203_s17 }
 0x435   :  { %3109 = vrot.lane.b32.xlu1 %v8926_v46, %s4202_s16 }
 0x436   :  { %v7486_v3 = vpop.permute.xlu1 %3023 }
 0x437   :  { %3367 = vrot.lane.b32.xlu0 %v8927_v15, %s4203_s17 }
 0x439   :  { %3113 = vrot.lane.b32.xlu1 %v8928_v4, %s4202_s16 }
 0x43b   :  { %v7492_v16 = vpop.permute.xlu1 %3025 }
 0x43d   :  { %3245 = vrot.lane.b32.xlu1 %v8746_v38, %s4203_s17 }
 0x43f   :  { %v7498_v28 = vpop.permute.xlu1 %3027 }
 0x441   :  { %3249 = vrot.lane.b32.xlu1 %v8778_v37, %s4203_s17  ;;  %v7518_v37 = vpop.permute.xlu0 %3099 }
 0x442   :  { %8931 = vst [vmem:[#allocation163_spill] sm:$0xff] %v7518_v37 }
 0x443   :  { %v7504_v61 = vpop.permute.xlu1 %3029 }
 0x445   :  { %3253 = vrot.lane.b32.xlu1 %v8797_v21, %s4203_s17  ;;  %v7526_v5 = vpop.permute.xlu0 %3103 }
 0x446   :  { %8935 = vst [vmem:[#allocation230_spill] sm:$0xff] %v7526_v5  ;;  %v8944_v5 = vld [vmem:[#allocation90_spill] sm:$0xff] }
 0x447   :  { %v7508_v15 = vpop.permute.xlu1 %3031 }
 0x449   :  { %3277 = vrot.lane.b32.xlu1 %v8896_v34, %s4203_s17 }
 0x44b   :  { %v7514_v38 = vpop.permute.xlu1 %3035 }
 0x44c   :  { %8929 = vst [vmem:[#allocation228_spill] sm:$0xff] %v7514_v38  ;;  %v3180_v38 = vadd.f32 %v7366_v49, %v8961_v8  ;;  %v8967_v8 = vld [vmem:[#allocation13_spill] sm:$0xff] }
 0x44d   :  { %3279 = vrot.lane.b32.xlu1 %v8930_v59, %s4203_s17  ;;  %v7534_v59 = vpop.permute.xlu0 %3107 }
 0x44e   :  { %8939 = vst [vmem:[#allocation156_spill] sm:$0xff] %v7534_v59 }
 0x44f   :  { %v7520_v23 = vpop.permute.xlu1 %3037 }
 0x450   :  { %8932 = vst [vmem:[#allocation229_spill] sm:$0xff] %v7520_v23 }
 0x451   :  { %3339 = vrot.lane.b32.xlu1 %v8933_v42, %s4203_s17 }
 0x453   :  { %v7524_v21 = vpop.permute.xlu1 %3039 }
 0x454   :  { %8934 = vst [vmem:[#allocation54_spill] sm:$0xff] %v7524_v21  ;;  %v7542_v21 = vpop.permute.xlu0 %3111 }
 0x455   :  { %3311 = vrot.lane.b32.xlu1 %v8936_v19, %s4203_s17  ;;  %8943 = vst [vmem:[#allocation233_spill] sm:$0xff] %v7542_v21  ;;  %v8947_v21 = vld [vmem:[#allocation59_spill] sm:$0xff] }
 0x457   :  { %v7530_v34 = vpop.permute.xlu1 %3041 }
 0x458   :  { %8937 = vst [vmem:[#allocation231_spill] sm:$0xff] %v7530_v34 }
 0x459   :  { %3283 = vrot.lane.b32.xlu1 %v8938_v9, %s4203_s17  ;;  %v7550_v9 = vpop.permute.xlu0 %3243 }
 0x45b   :  { %v7536_v30 = vpop.permute.xlu1 %3043 }
 0x45c   :  { %8940 = vst [vmem:[#allocation164_spill] sm:$0xff] %v7536_v30 }
 0x45d   :  { %3343 = vrot.lane.b32.xlu1 %v8941_v40, %s4203_s17 }
 0x45f   :  { %v7540_v42 = vpop.permute.xlu1 %3045 }
 0x460   :  { %8942 = vst [vmem:[#allocation232_spill] sm:$0xff] %v7540_v42  ;;  %v7558_v42 = vpop.permute.xlu0 %3247 }
 0x461   :  { %3315 = vrot.lane.b32.xlu1 %v8944_v5, %s4203_s17 }
 0x463   :  { %v7546_v19 = vpop.permute.xlu1 %3047 }
 0x464   :  { %8945 = vst [vmem:[#allocation234_spill] sm:$0xff] %v7546_v19  ;;  %v8948_v19 = vld [vmem:[#allocation89_spill] sm:$0xff]  ;;  %v7564_v30 = vpop.permute.xlu0 %3251 }
 0x465   :  { %3255 = vrot.lane.b32.xlu1 %v8813_v35, %s4203_s17 }
 0x467   :  { %v7552_v59 = vpop.permute.xlu1 %3049 }
 0x468   :  { %8946 = vst [vmem:[#allocation53_spill] sm:$0xff] %v7552_v59 }
 0x469   :  { %3317 = vrot.lane.b32.xlu1 %v8915_v13, %s4203_s17  ;;  %v3276_v13 = vpop.permute.xlu0 %3275 }
 0x46b   :  { %v7556_v40 = vpop.permute.xlu1 %3051 }
 0x46d   :  { %3257 = vrot.lane.b32.xlu1 %v8947_v21, %s4203_s17  ;;  %v7576_v21 = vpop.permute.xlu0 %3307 }
 0x46f   :  { %v3054_v5 = vpop.permute.xlu1 %3053 }
 0x471   :  { %3319 = vrot.lane.b32.xlu1 %v8948_v19, %s4203_s17 }
 0x473   :  { %v3058_v35 = vpop.permute.xlu1 %3057 }
 0x474   :  { %v3214_v22 = vadd.f32 %v3058_v35, %v6850_v55  ;;  %v3179_v55 = vadd.f32 %v7360_v12, %v8967_v8 }
 0x475   :  { %3259 = vrot.lane.b32.xlu1 %v8826_v60, %s4203_s17  ;;  %v3310_v60 = vpop.permute.xlu0 %3309 }
 0x477   :  { %v7568_v59 = vpop.permute.xlu1 %3061 }
 0x479   :  { %3321 = vrot.lane.b32.xlu1 %v8918_v24, %s4203_s17  ;;  %v3282_v24 = vpop.permute.xlu0 %3281 }
 0x47b   :  { %v7572_v34 = vpop.permute.xlu1 %3065 }
 0x47c   :  { %8949 = vst [vmem:[#allocation235_spill] sm:$0xff] %v7572_v34 }
 0x47d   :  { %3261 = vrot.lane.b32.xlu1 %v8839_v10, %s4203_s17  ;;  %v3342_v18 = vpop.permute.xlu0 %3341 }
 0x47f   :  { %v7578_v19 = vpop.permute.xlu1 %3069 }
 0x480   :  { %8950 = vst [vmem:[#allocation236_spill] sm:$0xff] %v7578_v19 }
 0x481   :  { %3323 = vrot.lane.b32.xlu1 %v8951_v56, %s4203_s17 }
 0x483   :  { %v7582_v51 = vpop.permute.xlu1 %3073 }
 0x484   :  { %8952 = vst [vmem:[#allocation56_spill] sm:$0xff] %v7582_v51 }
 0x485   :  { %3263 = vrot.lane.b32.xlu1 %v8855_v25, %s4203_s17  ;;  %v3314_v25 = vpop.permute.xlu0 %3313 }
 0x487   :  { %v7586_v23 = vpop.permute.xlu1 %3077 }
 0x488   :  { %8953 = vst [vmem:[#allocation237_spill] sm:$0xff] %v7586_v23 }
 0x489   :  { %3325 = vrot.lane.b32.xlu1 %v8922_v44, %s4203_s17 }
 0x48b   :  { %v7590_v10 = vpop.permute.xlu1 %3081 }
 0x48c   :  { %8954 = vst [vmem:[#allocation238_spill] sm:$0xff] %v7590_v10  ;;  %v7604_v10 = vpop.permute.xlu0 %3285 }
 0x48d   :  { %3265 = vrot.lane.b32.xlu1 %v8868_v48, %s4203_s17 }
 0x48f   :  { %v3086_v19 = vpop.permute.xlu1 %3085 }
 0x491   :  { %3327 = vrot.lane.b32.xlu1 %v8687_v6, %s4203_s17  ;;  %v3346_v6 = vpop.permute.xlu0 %3345 }
 0x493   :  { %v3090_v56 = vpop.permute.xlu1 %3089 }
 0x495   :  { %3267 = vrot.lane.b32.xlu1 %v8879_v20, %s4203_s17 }
 0x497   :  { %v7598_v23 = vpop.permute.xlu1 %3093 }
 0x499   :  { %3329 = vrot.lane.b32.xlu1 %v8924_v53, %s4203_s17  ;;  %v7618_v53 = vpop.permute.xlu0 %3287 }
 0x49b   :  { %v7602_v44 = vpop.permute.xlu1 %3097 }
 0x49c   :  { %8955 = vst [vmem:[#allocation58_spill] sm:$0xff] %v7602_v44 }
 0x49d   :  { %3269 = vrot.lane.b32.xlu1 %v8888_v63, %s4203_s17  ;;  %v7626_v63 = vpop.permute.xlu0 %3347 }
 0x49f   :  { %v7608_v48 = vpop.permute.xlu1 %3101 }
 0x4a0   :  { %8956 = vst [vmem:[#allocation239_spill] sm:$0xff] %v7608_v48  ;;  %v3198_v48 = vadd.f32 %v7492_v16, %v6660_v50  ;;  %v8963_v16 = vld [vmem:[#allocation166_spill] sm:$0xff] }
 0x4a1   :  { %3331 = vrot.lane.b32.xlu1 %v8706_v54, %s4203_s17  ;;  %v7634_v43 = vpop.permute.xlu0 %3289 }
 0x4a3   :  { %v7612_v20 = vpop.permute.xlu1 %3105 }
 0x4a4   :  { %8957 = vst [vmem:[#allocation115_spill] sm:$0xff] %v7612_v20 }
 0x4a5   :  { %3271 = vrot.lane.b32.xlu1 %v8891_v32, %s4203_s17  ;;  %v8960_v32 = vld [vmem:[#allocation12_spill] sm:$0xff]  ;;  %v7657_v35 = vpop.permute.xlu0 %3349 }
 0x4a7   :  { %v7616_v51 = vpop.permute.xlu1 %3109 }
 0x4a8   :  { %8958 = vst [vmem:[#allocation242_spill] sm:$0xff] %v7616_v51  ;;  %v3182_v51 = vadd.f32 %v7378_v17, %v8960_v32  ;;  %v8962_v17 = vld [vmem:[#allocation174_spill] sm:$0xff]  ;;  %v3196_v32 = vadd.f32 %v7478_v14, %v8963_v16  ;;  %v3470_v16 = vadd.f32 %v3314_v25, %v3214_v22 }
 0x4a9   :  { %3333 = vrot.lane.b32.xlu1 %v8926_v46, %s4203_s17  ;;  %v3195_v50 = vadd.f32 %v7470_v62, %v8962_v17  ;;  %v7667_v25 = vpop.permute.xlu0 %3291 }
 0x4aa   :  { %v3524_v22 = vsel %vm3499_vm10, %v3470_v16, -inf  ;;  %v8971_v16 = vld [vmem:[#allocation192_spill] sm:$0xff] }
 0x4ab   :  { %v7622_v37 = vpop.permute.xlu1 %3113 }
 0x4ac   :  { %8959 = vst [vmem:[#allocation117_spill] sm:$0xff] %v7622_v37 }
 0x4ad   :  { %3273 = vrot.lane.b32.xlu1 %v8893_v41, %s4203_s17  ;;  %v3454_v41 = vadd.f32 %v3282_v24, %v3198_v48  ;;  %v8966_v48 = vld [vmem:[#allocation190_spill] sm:$0xff] }
 0x4af   :  { %v3246_v54 = vpop.permute.xlu1 %3245  ;;  %v3522_v62 = vsel %vm3499_vm10, %v3454_v41, -inf }
 0x4b0   :  { %v3436_v49 = vadd.f32 %v3246_v54, %v3180_v38 }
 0x4b1   :  { %3335 = vrot.lane.b32.xlu1 %v8715_v26, %s4203_s17  ;;  %v3212_v26 = vadd.f32 %v3054_v5, %v6838_v27  ;;  %v3451_v5 = vadd.f32 %v3276_v13, %v3195_v50 }
 0x4b3   :  { %v3250_v20 = vpop.permute.xlu1 %3249  ;;  %v3468_v17 = vadd.f32 %v3310_v60, %v3212_v26  ;;  %v3501_v50 = vsel %vm3499_vm10, %v3451_v5, -inf }
 0x4b4   :  { %v3438_v46 = vadd.f32 %v3250_v20, %v3182_v51  ;;  %v8965_v51 = vld [vmem:[#allocation178_spill] sm:$0xff]  ;;  %v3228_v20 = vadd.f32 %v3086_v19, %v8966_v48 }
 0x4b5   :  { %3337 = vrot.lane.b32.xlu1 %v8928_v4, %s4203_s17  ;;  %v8964_v4 = vld [vmem:[#allocation119_spill] sm:$0xff]  ;;  %v3211_v24 = vadd.f32 %v7556_v40, %v8965_v51  ;;  %v3435_v40 = vadd.f32 %v7550_v9, %v3179_v55  ;;  %v3510_v60 = vsel %vm3499_vm10, %v3468_v17, -inf  ;;  %v8970_v55 = vld [vmem:[#allocation25_spill] sm:$0xff] }
 0x4b6   :  { %v3521_v27 = vsel %vm3499_vm10, %v3438_v46, -inf  ;;  %v3484_v54 = vadd.f32 %v3342_v18, %v3228_v20  ;;  %v3507_v46 = vsel %vm3499_vm10, %v3436_v49, -inf  ;;  %v3197_v5 = vadd.f32 %v7486_v3, %v8970_v55 }
 0x4b7   :  { %v7638_v37 = vpop.permute.xlu1 %3253  ;;  %v3523_v19 = vmax.f32 %v3521_v27, %v3522_v62  ;;  %v3467_v38 = vadd.f32 %v7576_v21, %v3211_v24  ;;  %v3500_v21 = vsel %vm3499_vm10, %v3435_v40, -inf  ;;  %v7678_v62 = vpop.permute.xlu0 %3351  ;;  %v8972_v40 = vld [vmem:[#allocation137_spill] sm:$0xff] }
 0x4b8   :  { %v3512_v51 = vsel %vm3499_vm10, %v3484_v54, -inf  ;;  %v3502_v24 = vmax.f32 %v3500_v21, %v3501_v50  ;;  %v8973_v50 = vld [vmem:[#allocation170_spill] sm:$0xff] }
 0x4b9   :  { %3369 = vrot.lane.b32.xlu1 %v8964_v4, %s4203_s17  ;;  %v8968_v4 = vld [vmem:[#allocation33_spill] sm:$0xff]  ;;  %v3525_v9 = vmax.f32 %v3523_v19, %v3524_v22  ;;  %v3181_v19 = vadd.f32 %v7372_v39, %v8972_v40 }
 0x4ba   :  { %v3230_v34 = vadd.f32 %v3090_v56, %v8968_v4  ;;  %v3213_v4 = vadd.f32 %v7408_v52, %v8971_v16  ;;  %v8974_v52 = vld [vmem:[#allocation149_spill] sm:$0xff] }
 0x4bb   :  { %v3278_v14 = vpop.permute.xlu1 %3277  ;;  %v7693_v39 = vpop.permute.xlu0 %3293 }
 0x4bc   :  { %v3452_v44 = vadd.f32 %v3278_v14, %v3196_v32  ;;  %v3486_v56 = vadd.f32 %v3346_v6, %v3230_v34  ;;  %v8969_v32 = vld [vmem:[#allocation189_spill] sm:$0xff] }
 0x4bd   :  { %v3227_v18 = vadd.f32 %v7484_v2, %v8969_v32 }
 0x4be   :  { %v3508_v12 = vsel %vm3499_vm10, %v3452_v44, -inf  ;;  %v3503_v44 = vsel %vm3499_vm10, %v3467_v38, -inf  ;;  %v3526_v49 = vsel %vm3499_vm10, %v3486_v56, -inf  ;;  %v3183_v56 = vadd.f32 %v7384_v1, %v8974_v52  ;;  %v8977_v1 = vld [vmem:[#allocation195_spill] sm:$0xff] }
 0x4bf   :  { %v3509_v13 = vmax.f32 %v3507_v46, %v3508_v12  ;;  %v3280_v41 = vpop.permute.xlu1 %3279  ;;  %v3527_v34 = vmax.f32 %v3525_v9, %v3526_v49  ;;  %v3504_v6 = vmax.f32 %v3502_v24, %v3503_v44  ;;  %v3437_v12 = vadd.f32 %v7558_v42, %v3181_v19  ;;  %v8976_v24 = vld [vmem:[#allocation181_spill] sm:$0xff] }
 0x4c0   :  { %v3453_v38 = vadd.f32 %v3280_v41, %v3197_v5  ;;  %v8975_v41 = vld [vmem:[#allocation193_spill] sm:$0xff]  ;;  %v3439_v44 = vadd.f32 %v7564_v30, %v3183_v56 }
 0x4c1   :  { %v3511_v26 = vmax.f32 %v3509_v13, %v3510_v60  ;;  %v3615_v46 = vmax.f32 %v3527_v34, 0.0  ;;  %v3199_v60 = vadd.f32 %v7498_v28, %v8973_v50  ;;  %v3229_v9 = vadd.f32 %v7494_v47, %v8975_v41 }
 0x4c2   :  { %v3515_v22 = vsel %vm3499_vm10, %v3453_v38, -inf  ;;  %v3514_v42 = vsel %vm3499_vm10, %v3437_v12, -inf  ;;  %v3528_v30 = vsel %vm3499_vm10, %v3439_v44, -inf }
 0x4c3   :  { %v3513_v48 = vmax.f32 %v3511_v26, %v3512_v51  ;;  %v3340_v20 = vpop.permute.xlu1 %3339 }
 0x4c4   :  { %v3483_v27 = vadd.f32 %v3340_v20, %v3227_v18  ;;  %v3516_v18 = vmax.f32 %v3514_v42, %v3515_v22  ;;  %v3231_v20 = vadd.f32 %v7502_v7, %v8977_v1  ;;  %v8985_v1 = vld [vmem:[#allocation147_spill] sm:$0xff] }
 0x4c5   :  { %v3613_v8 = vmax.f32 %v3513_v48, 0.0  ;;  %v3215_v48 = vadd.f32 %v7418_v36, %v8976_v24 }
 0x4c6   :  { %v3505_v2 = vsel %vm3499_vm10, %v3483_v27, -inf  ;;  %v7706_v27 = vpop.permute.xlu0 %3353  ;;  %v3487_v5 = vadd.f32 %v7626_v63, %v3231_v20  ;;  %v3186_v20 = vadd.f32 %v7404_v31, %v8985_v1 }
 0x4c7   :  { %v3506_v14 = vmax.f32 %v3504_v6, %v3505_v2  ;;  %v3312_v17 = vpop.permute.xlu1 %3311  ;;  %3646 = vrot.lane.b32.xlu1 %v3613_v8, %s4202_s16  ;;  %v8978_v8 = vld [vmem:[#allocation162_spill] sm:$0xff] }
 0x4c8   :  { %v3469_v3 = vadd.f32 %v3312_v17, %v3213_v4  ;;  %v3184_v55 = vadd.f32 %v7390_v11, %v8978_v8  ;;  %v8979_v17 = vld [vmem:[#allocation27_spill] sm:$0xff]  ;;  %v3533_v38 = vsel %vm3499_vm10, %v3487_v5, -inf }
 0x4c9   :  { %v3612_v54 = vmax.f32 %v3506_v14, 0.0  ;;  %v3200_v7 = vadd.f32 %v7504_v61, %v8979_v17  ;;  %v8989_v17 = vld [vmem:[#allocation235_spill] sm:$0xff] }
 0x4ca   :  { %v3517_v26 = vsel %vm3499_vm10, %v3469_v3, -inf  ;;  %v3440_v16 = vadd.f32 %v7638_v37, %v3184_v55  ;;  %v8981_v3 = vld [vmem:[#allocation29_spill] sm:$0xff] }
 0x4cb   :  { %v3284_v13 = vpop.permute.xlu1 %3283  ;;  %3644 = vrot.lane.b32.xlu0 %v3612_v54, %s4202_s16  ;;  %3650 = vrot.lane.b32.xlu1 %v3615_v46, %s4202_s16  ;;  %v3518_v51 = vmax.f32 %v3516_v18, %v3517_v26  ;;  %v3456_v11 = vadd.f32 %v7604_v10, %v3200_v7  ;;  %v8980_v54 = vld [vmem:[#allocation34_spill] sm:$0xff]  ;;  %v7721_v46 = vpop.permute.xlu0 %3295  ;;  %v3216_v61 = vadd.f32 %v7568_v59, %v8981_v3  ;;  %v8993_v3 = vld [vmem:[#allocation228_spill] sm:$0xff] }
 0x4cc   :  { %v3455_v32 = vadd.f32 %v3284_v13, %v3199_v60  ;;  %v3232_v63 = vadd.f32 %v7598_v23, %v8980_v54  ;;  %v3535_v37 = vsel %vm3499_vm10, %v3440_v16, -inf  ;;  %v8982_v60 = vld [vmem:[#allocation145_spill] sm:$0xff]  ;;  %v8983_v23 = vld [vmem:[#allocation180_spill] sm:$0xff] }
 0x4cd   :  { %v3185_v22 = vadd.f32 %v7398_v58, %v8982_v60  ;;  %v3536_v10 = vsel %vm3499_vm10, %v3456_v11, -inf  ;;  %v8991_v11 = vld [vmem:[#allocation219_spill] sm:$0xff] }
 0x4ce   :  { %v3529_v49 = vsel %vm3499_vm10, %v3455_v32, -inf  ;;  %v3488_v52 = vadd.f32 %v7657_v35, %v3232_v63  ;;  %v3537_v41 = vmax.f32 %v3535_v37, %v3536_v10 }
 0x4cf   :  { %v3344_v21 = vpop.permute.xlu1 %3343  ;;  %v3530_v36 = vmax.f32 %v3528_v30, %v3529_v49  ;;  %v3356_v26 = vpop.permute.xlu0 %3355 }
 0x4d0   :  { %v3485_v28 = vadd.f32 %v3344_v21, %v3229_v9  ;;  %v3201_v9 = vadd.f32 %v7508_v15, %v8983_v23  ;;  %v3540_v58 = vsel %vm3499_vm10, %v3488_v52, -inf }
 0x4d2   :  { %v3519_v47 = vsel %vm3499_vm10, %v3485_v28, -inf  ;;  %v3457_v21 = vadd.f32 %v7618_v53, %v3201_v9  ;;  %v8984_v28 = vld [vmem:[#allocation182_spill] sm:$0xff] }
 0x4d3   :  { %v3520_v34 = vmax.f32 %v3518_v51, %v3519_v47  ;;  %v3316_v6 = vpop.permute.xlu1 %3315  ;;  %v3217_v35 = vadd.f32 %v7430_v0, %v8984_v28  ;;  %v3233_v51 = vadd.f32 %v7510_v45, %v7044_v29  ;;  %v8986_v0 = vld [vmem:[#allocation172_spill] sm:$0xff]  ;;  %v8996_v9 = vld [vmem:[#allocation198_spill] sm:$0xff] }
 0x4d4   :  { %v3471_v2 = vadd.f32 %v3316_v6, %v3215_v48  ;;  %v3543_v49 = vsel %vm3499_vm10, %v3457_v21, -inf  ;;  %v3202_v29 = vadd.f32 %v7396_v57, %v8986_v0 }
 0x4d5   :  { %v3614_v14 = vmax.f32 %v3520_v34, 0.0  ;;  %v3489_v53 = vadd.f32 %v7678_v62, %v3233_v51  ;;  %v7745_v34 = vpop.permute.xlu0 %3297  ;;  %v8987_v62 = vld [vmem:[#allocation58_spill] sm:$0xff] }
 0x4d6   :  { %v3531_v4 = vsel %vm3499_vm10, %v3471_v2, -inf  ;;  %v3458_v31 = vadd.f32 %v7634_v43, %v3202_v29  ;;  %v3234_v2 = vadd.f32 %v8987_v62, %v7060_v33  ;;  %v8992_v33 = vld [vmem:[#allocation185_spill] sm:$0xff] }
 0x4d7   :  { %v3532_v40 = vmax.f32 %v3530_v36, %v3531_v4  ;;  %v3256_v19 = vpop.permute.xlu1 %3255  ;;  %3648 = vrot.lane.b32.xlu0 %v3614_v14, %s4202_s16  ;;  %v3547_v5 = vsel %vm3499_vm10, %v3489_v53, -inf  ;;  %v8988_v14 = vld [vmem:[#allocation31_spill] sm:$0xff] }
 0x4d8   :  { %v3441_v42 = vadd.f32 %v3256_v19, %v3185_v22  ;;  %v3218_v7 = vadd.f32 %v8989_v17, %v8988_v14  ;;  %v8990_v19 = vld [vmem:[#allocation18_spill] sm:$0xff]  ;;  %v3550_v54 = vsel %vm3499_vm10, %v3458_v31, -inf  ;;  %v3490_v43 = vadd.f32 %v7706_v27, %v3234_v2  ;;  %v8994_v27 = vld [vmem:[#allocation183_spill] sm:$0xff]  ;;  %v9005_v31 = vld [vmem:[#allocation236_spill] sm:$0xff] }
 0x4d9   :  { %v3534_v12 = vmax.f32 %v3532_v40, %v3533_v38  ;;  %v3358_v4 = vpop.permute.xlu0 %3357  ;;  %v3187_v38 = vadd.f32 %v8991_v11, %v8990_v19  ;;  %v9006_v14 = vld [vmem:[#allocation19_spill] sm:$0xff]  ;;  %v9007_v17 = vld [vmem:[#allocation98_spill] sm:$0xff] }
 0x4da   :  { %v3542_v24 = vsel %vm3499_vm10, %v3441_v42, -inf  ;;  %v3554_v10 = vsel %vm3499_vm10, %v3490_v43, -inf  ;;  %v8997_v42 = vld [vmem:[#allocation163_spill] sm:$0xff]  ;;  %v9008_v11 = vld [vmem:[#allocation26_spill] sm:$0xff] }
 0x4db   :  { %v3616_v13 = vmax.f32 %v3534_v12, 0.0  ;;  %v3318_v50 = vpop.permute.xlu1 %3317  ;;  %v3544_v6 = vmax.f32 %v3542_v24, %v3543_v49 }
 0x4dc   :  { %v3472_v56 = vadd.f32 %v3318_v50, %v3216_v61  ;;  %v3203_v61 = vadd.f32 %v8993_v3, %v8992_v33 }
 0x4dd   :  { %3652 = vrot.lane.b32.xlu0 %v3616_v13, %s4202_s16  ;;  %v7768_v52 = vpop.permute.xlu0 %3299 }
 0x4de   :  { %v3538_v59 = vsel %vm3499_vm10, %v3472_v56, -inf  ;;  %v3459_v22 = vadd.f32 %v7667_v25, %v3203_v61 }
 0x4df   :  { %v3539_v32 = vmax.f32 %v3537_v41, %v3538_v59  ;;  %v3258_v18 = vpop.permute.xlu1 %3257  ;;  %v8995_v41 = vld [vmem:[#allocation222_spill] sm:$0xff]  ;;  %v3235_v59 = vadd.f32 %v8997_v42, %v8996_v9  ;;  %v9014_v9 = vld [vmem:[#allocation151_spill] sm:$0xff]  ;;  %v9015_v42 = vld [vmem:[#allocation221_spill] sm:$0xff] }
 0x4e0   :  { %v3442_v45 = vadd.f32 %v3258_v18, %v3186_v20  ;;  %v3219_v23 = vadd.f32 %v8995_v41, %v8994_v27  ;;  %v3557_v25 = vsel %vm3499_vm10, %v3459_v22, -inf  ;;  %v9013_v22 = vld [vmem:[#allocation230_spill] sm:$0xff] }
 0x4e1   :  { %v3541_v44 = vmax.f32 %v3539_v32, %v3540_v58  ;;  %v8998_v58 = vld [vmem:[#allocation154_spill] sm:$0xff]  ;;  %v3360_v53 = vpop.permute.xlu0 %3359 }
 0x4e2   :  { %v3549_v16 = vsel %vm3499_vm10, %v3442_v45, -inf  ;;  %v9002_v45 = vld [vmem:[#allocation201_spill] sm:$0xff] }
 0x4e3   :  { %v3617_v15 = vmax.f32 %v3541_v44, 0.0  ;;  %v3320_v48 = vpop.permute.xlu1 %3319  ;;  %v3551_v12 = vmax.f32 %v3549_v16, %v3550_v54  ;;  %v8999_v44 = vld [vmem:[#allocation220_spill] sm:$0xff] }
 0x4e4   :  { %v3473_v47 = vadd.f32 %v3320_v48, %v3217_v35  ;;  %v3188_v28 = vadd.f32 %v8999_v44, %v8998_v58  ;;  %v3491_v35 = vadd.f32 %v3356_v26, %v3235_v59  ;;  %v9001_v48 = vld [vmem:[#allocation229_spill] sm:$0xff]  ;;  %v3190_v59 = vadd.f32 %v9015_v42, %v9014_v9  ;;  %v9016_v58 = vld [vmem:[#allocation175_spill] sm:$0xff]  ;;  %v9033_v9 = vld [vmem:[#allocation232_spill] sm:$0xff] }
 0x4e5   :  { %3654 = vrot.lane.b32.xlu1 %v3617_v15, %s4202_s16  ;;  %v9000_v15 = vld [vmem:[#allocation186_spill] sm:$0xff]  ;;  %v9017_v44 = vld [vmem:[#allocation231_spill] sm:$0xff] }
 0x4e6   :  { %v3545_v8 = vsel %vm3499_vm10, %v3473_v47, -inf  ;;  %v3204_v1 = vadd.f32 %v9001_v48, %v9000_v15  ;;  %v3561_v29 = vsel %vm3499_vm10, %v3491_v35, -inf }
 0x4e7   :  { %v3546_v55 = vmax.f32 %v3544_v6, %v3545_v8  ;;  %v3260_v30 = vpop.permute.xlu1 %3259  ;;  %v9003_v8 = vld [vmem:[#allocation239_spill] sm:$0xff] }
 0x4e8   :  { %v3443_v37 = vadd.f32 %v3260_v30, %v3187_v38  ;;  %v3460_v0 = vadd.f32 %v7693_v39, %v3204_v1  ;;  %v3236_v26 = vadd.f32 %v9003_v8, %v9002_v45  ;;  %v9004_v30 = vld [vmem:[#allocation184_spill] sm:$0xff]  ;;  %v9009_v38 = vld [vmem:[#allocation54_spill] sm:$0xff] }
 0x4e9   :  { %v3548_v36 = vmax.f32 %v3546_v55, %v3547_v5  ;;  %v3220_v5 = vadd.f32 %v9005_v31, %v9004_v30  ;;  %v3205_v54 = vadd.f32 %v9009_v38, %v9008_v11  ;;  %v9018_v1 = vld [vmem:[#allocation40_spill] sm:$0xff]  ;;  %v9023_v30 = vld [vmem:[#allocation223_spill] sm:$0xff] }
 0x4ea   :  { %v3556_v32 = vsel %vm3499_vm10, %v3443_v37, -inf  ;;  %v3564_v16 = vsel %vm3499_vm10, %v3460_v0, -inf  ;;  %v9021_v0 = vld [vmem:[#allocation56_spill] sm:$0xff] }
 0x4eb   :  { %v3618_v57 = vmax.f32 %v3548_v36, 0.0  ;;  %v3322_v40 = vpop.permute.xlu1 %3321  ;;  %v3558_v24 = vmax.f32 %v3556_v32, %v3557_v25  ;;  %v3461_v3 = vadd.f32 %v7721_v46, %v3205_v54 }
 0x4ec   :  { %v3474_v63 = vadd.f32 %v3322_v40, %v3218_v7  ;;  %v3189_v7 = vadd.f32 %v9007_v17, %v9006_v14  ;;  %v7792_v40 = vpop.permute.xlu0 %3301  ;;  %v9025_v14 = vld [vmem:[#allocation164_spill] sm:$0xff] }
 0x4ed   :  { %3656 = vrot.lane.b32.xlu0 %v3618_v57, %s4202_s16  ;;  %v3492_v57 = vadd.f32 %v3358_v4, %v3236_v26  ;;  %v9010_v4 = vld [vmem:[#allocation30_spill] sm:$0xff]  ;;  %v3571_v32 = vsel %vm3499_vm10, %v3461_v3, -inf  ;;  %v9029_v3 = vld [vmem:[#allocation156_spill] sm:$0xff] }
 0x4ee   :  { %v3552_v13 = vsel %vm3499_vm10, %v3474_v63, -inf }
 0x4ef   :  { %v3553_v50 = vmax.f32 %v3551_v12, %v3552_v13  ;;  %v3262_v60 = vpop.permute.xlu1 %3261  ;;  %v3568_v61 = vsel %vm3499_vm10, %v3492_v57, -inf  ;;  %v9011_v13 = vld [vmem:[#allocation97_spill] sm:$0xff] }
 0x4f0   :  { %v3444_v20 = vadd.f32 %v3262_v60, %v3188_v28  ;;  %v9012_v60 = vld [vmem:[#allocation39_spill] sm:$0xff]  ;;  %v3362_v27 = vpop.permute.xlu0 %3361  ;;  %v3206_v28 = vadd.f32 %v9017_v44, %v9016_v58  ;;  %v9034_v44 = vld [vmem:[#allocation209_spill] sm:$0xff] }
 0x4f1   :  { %v3555_v56 = vmax.f32 %v3553_v50, %v3554_v10  ;;  %v3221_v50 = vadd.f32 %v9011_v13, %v9010_v4  ;;  %v3237_v10 = vadd.f32 %v9013_v22, %v9012_v60  ;;  %v9031_v60 = vld [vmem:[#allocation224_spill] sm:$0xff] }
 0x4f2   :  { %v3563_v62 = vsel %vm3499_vm10, %v3444_v20, -inf  ;;  %v3462_v15 = vadd.f32 %v7745_v34, %v3206_v28  ;;  %v9019_v20 = vld [vmem:[#allocation115_spill] sm:$0xff]  ;;  %v9035_v28 = vld [vmem:[#allocation242_spill] sm:$0xff] }
 0x4f3   :  { %v3619_v18 = vmax.f32 %v3555_v56, 0.0  ;;  %v3324_v21 = vpop.permute.xlu1 %3323  ;;  %v3565_v19 = vmax.f32 %v3563_v62, %v3564_v16  ;;  %v3493_v46 = vadd.f32 %v3360_v53, %v3237_v10 }
 0x4f4   :  { %v3475_v51 = vadd.f32 %v3324_v21, %v3219_v23  ;;  %v3304_v53 = vpop.permute.xlu0 %3303 }
 0x4f5   :  { %3658 = vrot.lane.b32.xlu1 %v3619_v18, %s4202_s16  ;;  %v3575_v48 = vsel %vm3499_vm10, %v3493_v46, -inf }
 0x4f6   :  { %v3559_v49 = vsel %vm3499_vm10, %v3475_v51, -inf }
 0x4f7   :  { %v3560_v47 = vmax.f32 %v3558_v24, %v3559_v49  ;;  %v3264_v6 = vpop.permute.xlu1 %3263  ;;  %v3238_v49 = vadd.f32 %v9019_v20, %v9018_v1 }
 0x4f8   :  { %v3445_v43 = vadd.f32 %v3264_v6, %v3189_v7  ;;  %v9020_v6 = vld [vmem:[#allocation187_spill] sm:$0xff]  ;;  %v3364_v57 = vpop.permute.xlu0 %3363 }
 0x4f9   :  { %v3562_v55 = vmax.f32 %v3560_v47, %v3561_v29  ;;  %v3222_v29 = vadd.f32 %v9021_v0, %v9020_v6  ;;  %v3494_v34 = vadd.f32 %v3362_v27, %v3238_v49  ;;  %v9039_v6 = vld [vmem:[#allocation225_spill] sm:$0xff] }
 0x4fa   :  { %v3570_v56 = vsel %vm3499_vm10, %v3445_v43, -inf  ;;  %v9026_v43 = vld [vmem:[#allocation32_spill] sm:$0xff] }
 0x4fb   :  { %v3620_v2 = vmax.f32 %v3562_v55, 0.0  ;;  %v3326_v36 = vpop.permute.xlu1 %3325  ;;  %v3572_v21 = vmax.f32 %v3570_v56, %v3571_v32  ;;  %v9022_v55 = vld [vmem:[#allocation165_spill] sm:$0xff]  ;;  %v3582_v38 = vsel %vm3499_vm10, %v3494_v34, -inf }
 0x4fc   :  { %v3476_v39 = vadd.f32 %v3326_v36, %v3220_v5  ;;  %v3191_v31 = vadd.f32 %v9023_v30, %v9022_v55  ;;  %v3578_v5 = vsel %vm3499_vm10, %v3462_v15, -inf  ;;  %v9024_v36 = vld [vmem:[#allocation28_spill] sm:$0xff]  ;;  %v3306_v27 = vpop.permute.xlu0 %3305  ;;  %v9041_v55 = vld [vmem:[#allocation234_spill] sm:$0xff] }
 0x4fd   :  { %3660 = vrot.lane.b32.xlu0 %v3620_v2, %s4202_s16  ;;  %v3207_v17 = vadd.f32 %v9025_v14, %v9024_v36 }
 0x4fe   :  { %v3566_v63 = vsel %vm3499_vm10, %v3476_v39, -inf }
 0x4ff   :  { %v3567_v12 = vmax.f32 %v3565_v19, %v3566_v63  ;;  %v3266_v33 = vpop.permute.xlu1 %3265  ;;  %v3463_v11 = vadd.f32 %v7768_v52, %v3207_v17  ;;  %v9027_v63 = vld [vmem:[#allocation226_spill] sm:$0xff] }
 0x500   :  { %v3446_v25 = vadd.f32 %v3266_v33, %v3190_v59  ;;  %v9028_v33 = vld [vmem:[#allocation207_spill] sm:$0xff]  ;;  %v3366_v1 = vpop.permute.xlu0 %3365 }
 0x501   :  { %v3569_v37 = vmax.f32 %v3567_v12, %v3568_v61  ;;  %v3223_v12 = vadd.f32 %v9027_v63, %v9026_v43  ;;  %v3239_v61 = vadd.f32 %v9029_v3, %v9028_v33  ;;  %v3585_v10 = vsel %vm3499_vm10, %v3463_v11, -inf  ;;  %v9049_v33 = vld [vmem:[#allocation53_spill] sm:$0xff] }
 0x502   :  { %v3577_v45 = vsel %vm3499_vm10, %v3446_v25, -inf  ;;  %v3240_v25 = vadd.f32 %v9035_v28, %v9034_v44 }
 0x503   :  { %v3621_v41 = vmax.f32 %v3569_v37, 0.0  ;;  %v3328_v23 = vpop.permute.xlu1 %3327  ;;  %v3579_v2 = vmax.f32 %v3577_v45, %v3578_v5  ;;  %v3495_v56 = vadd.f32 %v3364_v57, %v3239_v61 }
 0x504   :  { %v3477_v18 = vadd.f32 %v3328_v23, %v3221_v50  ;;  %v9030_v50 = vld [vmem:[#allocation179_spill] sm:$0xff]  ;;  %v9032_v23 = vld [vmem:[#allocation176_spill] sm:$0xff]  ;;  %v3368_v14 = vpop.permute.xlu0 %3367 }
 0x505   :  { %3662 = vrot.lane.b32.xlu1 %v3621_v41, %s4202_s16  ;;  %v3192_v22 = vadd.f32 %v9031_v60, %v9030_v50  ;;  %v3208_v42 = vadd.f32 %v9033_v9, %v9032_v23  ;;  %v3589_v58 = vsel %vm3499_vm10, %v3495_v56, -inf }
 0x506   :  { %v3573_v35 = vsel %vm3499_vm10, %v3477_v18, -inf }
 0x507   :  { %v3574_v51 = vmax.f32 %v3572_v21, %v3573_v35  ;;  %v3268_v24 = vpop.permute.xlu1 %3267  ;;  %v3464_v21 = vadd.f32 %v7792_v40, %v3208_v42  ;;  %v3496_v40 = vadd.f32 %v3366_v1, %v3240_v25 }
 0x508   :  { %v3447_v7 = vadd.f32 %v3268_v24, %v3191_v31  ;;  %v9037_v24 = vld [vmem:[#allocation237_spill] sm:$0xff] }
 0x509   :  { %v3576_v47 = vmax.f32 %v3574_v51, %v3575_v48  ;;  %v9036_v51 = vld [vmem:[#allocation188_spill] sm:$0xff]  ;;  %v3596_v36 = vsel %vm3499_vm10, %v3496_v40, -inf }
 0x50a   :  { %v3584_v37 = vsel %vm3499_vm10, %v3447_v7, -inf  ;;  %v3224_v15 = vadd.f32 %v9037_v24, %v9036_v51  ;;  %v9042_v7 = vld [vmem:[#allocation194_spill] sm:$0xff] }
 0x50b   :  { %v3622_v8 = vmax.f32 %v3576_v47, 0.0  ;;  %v3330_v26 = vpop.permute.xlu1 %3329  ;;  %v3586_v41 = vmax.f32 %v3584_v37, %v3585_v10  ;;  %v9038_v47 = vld [vmem:[#allocation169_spill] sm:$0xff]  ;;  %v9051_v10 = vld [vmem:[#allocation238_spill] sm:$0xff] }
 0x50c   :  { %v3478_v62 = vadd.f32 %v3330_v26, %v3222_v29  ;;  %v3193_v0 = vadd.f32 %v9039_v6, %v9038_v47  ;;  %v3592_v29 = vsel %vm3499_vm10, %v3464_v21, -inf  ;;  %v9040_v26 = vld [vmem:[#allocation191_spill] sm:$0xff] }
 0x50d   :  { %3664 = vrot.lane.b32.xlu0 %v3622_v8, %s4202_s16  ;;  %v3209_v30 = vadd.f32 %v9041_v55, %v9040_v26  ;;  %v9052_v21 = vld [vmem:[#allocation211_spill] sm:$0xff]  ;;  %v9061_v26 = vld [vmem:[#allocation202_spill] sm:$0xff] }
 0x50e   :  { %v3580_v16 = vsel %vm3499_vm10, %v3478_v62, -inf }
 0x50f   :  { %v3581_v39 = vmax.f32 %v3579_v2, %v3580_v16  ;;  %v3270_v19 = vpop.permute.xlu1 %3269  ;;  %v3465_v2 = vadd.f32 %v3304_v53, %v3209_v30  ;;  %v9043_v16 = vld [vmem:[#allocation22_spill] sm:$0xff] }
 0x510   :  { %v3448_v59 = vadd.f32 %v3270_v19, %v3192_v22  ;;  %v3225_v57 = vadd.f32 %v9043_v16, %v9042_v7  ;;  %v9045_v19 = vld [vmem:[#allocation233_spill] sm:$0xff]  ;;  %v9050_v22 = vld [vmem:[#allocation35_spill] sm:$0xff]  ;;  %v9070_v16 = vld [vmem:[#allocation206_spill] sm:$0xff] }
 0x511   :  { %v3583_v54 = vmax.f32 %v3581_v39, %v3582_v38  ;;  %v9044_v39 = vld [vmem:[#allocation46_spill] sm:$0xff]  ;;  %v9046_v38 = vld [vmem:[#allocation171_spill] sm:$0xff]  ;;  %v3599_v37 = vsel %vm3499_vm10, %v3465_v2, -inf  ;;  %v3226_v56 = vadd.f32 %v9051_v10, %v9050_v22  ;;  %v9066_v2 = vld [vmem:[#allocation204_spill] sm:$0xff] }
 0x512   :  { %v3591_v48 = vsel %vm3499_vm10, %v3448_v59, -inf  ;;  %v3241_v11 = vadd.f32 %v9045_v19, %v9044_v39  ;;  %v9069_v7 = vld [vmem:[#allocation41_spill] sm:$0xff]  ;;  %v9072_v19 = vld [vmem:[#allocation43_spill] sm:$0xff] }
 0x513   :  { %v3623_v4 = vmax.f32 %v3583_v54, 0.0  ;;  %v3332_v13 = vpop.permute.xlu1 %3331  ;;  %v3593_v8 = vmax.f32 %v3591_v48, %v3592_v29  ;;  %v9047_v54 = vld [vmem:[#allocation227_spill] sm:$0xff]  ;;  %v9058_v29 = vld [vmem:[#allocation200_spill] sm:$0xff]  ;;  %v9084_v22 = vld [vmem:[#allocation49_spill] sm:$0xff] }
 0x514   :  { %v3479_v52 = vadd.f32 %v3332_v13, %v3223_v12  ;;  %v3194_v43 = vadd.f32 %v9047_v54, %v9046_v38  ;;  %v9048_v12 = vld [vmem:[#allocation177_spill] sm:$0xff] }
 0x515   :  { %3666 = vrot.lane.b32.xlu1 %v3623_v4, %s4202_s16  ;;  %v3210_v3 = vadd.f32 %v9049_v33, %v9048_v12  ;;  %v3497_v4 = vadd.f32 %v3368_v14, %v3241_v11  ;;  %v9073_v11 = vld [vmem:[#allocation42_spill] sm:$0xff]  ;;  %v9085_v10 = vld [vmem:[#allocation93_spill] sm:$0xff] }
 0x516   :  { %v3587_v32 = vsel %vm3499_vm10, %v3479_v52, -inf  ;;  %v9074_v38 = vmax.f32 %v9072_v19, %v9073_v11 }
 0x517   :  { %v3588_v46 = vmax.f32 %v3586_v41, %v3587_v32  ;;  %v3272_v18 = vpop.permute.xlu1 %3271  ;;  %v3466_v52 = vadd.f32 %v3306_v27, %v3210_v3  ;;  %v3603_v42 = vsel %vm3499_vm10, %v3497_v4, -inf  ;;  %v9078_v3 = vld [vmem:[#allocation45_spill] sm:$0xff]  ;;  %v9081_v4 = vld [vmem:[#allocation210_spill] sm:$0xff] }
 0x518   :  { %v3449_v31 = vadd.f32 %v3272_v18, %v3193_v0  ;;  %v9057_v0 = vld [vmem:[#allocation199_spill] sm:$0xff]  ;;  %v2945_v54 = vmax.f32 %v9074_v38, 0.0 }
 0x519   :  { %v3590_v35 = vmax.f32 %v3588_v46, %v3589_v58  ;;  %v3606_v18 = vsel %vm3499_vm10, %v3466_v52, -inf  ;;  %v9053_v58 = vld [vmem:[#allocation117_spill] sm:$0xff]  ;;  %v9059_v40 = vmax.f32 %v9057_v0, %v9058_v29 }
 0x51a   :  { %v3598_v63 = vsel %vm3499_vm10, %v3449_v31, -inf  ;;  %v3242_v44 = vadd.f32 %v9053_v58, %v9052_v21  ;;  %v9063_v31 = vld [vmem:[#allocation38_spill] sm:$0xff]  ;;  %v9093_v21 = vld [vmem:[#allocation216_spill] sm:$0xff]  ;;  %v9094_v58 = vld [vmem:[#allocation217_spill] sm:$0xff] }
 0x51b   :  { %v3624_v20 = vmax.f32 %v3590_v35, 0.0  ;;  %v3334_v49 = vpop.permute.xlu1 %3333  ;;  %v3600_v60 = vmax.f32 %v3598_v63, %v3599_v37  ;;  %v9076_v63 = vld [vmem:[#allocation208_spill] sm:$0xff] }
 0x51c   :  { %v3480_v45 = vadd.f32 %v3334_v49, %v3224_v15  ;;  %v9055_v49 = vld [vmem:[#allocation36_spill] sm:$0xff] }
 0x51d   :  { %3668 = vrot.lane.b32.xlu0 %v3624_v20, %s4202_s16  ;;  %v9054_v20 = vld [vmem:[#allocation197_spill] sm:$0xff] }
 0x51e   :  { %v3594_v5 = vsel %vm3499_vm10, %v3480_v45, -inf  ;;  %v9056_v47 = vmax.f32 %v9054_v20, %v9055_v49  ;;  %v2940_v45 = vmax.f32 %v9059_v40, 0.0 }
 0x51f   :  { %v3595_v34 = vmax.f32 %v3593_v8, %v3594_v5  ;;  %v3274_v62 = vpop.permute.xlu1 %3273  ;;  %v9060_v8 = vld [vmem:[#allocation37_spill] sm:$0xff]  ;;  %v9064_v5 = vld [vmem:[#allocation203_spill] sm:$0xff] }
 0x520   :  { %v3450_v13 = vadd.f32 %v3274_v62, %v3194_v43  ;;  %v2939_v6 = vmax.f32 %v9056_v47, 0.0  ;;  %v9062_v55 = vmax.f32 %v9060_v8, %v9061_v26  ;;  %v9075_v43 = vld [vmem:[#allocation44_spill] sm:$0xff] }
 0x521   :  { %v3597_v17 = vmax.f32 %v3595_v34, %v3596_v36  ;;  %v9065_v34 = vmax.f32 %v9063_v31, %v9064_v5  ;;  %v9067_v36 = vld [vmem:[#allocation205_spill] sm:$0xff]  ;;  %v9077_v12 = vmax.f32 %v9075_v43, %v9076_v63 }
 0x522   :  { %v3605_v59 = vsel %vm3499_vm10, %v3450_v13, -inf  ;;  %v2941_v30 = vmax.f32 %v9062_v55, 0.0  ;;  %v9068_v14 = vmax.f32 %v9066_v2, %v9067_v36  ;;  %v9082_v13 = vld [vmem:[#allocation48_spill] sm:$0xff] }
 0x523   :  { %v3625_v61 = vmax.f32 %v3597_v17, 0.0  ;;  %v3336_v53 = vpop.permute.xlu1 %3335  ;;  %v3607_v25 = vmax.f32 %v3605_v59, %v3606_v18  ;;  %v2942_v62 = vmax.f32 %v9065_v34, 0.0  ;;  %v2946_v33 = vmax.f32 %v9077_v12, 0.0  ;;  %v9090_v59 = vld [vmem:[#allocation50_spill] sm:$0xff] }
 0x524   :  { %v3481_v50 = vadd.f32 %v3336_v53, %v3225_v57  ;;  %v2943_v17 = vmax.f32 %v9068_v14, 0.0  ;;  %v9071_v57 = vmax.f32 %v9069_v7, %v9070_v16 }
 0x525   :  { %3670 = vrot.lane.b32.xlu1 %v3625_v61, %s4202_s16  ;;  %v9079_v61 = vld [vmem:[#allocation47_spill] sm:$0xff] }
 0x526   :  { %v3601_v41 = vsel %vm3499_vm10, %v3481_v50, -inf  ;;  %v2944_v39 = vmax.f32 %v9071_v57, 0.0  ;;  %v9080_v53 = vmax.f32 %v9078_v3, %v9079_v61  ;;  %v9083_v50 = vmax.f32 %v9081_v4, %v9082_v13 }
 0x527   :  { %v3602_v23 = vmax.f32 %v3600_v60, %v3601_v41  ;;  %v3338_v9 = vpop.permute.xlu1 %3337  ;;  %v9087_v41 = vld [vmem:[#allocation212_spill] sm:$0xff] }
 0x528   :  { %v3482_v32 = vadd.f32 %v3338_v9, %v3226_v56  ;;  %v2947_v37 = vmax.f32 %v9080_v53, 0.0  ;;  %v2948_v60 = vmax.f32 %v9083_v50, 0.0  ;;  %v9086_v56 = vmax.f32 %v9084_v22, %v9085_v10 }
 0x529   :  { %v3604_v46 = vmax.f32 %v3602_v23, %v3603_v42  ;;  %v9088_v23 = vld [vmem:[#allocation51_spill] sm:$0xff] }
 0x52a   :  { %v3608_v28 = vsel %vm3499_vm10, %v3482_v32, -inf  ;;  %v2949_v52 = vmax.f32 %v9086_v56, 0.0  ;;  %v9089_v9 = vmax.f32 %v9087_v41, %v9088_v23  ;;  %v9091_v32 = vld [vmem:[#allocation213_spill] sm:$0xff] }
 0x52b   :  { %v3626_v35 = vmax.f32 %v3604_v46, 0.0  ;;  %v3370_v27 = vpop.permute.xlu1 %3369  ;;  %v3609_v24 = vmax.f32 %v3607_v25, %v3608_v28  ;;  %v9092_v46 = vmax.f32 %v9090_v59, %v9091_v32  ;;  %v9096_v25 = vld [vmem:[#allocation52_spill] sm:$0xff] }
 0x52c   :  { %v3498_v51 = vadd.f32 %v3370_v27, %v3242_v44  ;;  %v2950_v42 = vmax.f32 %v9089_v9, 0.0  ;;  %v9095_v44 = vmax.f32 %v9093_v21, %v9094_v58 }
 0x52d   :  { %3672 = vrot.lane.b32.xlu0 %v3626_v35, %s4202_s16  ;;  %v2951_v18 = vmax.f32 %v9092_v46, 0.0  ;;  %v9097_v35 = vld [vmem:[#allocation214_spill] sm:$0xff] }
 0x52e   :  { %v3610_v15 = vsel %vm3499_vm10, %v3498_v51, -inf  ;;  %v2952_v28 = vmax.f32 %v9095_v44, 0.0  ;;  %v9098_v27 = vmax.f32 %v9096_v25, %v9097_v35 }
 0x52f   :  { %v3611_v48 = vmax.f32 %v3609_v24, %v3610_v15  ;;  %v9099_v24 = vld [vmem:[#allocation215_spill] sm:$0xff]  ;;  %v9100_v15 = vld [vmem:[#allocation218_spill] sm:$0xff] }
 0x530   :  { %v2953_v51 = vmax.f32 %v9098_v27, 0.0 }
 0x531   :  { %v3627_v1 = vmax.f32 %v3611_v48, 0.0  ;;  %v9101_v48 = vmax.f32 %v9099_v24, %v9100_v15 }
 0x533   :  { %3674 = vrot.lane.b32.xlu1 %v3627_v1, %s4202_s16  ;;  %v2954_v1 = vmax.f32 %v9101_v48, 0.0 }
 0x539   :  { %v3647_v49 = vpop.permute.xlu1 %3646 }
 0x53d   :  { %v3645_v20 = vpop.permute.xlu0 %3644 }
 0x549   :  { %v3649_v47 = vpop.permute.xlu0 %3648 }
 0x54b   :  { %2955 = vxpose.xlu0.b32.start [1/16] (narrow) %v2939_v6, 8  ;;  %v3651_v6 = vpop.permute.xlu1 %3650 }
 0x54f   :  { %2956 = vxpose.xlu0.b32.cont [2/16] (narrow) %v2940_v45, 8  ;;  %v3653_v0 = vpop.permute.xlu0 %3652 }
 0x553   :  { %2957 = vxpose.xlu0.b32.cont [3/16] (narrow) %v2941_v30, 8 }
 0x557   :  { %2958 = vxpose.xlu0.b32.cont [4/16] (narrow) %v2942_v62, 8  ;;  %v3655_v29 = vpop.permute.xlu1 %3654 }
 0x55b   :  { %2959 = vxpose.xlu0.b32.cont [5/16] (narrow) %v2943_v17, 8 }
 0x55f   :  { %2960 = vxpose.xlu0.b32.cont [6/16] (narrow) %v2944_v39, 8  ;;  %v3657_v40 = vpop.permute.xlu0 %3656 }
 0x563   :  { %2961 = vxpose.xlu0.b32.cont [7/16] (narrow) %v2945_v54, 8 }
 0x567   :  { %2962 = vxpose.xlu0.b32.cont [8/16] (narrow) %v2946_v33, 8  ;;  %v3659_v45 = vpop.permute.xlu1 %3658 }
 0x56b   :  { %2963 = vxpose.xlu0.b32.cont [9/16] (narrow) %v2947_v37, 8 }
 0x56f   :  { %2964 = vxpose.xlu0.b32.cont [10/16] (narrow) %v2948_v60, 8  ;;  %v3661_v8 = vpop.permute.xlu0 %3660 }
 0x573   :  { %2965 = vxpose.xlu0.b32.cont [11/16] (narrow) %v2949_v52, 8 }
 0x577   :  { %2966 = vxpose.xlu0.b32.cont [12/16] (narrow) %v2950_v42, 8  ;;  %v3663_v26 = vpop.permute.xlu1 %3662 }
 0x57b   :  { %2967 = vxpose.xlu0.b32.cont [13/16] (narrow) %v2951_v18, 8 }
 0x57f   :  { %2968 = vxpose.xlu0.b32.cont [14/16] (narrow) %v2952_v28, 8  ;;  %v3665_v55 = vpop.permute.xlu0 %3664 }
 0x583   :  { %2969 = vxpose.xlu0.b32.cont [15/16] (narrow) %v2953_v51, 8 }
 0x587   :  { %2970 = vxpose.xlu0.b32.end [16/16] (narrow) %v2954_v1, 8  ;;  %v3667_v30 = vpop.permute.xlu1 %3666 }
 0x58b   :  { %3692 = vxpose.xlu0.b32.start [1/16] (narrow) %v3645_v20, 8 }
 0x58f   :  { %3693 = vxpose.xlu0.b32.cont [2/16] (narrow) %v3647_v49, 8  ;;  %v3669_v31 = vpop.permute.xlu0 %3668 }
 0x593   :  { %3694 = vxpose.xlu0.b32.cont [3/16] (narrow) %v3649_v47, 8 }
 0x597   :  { %3695 = vxpose.xlu0.b32.cont [4/16] (narrow) %v3651_v6, 8  ;;  %v3671_v5 = vpop.permute.xlu1 %3670 }
 0x59b   :  { %3696 = vxpose.xlu0.b32.cont [5/16] (narrow) %v3653_v0, 8 }
 0x59f   :  { %3697 = vxpose.xlu0.b32.cont [6/16] (narrow) %v3655_v29, 8  ;;  %v3673_v34 = vpop.permute.xlu0 %3672 }
 0x5a3   :  { %3698 = vxpose.xlu0.b32.cont [7/16] (narrow) %v3657_v40, 8 }
 0x5a5   :  { %v3675_v62 = vpop.permute.xlu1 %3674 }
 0x5a7   :  { %3699 = vxpose.xlu0.b32.cont [8/16] (narrow) %v3659_v45, 8 }
 0x5ab   :  { %3700 = vxpose.xlu0.b32.cont [9/16] (narrow) %v3661_v8, 8 }
 0x5af   :  { %3701 = vxpose.xlu0.b32.cont [10/16] (narrow) %v3663_v26, 8 }
 0x5b3   :  { %3702 = vxpose.xlu0.b32.cont [11/16] (narrow) %v3665_v55, 8 }
 0x5b7   :  { %3703 = vxpose.xlu0.b32.cont [12/16] (narrow) %v3667_v30, 8 }
 0x5bb   :  { %3704 = vxpose.xlu0.b32.cont [13/16] (narrow) %v3669_v31, 8 }
 0x5bf   :  { %3705 = vxpose.xlu0.b32.cont [14/16] (narrow) %v3671_v5, 8 }
 0x5c3   :  { %3706 = vxpose.xlu0.b32.cont [15/16] (narrow) %v3673_v34, 8 }
 0x5c7   :  { %3707 = vxpose.xlu0.b32.end [16/16] (narrow) %v3675_v62, 8 }
 0x5cb   :  { %v2971_v2 = vpop.trf.xlu0 }
 0x5cc   :  { %3724 = vst [vmem:[#allocation2] sm:$0xff] %v2971_v2 }
 0x60b   :  { %v3708_v36 = vpop.trf.xlu0 }
 0x60c   :  { %3725 = vst [vmem:[#allocation2 + $0x8] sm:$0xff] %v3708_v36 }
 0x60d   :  { %4185 = shalt.err (!%p4182_p4)
}
 0x60e   :  { %s4186_s23 = scalar_lea.hbm %s7940_s2, 256 }
 0x60f   :  { %p4187_p5 = scmp.ne.s32.totalorder %s7940_s2, %s4186_s23  ;;  %p4190_p6 = scmp.lt.u32.totalorder %s4186_s23, %s7940_s2 }
 0x611   :  { %p4192_p7 = pnand %p4190_p6, %p4187_p5 }
 0x613   :  { %4195 = shalt.err (!%p4192_p7)
}
 0x614   :  { %s4205_s28 = smov 128   ;;  %s4206_s29 = smov 8  }
 0x615   :  { %3737 = dma.vmem_to_hbm [thread:$0]  %s3732_s19, 256, %s7940_s2, [#allocation3], %s4205_s28, %s4205_s28, %s4206_s29  }
 0x616   :  { %4196 = dma.done.wait [#allocation3], 256  }
 0x617   :  { %4197 = vsyncadd [#allocation3], 4294967040 }
 0x618   :  { %3741 = vsyncpa [#allocation3], 1 }

</bundles_post_ra>
